<compile_context>
chip_gen: v5e
topology: v5e:2x2
jax: 0.10.0
libtpu: 0.0.40
codegen_flags: <defaults>
</compile_context>

<pallas_src>
import math

import jax
import jax.numpy as jnp
from jax.experimental import pallas as pl
from jax.experimental.pallas import tpu as pltpu


def _qfm_kernel_factory(n_layers: int, d: int, per_piece_stores: bool):
    """Kernel: x_ref (tm, d) -> o_ref (tm, 2*n_layers*d)."""

    def kernel(x_ref, o_ref):
        # Upcast once; math in f32 (avoids per-op bf16 converts on v5e).
        x = x_ref[...].astype(jnp.float32)

        # One cos + one sin pass over the tile (EUP); every shifted layer is derived
        # with sign flips / swaps (VPU), exact up to pi-rounding:
        #   (cos, sin)(x + k*pi/2), k mod 4 = 0,1,2,3 -> (c,s), (-s,c), (-c,-s), (s,-c)
        c = jnp.cos(x)
        s = jnp.sin(x)
        nc = -c  # dead-code-eliminated when unused (n_layers < 3)
        ns = -s  # dead-code-eliminated when unused (n_layers < 2)
        layer_pieces = [(c, s), (ns, c), (nc, ns), (s, nc)]

        pieces = []
        for i in range(n_layers):
            pieces.extend(layer_pieces[i % 4])

        if per_piece_stores:
            # d is a multiple of 128: every piece lands lane-aligned -> unmasked vst
            # with short live ranges (no single huge concatenated value).
            for k, p in enumerate(pieces):
                o_ref[:, k * d:(k + 1) * d] = p.astype(o_ref.dtype)
        else:
            # Lane-narrow d: assemble one lane-dense row block, single store.
            o_ref[...] = jnp.concatenate(pieces, axis=-1).astype(o_ref.dtype)

    return kernel


def _vmem_capacity_bytes() -> int:
    try:
        return int(pltpu.get_tpu_info().vmem_capacity_bytes)
    except Exception:
        return 64 * 1024 * 1024  # conservative fallback (v7x per-TC capacity)


def _pick_row_tile(m: int, d: int, out_d: int, in_itemsize: int, out_itemsize: int,
                   sublane: int, vmem_budget_bytes: int, tm_max: int = 8192,
                   min_grid_steps: int = 2, min_split_rows: int = 512) -> int:
    """Largest sublane-aligned row tile within the double-buffered VMEM budget,
    capped so the grid keeps >= min_grid_steps steps (v7x 2-TC sharding)."""
    bytes_per_row = 2 * (d * in_itemsize + out_d * out_itemsize)  # double-buffered
    tm = min(tm_max, max(sublane, vmem_budget_bytes // max(bytes_per_row, 1)))

    # Keep at least min_grid_steps grid steps when tiles stay usefully big, so
    # dimension_semantics=("parallel",) can shard rows across both v7x TensorCores.
    split_tm = -(-m // min_grid_steps)
    if split_tm >= min_split_rows:
        split_tm = -(-split_tm // sublane) * sublane
        tm = min(tm, split_tm)

    tm = max(sublane, (tm // sublane) * sublane)   # sublane-aligned
    m_rounded = -(-m // sublane) * sublane
    return min(tm, m_rounded)                      # never exceed the row count


def quantum_feature_map(x: jax.Array, n_layers: int = 2, out_dtype=None) -> jax.Array:
    """x: (..., D) -> (..., 2*n_layers*D), matching PyTorch QuantumFeatureMap.forward.

    out_dtype: optionally store a narrower dtype (e.g. jnp.bfloat16) — stores are
    2*n_layers x the input size, so this cuts total HBM traffic substantially.
    """
    orig_shape = x.shape
    d = orig_shape[-1]
    m = math.prod(orig_shape[:-1]) if len(orig_shape) > 1 else 1
    out_d = 2 * n_layers * d
    out_dtype = jnp.dtype(x.dtype if out_dtype is None else out_dtype)

    x2 = x.reshape(m, d)

    in_itemsize = jnp.dtype(x.dtype).itemsize
    out_itemsize = out_dtype.itemsize
    # Sublane tile: 8 rows f32, 16 bf16, 32 int8/fp8 — use the stricter of in/out so
    # both the loads and the stores stay unmasked and sublane-dense.
    sublane = max(8, 32 // in_itemsize, 32 // out_itemsize)

    vmem_cap = _vmem_capacity_bytes()
    budget = min(32 * 1024 * 1024, vmem_cap // 2)   # per-generation tile budget
    tm = _pick_row_tile(m, d, out_d, in_itemsize, out_itemsize, sublane, budget)

    # Ragged last block is handled by Pallas masking — no pad, no trailing slice.
    grid = (pl.cdiv(m, tm),)

    tile_bytes = 2 * tm * (d * in_itemsize + out_d * out_itemsize)
    vmem_limit = int(min(vmem_cap * 3 // 4,
                         max(32 * 1024 * 1024, tile_bytes + (4 << 20))))

    cost = pl.CostEstimate(
        flops=2 * n_layers * m * d,                 # sign flips / copies (cheap VPU)
        transcendentals=2 * m * d,                  # one cos + one sin per element
        bytes_accessed=m * d * in_itemsize + m * out_d * out_itemsize,
    )

    out = pl.pallas_call(
        _qfm_kernel_factory(n_layers, d, per_piece_stores=(d % 128 == 0)),
        out_shape=jax.ShapeDtypeStruct((m, out_d), out_dtype),
        grid_spec=pltpu.PrefetchScalarGridSpec(
            num_scalar_prefetch=0,
            grid=grid,
            in_specs=[pl.BlockSpec((tm, d), lambda i: (i, 0))],
            out_specs=pl.BlockSpec((tm, out_d), lambda i: (i, 0)),
        ),
        compiler_params=pltpu.CompilerParams(
            dimension_semantics=("parallel",),
            vmem_limit_bytes=vmem_limit,
        ),
        cost_estimate=cost,
    )(x2)

    return out.reshape(*orig_shape[:-1], out_d)


def quantum_feature_map_ref(x: jax.Array, n_layers: int = 2) -> jax.Array:
    """Pure-JAX reference mirroring the PyTorch module literally."""
    feats = []
    for i in range(n_layers):
        feats.append(jnp.cos(x + i * math.pi / 2.0))
        feats.append(jnp.sin(x + i * math.pi / 2.0))
    return jnp.concatenate(feats, axis=-1)


# TODO(synk): the rest of TQVT (ripser-based TopologicalFeatureExtractor, Conv2d patch
# embedding, attention projections / softmax, LayerNorm, mlp_head) is host-side NumPy
# or standard dense XLA; only QuantumFeatureMap is implemented as a Pallas kernel.


if __name__ == "__main__":
    key = jax.random.PRNGKey(0)
    k1, k2 = jax.random.split(key)
    n_layers = 2

    # Per-head usage from TopologicalQuantumAttention: head_dim = dim // n_heads = 32.
    batch, seq, n_heads, head_dim = 2, 8, 8, 32
    q = jax.random.normal(k1, (batch, seq, n_heads, head_dim), dtype=jnp.float32)
    out = jax.block_until_ready(quantum_feature_map(q, n_layers=n_layers))
    ref = quantum_feature_map_ref(q, n_layers=n_layers)
    assert out.shape == (batch, seq, n_heads, 2 * n_layers * head_dim), out.shape
    assert jnp.allclose(out, ref, atol=1e-5, rtol=1e-5), "per-head mismatch vs reference"

    # Lane-dense path: feature dim a multiple of 128 (heads batched into the last dim).
    d_full = 128
    x_full = jax.random.normal(k2, (batch, seq, d_full), dtype=jnp.float32)
    out_full = jax.block_until_ready(quantum_feature_map(x_full, n_layers=n_layers))
    ref_full = quantum_feature_map_ref(x_full, n_layers=n_layers)
    assert out_full.shape == (batch, seq, 2 * n_layers * d_full), out_full.shape
    assert jnp.allclose(out_full, ref_full, atol=1e-5, rtol=1e-5), "full-dim mismatch"

    print("KERNEL_OK")
</pallas_src>

<mosaic_0001>
module attributes {stable_mosaic.version = 11 : i64} {
  func.func @kernel(%arg0: i32, %arg1: memref<128x32xf32, #tpu.memory_space<vmem>>, %arg2: memref<128x128xf32, #tpu.memory_space<vmem>>) attributes {dimension_semantics = [#tpu.dimension_semantics<parallel>], iteration_bounds = array<i64: 1>, scalar_prefetch = 0 : i64, scratch_operands = 0 : i64, tpu.core_type = #tpu.core_type<tc>, window_params = [{transform_indices = @transform_0, window_bounds = array<i64: 128, 32>}, {transform_indices = @transform_1, window_bounds = array<i64: 128, 128>}]} {
    %c0 = arith.constant 0 : index
    %c0_0 = arith.constant 0 : index
    %0 = vector.load %arg1[%c0, %c0_0] : memref<128x32xf32, #tpu.memory_space<vmem>>, vector<128x32xf32>
    %1 = math.cos %0 : vector<128x32xf32>
    %2 = math.sin %0 : vector<128x32xf32>
    %cst = arith.constant 0.000000e+00 : f32
    %3 = vector.broadcast %cst : f32 to vector<128x32xf32>
    %4 = arith.subf %3, %2 : vector<128x32xf32>
    %5 = tpu.concatenate %1, %2, %4, %1 in 1 : vector<128x32xf32>, vector<128x32xf32>, vector<128x32xf32>, vector<128x32xf32> -> vector<128x128xf32>
    %c0_1 = arith.constant 0 : index
    %c0_2 = arith.constant 0 : index
    %6 = vector.load %arg2[%c0_1, %c0_2] : memref<128x128xf32, #tpu.memory_space<vmem>>, vector<128x128xf32>
    tpu.vector_store %arg2[%c0_1, %c0_2], %5 {strides = array<i32>} : memref<128x128xf32, #tpu.memory_space<vmem>>, vector<128x128xf32>,
    return
  }
  func.func @transform_0(%arg0: i32) -> (i32, i32) {
    %c0_i32 = arith.constant 0 : i32
    %c0_i32_0 = arith.constant 0 : i32
    return %arg0, %c0_i32 : i32, i32
  }
  func.func @transform_1(%arg0: i32) -> (i32, i32) {
    %c0_i32 = arith.constant 0 : i32
    %c0_i32_0 = arith.constant 0 : i32
    return %arg0, %c0_i32 : i32, i32
  }
}

</mosaic_0001>

<bundles_post_ra>
// kernel: tpu_custom_call.1
= control target key start
LH: loop header
LB: loop body
LE: loop exit
PB: predicated region body
PF: predicated region fallthrough
CT: control target
= control target key end

     0   :  { %s7838_s0 = inlined_call_operand.vmem [shape: f32[128,32], index: 0, kind: input, shape index: {}]   ;;  %s7839_s1 = inlined_call_operand.hbm [shape: f32[128,128], index: 1, kind: output, shape index: {}]  }
   0x1   :  { %v5426_v0 = vld [vmem:[%s7838_s0 + $0x20] sm:$0xff]  ;;  %v5433_v3 = vld [vmem:[%s7838_s0 + $0x10] sm:$0xff] }
   0x2   :  { %7958 = vst [vmem:[#allocation5_spill] sm:$0xff] %v5426_v0  ;;  %v641_v1 = vand.u32 2147483647, %v5426_v0  ;;  %v644_v2 = vand.u32 2139095040, %v5426_v0  ;;  %v5438_v4 = vld [vmem:[%s7838_s0] sm:$0xff] }
   0x3   :  { %6 = vsyncpa [#allocation3], 0  ;;  %v336_v7 = vand.u32 2139095040, %v5433_v3  ;;  %v333_v8 = vand.u32 2147483647, %v5433_v3  ;;  %v28_v9 = vand.u32 2139095040, %v5438_v4 }
   0x4   :  { %v645_v5 = vshrl.u32 %v644_v2, 23  ;;  %v648_v6 = vand.u32 8388607, %v641_v1  ;;  %v7862_v25 = vmov 683565275   ;;  %s5407_s16 = smov 32  }
   0x5   :  { %v337_v11 = vshrl.u32 %v336_v7, 23  ;;  %v340_v15 = vand.u32 8388607, %v333_v8  ;;  %v29_v16 = vshrl.u32 %v28_v9, 23  ;;  %v7860_v27 = vmov 2475754826  }
   0x6   :  { %v5274_v10 = vadd.s32 4294967169, %v645_v5  ;;  %v649_v12 = vor.u32 8388608, %v648_v6  ;;  %v7858_v29 = vmov 2131351028   ;;  %v7856_v31 = vmov 2102212464  }
   0x7   :  { %v5268_v14 = vadd.s32 4294967169, %v337_v11  ;;  %v341_v22 = vor.u32 8388608, %v340_v15  ;;  %v5449_v23 = vadd.s32 4294967169, %v29_v16  ;;  %v7852_v33 = vmov 920167782   ;;  %s5409_s17 = smov 64  }
   0x8   :  { %v651_v13 = vadd.s32 1, %v5274_v10  ;;  %v5447_v19 = vshll.u32 %v649_v12, 8  ;;  %v7850_v42 = vmov 1326507024   ;;  %s5250_s21 = sshll.u32 %s7839_s1, 4  ;;  %s5411_s22 = smov 128   ;;  %s5251_s21 = int_to_ptr.hbm [resolvable:$true] %s5250_s21 }
   0x9   :  { %v343_v17 = vadd.s32 1, %v5268_v14  ;;  %v5470_v61 = vshll.u32 %v341_v22, 8  ;;  %s5412_s23 = smov 8  }
   0xa   :  { %vm652_vm0 = vcmp.gt.s32.totalorder %v651_v13, 0  ;;  %v690_v35 = vand.u32 65535, %v5447_v19  ;;  %v691_v60 = vshrl.u32 %v5447_v19, 16 }
   0xb   :  { %v653_v18 = vsel %vm652_vm0, %v651_v13, 0  ;;  %vm344_vm1 = vcmp.gt.s32.totalorder %v343_v17, 0 }
   0xc   :  { %v655_v20 = vand.u32 31, %v653_v18  ;;  %v654_v21 = vshrl.u32 %v653_v18, 5  ;;  %v345_v36 = vsel %vm344_vm1, %v343_v17, 0 }
   0xd   :  { %v5464_v49 = vand.u32 31, %v345_v36  ;;  %v5477_v5 = vshrl.u32 %v345_v36, 5 }
   0xe   :  { %v656_v24 = vsub.s32 32, %v655_v20  ;;  %v658_v26 = vshll.u32 %v7862_v25, %v655_v20  ;;  %v661_v28 = vshll.u32 %v7860_v27, %v655_v20  ;;  %v664_v30 = vshll.u32 %v7858_v29, %v655_v20 }
   0xf   :  { %v667_v32 = vshll.u32 %v7856_v31, %v655_v20  ;;  %v670_v34 = vshll.u32 %v7852_v33, %v655_v20  ;;  %vm673_vm2 = vcmp.lt.s32.totalorder %v654_v21, 1  ;;  %vm674_vm3 = vcmp.lt.s32.totalorder %v654_v21, 2 }
  0x10   :  { %v657_v37 = vshrl.u32 %v7862_v25, %v656_v24  ;;  %v659_v38 = vshrl.u32 %v7860_v27, %v656_v24  ;;  %v662_v39 = vshrl.u32 %v7858_v29, %v656_v24  ;;  %v665_v40 = vshrl.u32 %v7856_v31, %v656_v24 }
  0x11   :  { %v668_v41 = vshrl.u32 %v7852_v33, %v656_v24  ;;  %v671_v43 = vshrl.u32 %v7850_v42, %v656_v24  ;;  %vm676_vm4 = vcmp.lt.s32.totalorder %v654_v21, 4  ;;  %vm675_vm5 = vcmp.lt.s32.totalorder %v654_v21, 3 }
  0x12   :  { %v660_v44 = vor.u32 %v659_v38, %v658_v26  ;;  %v663_v45 = vor.u32 %v662_v39, %v661_v28  ;;  %v666_v46 = vor.u32 %v665_v40, %v664_v30  ;;  %v5467_v57 = vsub.s32 32, %v5464_v49 }
  0x13   :  { %v669_v47 = vor.u32 %v668_v41, %v667_v32  ;;  %v672_v48 = vor.u32 %v671_v43, %v670_v34  ;;  %v350_v11 = vshll.u32 %v7862_v25, %v5464_v49  ;;  %v353_v13 = vshll.u32 %v7860_v27, %v5464_v49 }
  0x14   :  { %v677_v50 = vsel %vm673_vm2, %v657_v37, %v660_v44  ;;  %v678_v51 = vsel %vm676_vm4, %v666_v46, 2102212464  ;;  %v681_v52 = vsel %vm673_vm2, %v660_v44, %v663_v45  ;;  %v685_v53 = vsel %vm673_vm2, %v663_v45, %v666_v46 }
  0x15   :  { %v679_v54 = vsel %vm675_vm5, %v663_v45, %v678_v51  ;;  %v682_v55 = vsel %vm676_vm4, %v669_v47, 920167782  ;;  %v686_v56 = vsel %vm676_vm4, %v672_v48, 1326507024  ;;  %v351_v12 = vshrl.u32 %v7860_v27, %v5467_v57 }
  0x16   :  { %v683_v58 = vsel %vm675_vm5, %v666_v46, %v682_v55  ;;  %v687_v59 = vsel %vm675_vm5, %v669_v47, %v686_v56  ;;  %v5473_v62 = vsel %vm674_vm3, %v677_v50, %v679_v54  ;;  %v354_v14 = vshrl.u32 %v7858_v29, %v5467_v57 }
  0x17   :  { %v684_v63 = vsel %vm674_vm3, %v681_v52, %v683_v58  ;;  %v688_v2 = vsel %vm674_vm3, %v685_v53, %v687_v59  ;;  %v356_v18 = vshll.u32 %v7858_v29, %v5464_v49  ;;  %v5489_v41 = vor.u32 %v351_v12, %v350_v11 }
  0x18   :  { %v692_v6 = vand.u32 65535, %v688_v2  ;;  %v693_v7 = vshrl.u32 %v688_v2, 16  ;;  %v714_v9 = vand.u32 65535, %v684_v63  ;;  %v715_v10 = vshrl.u32 %v684_v63, 16 }
  0x19   :  { %v7871_v43 = vmov 0   ;;  %v359_v48 = vshll.u32 %v7856_v31, %v5464_v49  ;;  %v5498_v52 = vor.u32 %v354_v14, %v353_v13  ;;  %v360_v56 = vshrl.u32 %v7852_v33, %v5467_v57 }
  0x1a   :  { %v694_v15 = vmul.u32 %v692_v6, %v690_v35  ;;  %v695_v16 = vmul.u32 %v693_v7, %v690_v35  ;;  %v696_v17 = vmul.u32 %v692_v6, %v691_v60  ;;  %v697_v20 = vmul.u32 %v693_v7, %v691_v60 }
  0x1b   :  { %v716_v21 = vmul.u32 %v714_v9, %v690_v35  ;;  %v717_v22 = vmul.u32 %v715_v10, %v690_v35  ;;  %v718_v24 = vmul.u32 %v714_v9, %v691_v60  ;;  %v719_v32 = vmul.u32 %v715_v10, %v691_v60 }
  0x1c   :  { %v698_v26 = vshll.u32 %v695_v16, 16  ;;  %v699_v28 = vshrl.u32 %v695_v16, 16  ;;  %v700_v30 = vshll.u32 %v696_v17, 16  ;;  %v701_v34 = vshrl.u32 %v696_v17, 16 }
  0x1d   :  { %v720_v36 = vshll.u32 %v717_v22, 16  ;;  %v721_v37 = vshrl.u32 %v717_v22, 16  ;;  %v722_v38 = vshll.u32 %v718_v24, 16  ;;  %v723_v40 = vshrl.u32 %v718_v24, 16 }
  0x1e   :  { %vm702_vm6 = vc.u32 %v694_v15, %v698_v26  ;;  %v704_v39 = vadd.s32 %v698_v26, %v694_v15  ;;  %v357_v35 = vshrl.u32 %v7856_v31, %v5467_v57  ;;  %v362_v59 = vshll.u32 %v7852_v33, %v5464_v49 }
  0x1f   :  { %v703_v44 = vsel %vm702_vm6, 1, %v7871_v43  ;;  %vm724_vm7 = vc.u32 %v716_v21, %v720_v36  ;;  %v726_v45 = vadd.s32 %v720_v36, %v716_v21  ;;  %v363_v60 = vshrl.u32 %v7850_v42, %v5467_v57 }
  0x20   :  { %v705_v46 = vadd.s32 %v703_v44, %v697_v20  ;;  %vm706_vm8 = vc.u32 %v704_v39, %v700_v30  ;;  %v725_v47 = vsel %vm724_vm7, 1, %v7871_v43  ;;  %v358_v55 = vor.u32 %v357_v35, %v356_v18 }
  0x21   :  { %v707_v50 = vsel %vm706_vm8, 1, %v7871_v43  ;;  %v727_v51 = vadd.s32 %v725_v47, %v719_v32  ;;  %vm728_vm9 = vc.u32 %v726_v45, %v722_v38  ;;  %vm365_vm10 = vcmp.lt.s32.totalorder %v5477_v5, 1 }
  0x22   :  { %v709_v53 = vadd.s32 %v707_v50, %v705_v46  ;;  %v729_v54 = vsel %vm728_vm9, 1, %v7871_v43  ;;  %v5508_v2 = vadd.s32 %v726_v45, %v722_v38  ;;  %v361_v6 = vor.u32 %v360_v56, %v359_v48 }
  0x23   :  { %v731_v58 = vadd.s32 %v729_v54, %v727_v51  ;;  %vm367_vm11 = vcmp.lt.s32.totalorder %v5477_v5, 3  ;;  %v364_v9 = vor.u32 %v363_v60, %v362_v59  ;;  %vm366_vm12 = vcmp.lt.s32.totalorder %v5477_v5, 2 }
  0x24   :  { %v710_v63 = vadd.s32 %v709_v53, %v699_v28  ;;  %vm368_vm13 = vcmp.lt.s32.totalorder %v5477_v5, 4  ;;  %v373_v49 = vsel %vm365_vm10, %v5489_v41, %v5498_v52  ;;  %v35_v12 = vadd.s32 1, %v5449_v23 }
  0x25   :  { %v732_v7 = vadd.s32 %v731_v58, %v721_v37  ;;  %v374_v11 = vsel %vm368_vm13, %v361_v6, 920167782  ;;  %v382_v15 = vand.u32 65535, %v5470_v61  ;;  %v383_v16 = vshrl.u32 %v5470_v61, 16 }
  0x26   :  { %v5513_v10 = vadd.s32 %v710_v63, %v701_v34  ;;  %v375_v14 = vsel %vm367_vm11, %v358_v55, %v374_v11  ;;  %v734_v17 = vmul.u32 %v5447_v19, %v5473_v62  ;;  %v377_v23 = vsel %vm365_vm10, %v5498_v52, %v358_v55 }
  0x27   :  { %v733_v13 = vadd.s32 %v732_v7, %v723_v40  ;;  %v376_v18 = vsel %vm366_vm12, %v373_v49, %v375_v14  ;;  %v378_v21 = vsel %vm368_vm13, %v364_v9, 1326507024  ;;  %vm36_vm15 = vcmp.gt.s32.totalorder %v35_v12, 0 }
  0x28   :  { %vm736_vm14 = vc.u32 %v5513_v10, %v5508_v2  ;;  %v406_v22 = vand.u32 65535, %v376_v18  ;;  %v407_v24 = vshrl.u32 %v376_v18, 16  ;;  %v379_v26 = vsel %vm367_vm11, %v361_v6, %v378_v21 }
  0x29   :  { %v737_v20 = vadd.s32 1, %v733_v13  ;;  %v380_v62 = vsel %vm366_vm12, %v377_v23, %v379_v26  ;;  %v349_v36 = vshrl.u32 %v7862_v25, %v5467_v57  ;;  %v370_v46 = vsel %vm368_vm13, %v358_v55, 2102212464 }
  0x2a   :  { %v409_v28 = vmul.u32 %v407_v24, %v382_v15  ;;  %v384_v32 = vand.u32 65535, %v380_v62  ;;  %v385_v34 = vshrl.u32 %v380_v62, 16  ;;  %v408_v37 = vmul.u32 %v406_v22, %v382_v15 }
  0x2b   :  { %v738_v19 = vsel %vm736_vm14, %v737_v20, %v733_v13  ;;  %v410_v38 = vmul.u32 %v406_v22, %v383_v16  ;;  %v25_v48 = vand.u32 2147483647, %v5438_v4  ;;  %v37_v50 = vsel %vm36_vm15, %v35_v12, 0 }
  0x2c   :  { %v739_v30 = vadd.s32 %v738_v19, %v734_v17  ;;  %v412_v39 = vshll.u32 %v409_v28, 16  ;;  %v386_v44 = vmul.u32 %v384_v32, %v382_v15  ;;  %v387_v45 = vmul.u32 %v385_v34, %v382_v15 }
  0x2d   :  { %v388_v35 = vmul.u32 %v384_v32, %v383_v16  ;;  %v414_v47 = vshll.u32 %v410_v38, 16  ;;  %v389_v53 = vmul.u32 %v385_v34, %v383_v16  ;;  %v369_v57 = vsel %vm365_vm10, %v349_v36, %v5489_v41 }
  0x2e   :  { %v740_v40 = vadd.s32 536870912, %v739_v30  ;;  %v390_v54 = vshll.u32 %v387_v45, 16  ;;  %v411_v58 = vmul.u32 %v407_v24, %v383_v16  ;;  %vm416_vm0 = vc.u32 %v408_v37, %v412_v39 }
  0x2f   :  { %v392_v56 = vshll.u32 %v388_v35, 16  ;;  %v418_v59 = vadd.s32 %v412_v39, %v408_v37  ;;  %v371_v55 = vsel %vm367_vm11, %v5498_v52, %v370_v46  ;;  %v417_v7 = vsel %vm416_vm0, 1, %v7871_v43 }
  0x30   :  { %v5546_v51 = vshrl.u32 %v740_v40, 30  ;;  %vm394_vm1 = vc.u32 %v386_v44, %v390_v54  ;;  %v396_v63 = vadd.s32 %v390_v54, %v386_v44  ;;  %v39_v9 = vand.u32 31, %v37_v50 }
  0x31   :  { %v395_v6 = vsel %vm394_vm1, 1, %v7871_v43  ;;  %vm420_vm2 = vc.u32 %v418_v59, %v414_v47  ;;  %v391_v11 = vshrl.u32 %v387_v45, 16  ;;  %v413_v13 = vshrl.u32 %v409_v28, 16 }
  0x32   :  { %v742_v60 = vshll.u32 %v5546_v51, 30  ;;  %v397_v41 = vadd.s32 %v395_v6, %v389_v53  ;;  %vm398_vm3 = vc.u32 %v396_v63, %v392_v56  ;;  %v419_v14 = vadd.s32 %v417_v7, %v411_v58 }
  0x33   :  { %v399_v12 = vsel %vm398_vm3, 1, %v7871_v43  ;;  %v421_v15 = vsel %vm420_vm2, 1, %v7871_v43  ;;  %v393_v16 = vshrl.u32 %v388_v35, 16  ;;  %v372_v18 = vsel %vm366_vm12, %v369_v57, %v371_v55 }
  0x34   :  { %v743_v49 = vsub.s32 %v739_v30, %v742_v60  ;;  %v401_v17 = vadd.s32 %v399_v12, %v397_v41  ;;  %v415_v23 = vshrl.u32 %v410_v38, 16  ;;  %v423_v20 = vadd.s32 %v421_v15, %v419_v14 }
  0x35   :  { %v40_v21 = vsub.s32 32, %v39_v9  ;;  %vm643_vm5 = vcmp.lt.s32.totalorder %v5426_v0, 0  ;;  %v422_v26 = vadd.s32 %v418_v59, %v414_v47  ;;  %v735_v19 = vadd.s32 %v5508_v2, %v5513_v10 }
  0x36   :  { %vm744_vm4 = vcmp.lt.s32.totalorder %v743_v49, 0  ;;  %v745_v52 = vsub.s32 0, %v743_v49  ;;  %v402_v24 = vadd.s32 %v401_v17, %v391_v11  ;;  %v424_v28 = vadd.s32 %v423_v20, %v413_v13 }
  0x37   :  { %v32_v30 = vand.u32 8388607, %v25_v48  ;;  %v765_v32 = vsub.s32 4, %v5546_v51  ;;  %v426_v34 = vmul.u32 %v5470_v61, %v372_v18  ;;  %v5568_v36 = vshrl.u32 %v37_v50, 5 }
  0x38   :  { %v746_v22 = vsel %vm744_vm4, %v745_v52, %v743_v49  ;;  %v403_v5 = vadd.s32 %v402_v24, %v393_v16  ;;  %vm5572_vm6 = vcmp.le.f32.partialorder %v641_v1, 0.7853982  ;;  %v425_v2 = vadd.s32 %v424_v28, %v415_v23 }
  0x39   :  { %v747_v62 = vclz %v746_v22  ;;  %v42_v10 = vshll.u32 %v7862_v25, %v39_v9  ;;  %v43_v39 = vshrl.u32 %v7860_v27, %v40_v21  ;;  %v45_v40 = vshll.u32 %v7860_v27, %v39_v9 }
  0x3a   :  { %vm428_vm7 = vc.u32 %v403_v5, %v422_v26  ;;  %v51_v44 = vshll.u32 %v7856_v31, %v39_v9  ;;  %v52_v61 = vshrl.u32 %v7852_v33, %v40_v21  ;;  %v429_v45 = vadd.s32 1, %v425_v2 }
  0x3b   :  { %v5275_v38 = vadd.s32 4294967294, %v747_v62  ;;  %v46_v1 = vshrl.u32 %v7858_v29, %v40_v21  ;;  %v48_v35 = vshll.u32 %v7858_v29, %v39_v9  ;;  %v49_v47 = vshrl.u32 %v7856_v31, %v40_v21 }
  0x3c   :  { %v54_v50 = vshll.u32 %v7852_v33, %v39_v9  ;;  %v55_v53 = vshrl.u32 %v7850_v42, %v40_v21  ;;  %v430_v58 = vsel %vm428_vm7, %v429_v45, %v425_v2  ;;  %v766_v59 = vsel %vm643_vm5, %v765_v32, %v5546_v51 }
  0x3d   :  { %vm5276_vm8 = vcmp.lt.s32.totalorder %v5275_v38, 0  ;;  %v431_v60 = vadd.s32 %v430_v58, %v426_v34  ;;  %v33_v55 = vor.u32 8388608, %v32_v30  ;;  %v53_v63 = vor.u32 %v52_v61, %v51_v44 }
  0x3e   :  { %v750_v46 = vsel %vm5276_vm8, 0, %v5275_v38  ;;  %v44_v11 = vor.u32 %v43_v39, %v42_v10  ;;  %v47_v41 = vor.u32 %v46_v1, %v45_v40  ;;  %v50_v13 = vor.u32 %v49_v47, %v48_v35 }
  0x3f   :  { %v751_v54 = vsub.s32 32, %v750_v46  ;;  %v752_v56 = vshll.u32 %v743_v49, %v750_v46  ;;  %v755_v57 = vsub.s32 4294967266, %v750_v46  ;;  %v432_v12 = vadd.s32 536870912, %v431_v60 }
  0x40   :  { %vm57_vm9 = vcmp.lt.s32.totalorder %v5568_v36, 1  ;;  %vm60_vm10 = vcmp.lt.s32.totalorder %v5568_v36, 4  ;;  %v56_v14 = vor.u32 %v55_v53, %v54_v50  ;;  %vm59_vm11 = vcmp.lt.s32.totalorder %v5568_v36, 3 }
  0x41   :  { %v753_v6 = vshrl.u32 %v735_v19, %v751_v54  ;;  %v756_v7 = vadd.s32 127, %v755_v57  ;;  %v5594_v51 = vsel %vm5572_vm6, 0, %v766_v59  ;;  %v433_v15 = vshrl.u32 %v432_v12, 30 }
  0x42   :  { %7961 = vst [vmem:[#allocation6_spill] sm:$0xff] %v5594_v51  ;;  %v66_v52 = vsel %vm60_vm10, %v53_v63, 920167782  ;;  %vm335_vm12 = vcmp.lt.s32.totalorder %v5433_v3, 0  ;;  %v41_v18 = vshrl.u32 %v7862_v25, %v40_v21  ;;  %vm58_vm13 = vcmp.lt.s32.totalorder %v5568_v36, 2 }
  0x43   :  { %v754_v9 = vor.u32 %v753_v6, %v752_v56  ;;  %v757_v49 = vshll.u32 %v756_v7, 23  ;;  %v434_v23 = vshll.u32 %v433_v15, 30  ;;  %v65_v20 = vsel %vm57_vm9, %v44_v11, %v47_v41 }
  0x44   :  { %v67_v22 = vsel %vm59_vm11, %v50_v13, %v66_v52  ;;  %v69_v24 = vsel %vm57_vm9, %v47_v41, %v50_v13  ;;  %v3253_v62 = vadd.s32 3, %v5594_v51  ;;  %v70_v28 = vsel %vm60_vm10, %v56_v14, 1326507024 }
  0x45   :  { %v758_v16 = vor.u32 4788187, %v757_v49  ;;  %v761_v17 = vcvt.s32.f32 %v754_v9  ;;  %v5610_v30 = vshll.u32 %v33_v55, 8  ;;  %v427_v21 = vadd.s32 %v422_v26, %v403_v5 }
  0x46   :  { %v5612_v32 = vsub.s32 %v431_v60, %v434_v23  ;;  %v457_v34 = vsub.s32 4, %v433_v15  ;;  %v71_v38 = vsel %vm59_vm11, %v53_v63, %v70_v28  ;;  %v68_v10 = vsel %vm58_vm13, %v65_v20, %v67_v22 }
  0x47   :  { %v759_v19 = vand.u32 2147483647, %v758_v16  ;;  %v72_v39 = vsel %vm58_vm13, %v69_v24, %v71_v38  ;;  %v74_v40 = vand.u32 65535, %v5610_v30  ;;  %v75_v26 = vshrl.u32 %v5610_v30, 16 }
  0x48   :  { %vm436_vm14 = vcmp.lt.s32.totalorder %v5612_v32, 0  ;;  %v437_v44 = vsub.s32 0, %v5612_v32  ;;  %v76_v5 = vand.u32 65535, %v72_v39  ;;  %v62_v45 = vsel %vm60_vm10, %v50_v13, 2102212464 }
  0x49   :  { %v762_v2 = vmul.f32 %v761_v17, %v759_v19  ;;  %v77_v1 = vshrl.u32 %v72_v39, 16  ;;  %v98_v35 = vand.u32 65535, %v68_v10  ;;  %v5626_v46 = vand.u32 3, %v3253_v62 }
  0x4a   :  { %v438_v47 = vsel %vm436_vm14, %v437_v44, %v5612_v32  ;;  %v5629_v50 = vmul.u32 %v76_v5, %v75_v26  ;;  %v99_v53 = vshrl.u32 %v68_v10, 16  ;;  %v5635_v57 = vsel %vm57_vm9, %v41_v18, %v44_v11 }
  0x4b   :  { %v763_v61 = vxor.u32 2147483648, %v762_v2  ;;  %v439_v56 = vclz %v438_v47  ;;  %v79_v58 = vmul.u32 %v77_v1, %v74_v40  ;;  %v458_v60 = vsel %vm335_vm12, %v457_v34, %v433_v15 }
  0x4c   :  { %v5646_v55 = vsel %vm59_vm11, %v47_v41, %v62_v45  ;;  %v78_v63 = vmul.u32 %v76_v5, %v74_v40  ;;  %v100_v12 = vmul.u32 %v98_v35, %v74_v40  ;;  %v81_v13 = vmul.u32 %v77_v1, %v75_v26 }
  0x4d   :  { %v764_v54 = vsel %vm643_vm5, %v763_v61, %v762_v2  ;;  %v5269_v7 = vadd.s32 4294967294, %v439_v56  ;;  %v82_v11 = vshll.u32 %v79_v58, 16  ;;  %v84_v9 = vshll.u32 %v5629_v50, 16 }
  0x4e   :  { %v5640_v59 = vsel %vm5572_vm6, %v5426_v0, %v764_v54  ;;  %v101_v37 = vmul.u32 %v99_v53, %v74_v40  ;;  %v5651_v49 = vmul.u32 %v98_v35, %v75_v26  ;;  %v85_v15 = vshrl.u32 %v5629_v50, 16 }
  0x4f   :  { %v769_v6 = vmul.f32 %v5640_v59, %v5640_v59  ;;  %vm5270_vm15 = vcmp.lt.s32.totalorder %v5269_v7, 0  ;;  %vm5656_vm0 = vcmp.le.f32.partialorder %v333_v8, 0.7853982  ;;  %vm86_vm1 = vc.u32 %v78_v63, %v82_v11 }
  0x50   :  { %v442_v16 = vsel %vm5270_vm15, 0, %v5269_v7  ;;  %v88_v17 = vadd.s32 %v82_v11, %v78_v63  ;;  %v103_v18 = vmul.u32 %v99_v53, %v75_v26  ;;  %vm3259_vm2 = vcmp.eq.s32.totalorder %v5626_v46, 2  ;;  %v5670_v63 = vld [vmem:[%s7838_s0 + $0x28] sm:$0xff] }
  0x51   :  { %v770_v14 = vmul.f32 -0.001358992, %v769_v6  ;;  %v777_v52 = vmul.f32 -0.00019511016, %v769_v6  ;;  %v443_v22 = vsub.s32 32, %v442_v16  ;;  %v444_v24 = vshll.u32 %v5612_v32, %v442_v16 }
  0x52   :  { %v447_v19 = vsub.s32 4294967266, %v442_v16  ;;  %v87_v62 = vsel %vm86_vm1, 1, %v7871_v43  ;;  %vm90_vm3 = vc.u32 %v88_v17, %v84_v9  ;;  %v104_v28 = vshll.u32 %v101_v37, 16 }
  0x53   :  { %v771_v23 = vadd.f32 0.041655596, %v770_v14  ;;  %v778_v20 = vadd.f32 0.008332121, %v777_v52  ;;  %v445_v38 = vshrl.u32 %v427_v21, %v443_v22  ;;  %v89_v2 = vadd.s32 %v87_v62, %v81_v13 }
  0x54   :  { %vm3256_vm4 = vcmp.eq.s32.totalorder %v5626_v46, 0  ;;  %v448_v10 = vadd.s32 127, %v447_v19  ;;  %v83_v39 = vshrl.u32 %v79_v58, 16  ;;  %v105_v40 = vshrl.u32 %v101_v37, 16 }
  0x55   :  { %v772_v8 = vmul.f32 %v771_v23, %v769_v6  ;;  %v779_v34 = vmul.f32 %v778_v20, %v769_v6  ;;  %v106_v44 = vshll.u32 %v5651_v49, 16  ;;  %v446_v5 = vor.u32 %v445_v38, %v444_v24 }
  0x56   :  { %v91_v61 = vsel %vm90_vm3, 1, %v7871_v43  ;;  %v449_v45 = vshll.u32 %v448_v10, 23  ;;  %vm108_vm5 = vc.u32 %v100_v12, %v104_v28  ;;  %v110_v35 = vadd.s32 %v104_v28, %v100_v12 }
  0x57   :  { %v773_v26 = vadd.f32 -0.4999988, %v772_v8  ;;  %v780_v32 = vadd.f32 -0.16666654, %v779_v34  ;;  %v93_v1 = vadd.s32 %v91_v61, %v89_v2  ;;  %v453_v21 = vcvt.s32.f32 %v446_v5 }
  0x58   :  { %v109_v53 = vsel %vm108_vm5, 1, %v7871_v43  ;;  %v450_v54 = vor.u32 4788187, %v449_v45  ;;  %vm112_vm6 = vc.u32 %v110_v35, %v106_v44  ;;  %v5676_v12 = vsel %vm5656_vm0, 0, %v458_v60 }
  0x59   :  { %v774_v47 = vmul.f32 %v773_v26, %v769_v6  ;;  %v781_v50 = vmul.f32 %v780_v32, %v769_v6  ;;  %v94_v56 = vadd.s32 %v93_v1, %v83_v39  ;;  %v111_v58 = vadd.s32 %v109_v53, %v103_v18 }
  0x5a   :  { %v113_v6 = vsel %vm112_vm6, 1, %v7871_v43  ;;  %v451_v13 = vand.u32 2147483647, %v450_v54  ;;  %v107_v9 = vshrl.u32 %v5651_v49, 16  ;;  %v114_v37 = vadd.s32 %v110_v35, %v106_v44 }
  0x5b   :  { %v5672_v7 = vadd.f32 1.0, %v774_v47  ;;  %v782_v11 = vadd.f32 1.0, %v781_v50  ;;  %v115_v14 = vadd.s32 %v113_v6, %v111_v58  ;;  %v95_v17 = vadd.s32 %v94_v56, %v85_v15 }
  0x5c   :  { %v798_v18 = vand.u32 2139095040, %v5670_v63  ;;  %v454_v23 = vmul.f32 %v453_v21, %v451_v13  ;;  %v64_v60 = vsel %vm58_vm13, %v5635_v57, %v5646_v55  ;;  %v795_v22 = vand.u32 2147483647, %v5670_v63  ;;  %v5702_v55 = vld [vmem:[%s7838_s0 + $0x18] sm:$0xff] }
  0x5d   :  { %7964 = vst [vmem:[#allocation7_spill] sm:$0xff] %v5672_v7  ;;  %v5681_v52 = vmul.f32 %v782_v11, %v5640_v59  ;;  %v7840_v16 = vxor.u32 2147483648, %v5672_v7  ;;  %v116_v20 = vadd.s32 %v115_v14, %v105_v40  ;;  %vm3255_vm7 = vcmp.lt.s32.totalorder %v5626_v46, 2 }
  0x5e   :  { %v799_v15 = vshrl.u32 %v798_v18, 23  ;;  %vm7890_vm8 = vweird.f32 %v5426_v0  ;;  %v455_v24 = vxor.u32 2147483648, %v454_v23  ;;  %v2943_v36 = vadd.s32 3, %v5676_v12 }
  0x5f   :  { %7965 = vst [vmem:[#allocation8_spill] sm:$0xff] %v5681_v52  ;;  %v7841_v49 = vxor.u32 2147483648, %v5681_v52  ;;  %v3261_v59 = vsel %vm3259_vm2, %v7840_v16, %v5681_v52  ;;  %v117_v57 = vadd.s32 %v116_v20, %v107_v9  ;;  %v118_v62 = vmul.u32 %v5610_v30, %v64_v60 }
  0x60   :  { %vm120_vm9 = vc.u32 %v95_v17, %v114_v37  ;;  %v5277_v28 = vadd.s32 4294967169, %v799_v15  ;;  %v456_v34 = vsel %vm335_vm12, %v455_v24, %v454_v23  ;;  %v802_v2 = vand.u32 8388607, %v795_v22 }
  0x61   :  { %v3258_v19 = vsel %vm3256_vm4, %v5672_v7, %v7841_v49  ;;  %v121_v38 = vadd.s32 1, %v117_v57  ;;  %v459_v46 = vsel %vm5656_vm0, %v5433_v3, %v456_v34  ;;  %v490_v30 = vand.u32 2139095040, %v5702_v55 }
  0x62   :  { %v3262_v8 = vsel %vm3255_vm7, %v3258_v19, %v3261_v59  ;;  %v805_v39 = vadd.s32 1, %v5277_v28  ;;  %v461_v40 = vmul.f32 %v459_v46, %v459_v46  ;;  %v5724_v61 = vand.u32 3, %v2943_v36 }
  0x63   :  { %v5716_v10 = vsel %vm7890_vm8, nan, %v3262_v8  ;;  %v122_v44 = vsel %vm120_vm9, %v121_v38, %v117_v57  ;;  %v803_v35 = vor.u32 8388608, %v802_v2  ;;  %v491_v47 = vshrl.u32 %v490_v30, 23 }
  0x64   :  { %7966 = vst [vmem:[#allocation9_spill] sm:$0xff] %v5716_v10  ;;  %5009 = vrot.lane.b32.xlu2 %v5716_v10, %s5407_s16  ;;  %v123_v26 = vadd.s32 %v122_v44, %v118_v62  ;;  %vm806_vm10 = vcmp.gt.s32.totalorder %v805_v39, 0  ;;  %v462_v32 = vmul.f32 -0.001358992, %v461_v40  ;;  %v469_v5 = vmul.f32 -0.00019511016, %v461_v40 }
  0x65   :  { %v807_v45 = vsel %vm806_vm10, %v805_v39, 0  ;;  %vm2949_vm11 = vcmp.eq.s32.totalorder %v5724_v61, 2  ;;  %v5727_v11 = vadd.s32 %v114_v37, %v95_v17  ;;  %vm2946_vm12 = vcmp.eq.s32.totalorder %v5724_v61, 0 }
  0x66   :  { %v124_v1 = vadd.s32 536870912, %v123_v26  ;;  %v809_v41 = vand.u32 31, %v807_v45  ;;  %v463_v50 = vadd.f32 0.041655596, %v462_v32  ;;  %v470_v21 = vadd.f32 0.008332121, %v469_v5 }
  0x67   :  { %v5730_v13 = vshll.u32 %v803_v35, 8  ;;  %v487_v9 = vand.u32 2147483647, %v5702_v55  ;;  %v5271_v14 = vadd.s32 4294967169, %v491_v47  ;;  %vm2945_vm13 = vcmp.lt.s32.totalorder %v5724_v61, 2 }
  0x68   :  { %v125_v53 = vshrl.u32 %v124_v1, 30  ;;  %v810_v54 = vsub.s32 32, %v809_v41  ;;  %v464_v56 = vmul.f32 %v463_v50, %v461_v40  ;;  %v471_v58 = vmul.f32 %v470_v21, %v461_v40 }
  0x69   :  { %vm27_vm14 = vcmp.lt.s32.totalorder %v5438_v4, 0  ;;  %v5735_v60 = vshrl.u32 %v807_v45, 5  ;;  %v812_v20 = vshll.u32 %v7862_v25, %v809_v41  ;;  %vm476_vm15 = vweird.f32 %v5433_v3 }
  0x6a   :  { %v126_v6 = vshll.u32 %v125_v53, 30  ;;  %v465_v18 = vadd.f32 -0.4999988, %v464_v56  ;;  %v472_v23 = vadd.f32 -0.16666654, %v471_v58  ;;  %v813_v17 = vshrl.u32 %v7860_v27, %v810_v54 }
  0x6b   :  { %v821_v59 = vshll.u32 %v7856_v31, %v809_v41  ;;  %v822_v15 = vshrl.u32 %v7852_v33, %v810_v54  ;;  %v815_v57 = vshll.u32 %v7860_v27, %v809_v41  ;;  %v816_v19 = vshrl.u32 %v7858_v29, %v810_v54 }
  0x6c   :  { %v5739_v37 = vsub.s32 %v123_v26, %v126_v6  ;;  %v466_v24 = vmul.f32 %v465_v18, %v461_v40  ;;  %v473_v36 = vmul.f32 %v472_v23, %v461_v40  ;;  %v818_v28 = vshll.u32 %v7858_v29, %v809_v41 }
  0x6d   :  { %v819_v8 = vshrl.u32 %v7856_v31, %v810_v54  ;;  %v824_v2 = vshll.u32 %v7852_v33, %v809_v41  ;;  %v825_v39 = vshrl.u32 %v7850_v42, %v810_v54  ;;  %vm5756_vm1 = vcmp.le.f32.partialorder %v25_v48, 0.7853982 }
  0x6e   :  { %vm128_vm0 = vcmp.lt.s32.totalorder %v5739_v37, 0  ;;  %v129_v62 = vsub.s32 0, %v5739_v37  ;;  %v5750_v34 = vadd.f32 1.0, %v466_v24  ;;  %v474_v38 = vadd.f32 1.0, %v473_v36 }
  0x6f   :  { %v149_v44 = vsub.s32 4, %v125_v53  ;;  %v814_v26 = vor.u32 %v813_v17, %v812_v20  ;;  %v823_v32 = vor.u32 %v822_v15, %v821_v59  ;;  %v817_v35 = vor.u32 %v816_v19, %v815_v57 }
  0x70   :  { %v130_v40 = vsel %vm128_vm0, %v129_v62, %v5739_v37  ;;  %v5761_v5 = vmul.f32 %v474_v38, %v459_v46  ;;  %v7845_v45 = vxor.u32 2147483648, %v5750_v34  ;;  %v820_v41 = vor.u32 %v819_v8, %v818_v28 }
  0x71   :  { %v131_v1 = vclz %v130_v40  ;;  %v826_v47 = vor.u32 %v825_v39, %v824_v2  ;;  %vm827_vm2 = vcmp.lt.s32.totalorder %v5735_v60, 1  ;;  %vm830_vm3 = vcmp.lt.s32.totalorder %v5735_v60, 4 }
  0x72   :  { %v7847_v48 = vxor.u32 2147483648, %v5761_v5  ;;  %v2951_v50 = vsel %vm2949_vm11, %v7845_v45, %v5761_v5  ;;  %vm829_vm4 = vcmp.lt.s32.totalorder %v5735_v60, 3  ;;  %v150_v21 = vsel %vm27_vm14, %v149_v44, %v125_v53 }
  0x73   :  { %v5263_v46 = vadd.s32 4294967294, %v131_v1  ;;  %v811_v56 = vshrl.u32 %v7862_v25, %v810_v54  ;;  %vm828_vm5 = vcmp.lt.s32.totalorder %v5735_v60, 2  ;;  %v836_v58 = vsel %vm830_vm3, %v823_v32, 920167782 }
  0x74   :  { %v2948_v6 = vsel %vm2946_vm12, %v5750_v34, %v7847_v48  ;;  %v832_v18 = vsel %vm830_vm3, %v820_v41, 2102212464  ;;  %v835_v53 = vsel %vm827_vm2, %v814_v26, %v817_v35  ;;  %v837_v20 = vsel %vm829_vm4, %v820_v41, %v836_v58 }
  0x75   :  { %vm5264_vm6 = vcmp.lt.s32.totalorder %v5263_v46, 0  ;;  %v2952_v54 = vsel %vm2945_vm13, %v2948_v6, %v2951_v50  ;;  %v840_v17 = vsel %vm830_vm3, %v826_v47, 1326507024  ;;  %v839_v61 = vsel %vm827_vm2, %v817_v35, %v820_v41 }
  0x76   :  { %v134_v23 = vsel %vm5264_vm6, 0, %v5263_v46  ;;  %v5796_v59 = vsel %vm476_vm15, nan, %v2952_v54  ;;  %v844_v57 = vand.u32 65535, %v5730_v13  ;;  %v845_v19 = vshrl.u32 %v5730_v13, 16 }
  0x77   :  { %7969 = vst [vmem:[#allocation10_spill] sm:$0xff] %v5796_v59  ;;  %v135_v15 = vsub.s32 32, %v134_v23  ;;  %v136_v24 = vshll.u32 %v5739_v37, %v134_v23  ;;  %v139_v36 = vsub.s32 4294967266, %v134_v23  ;;  %5005 = vrot.lane.b32.xlu1 %v5796_v59, %s5407_s16  ;;  %v497_v62 = vadd.s32 1, %v5271_v14 }
  0x78   :  { %v5808_v38 = vsel %vm5756_vm1, 0, %v150_v21  ;;  %v5812_v37 = vand.u32 8388607, %v487_v9  ;;  %v831_v2 = vsel %vm827_vm2, %v811_v56, %v814_v26  ;;  %v833_v39 = vsel %vm829_vm4, %v817_v35, %v832_v18 }
  0x79   :  { %v137_v28 = vshrl.u32 %v5727_v11, %v135_v15  ;;  %v140_v8 = vadd.s32 127, %v139_v36  ;;  %v838_v14 = vsel %vm828_vm5, %v835_v53, %v837_v20  ;;  %v841_v11 = vsel %vm829_vm4, %v823_v32, %v840_v17 }
  0x7a   :  { %v842_v1 = vsel %vm828_vm5, %v839_v61, %v841_v11  ;;  %v868_v41 = vand.u32 65535, %v838_v14  ;;  %v869_v46 = vshrl.u32 %v838_v14, 16  ;;  %vm498_vm7 = vcmp.gt.s32.totalorder %v497_v62, 0 }
  0x7b   :  { %v138_v40 = vor.u32 %v137_v28, %v136_v24  ;;  %v141_v44 = vshll.u32 %v140_v8, 23  ;;  %v846_v47 = vand.u32 65535, %v842_v1  ;;  %v847_v50 = vshrl.u32 %v842_v1, 16 }
  0x7c   :  { %v2633_v35 = vadd.s32 3, %v5808_v38  ;;  %v872_v56 = vmul.u32 %v868_v41, %v845_v19  ;;  %v5827_v58 = vsel %vm828_vm5, %v831_v2, %v833_v39  ;;  %v870_v54 = vmul.u32 %v868_v41, %v844_v57 }
  0x7d   :  { %v142_v26 = vor.u32 4788187, %v141_v44  ;;  %v145_v21 = vcvt.s32.f32 %v138_v40  ;;  %v848_v32 = vmul.u32 %v846_v47, %v844_v57  ;;  %v849_v6 = vmul.u32 %v847_v50, %v844_v57 }
  0x7e   :  { %v850_v18 = vmul.u32 %v846_v47, %v845_v19  ;;  %v871_v23 = vmul.u32 %v869_v46, %v844_v57  ;;  %v499_v20 = vsel %vm498_vm7, %v497_v62, 0  ;;  %v851_v17 = vmul.u32 %v847_v50, %v845_v19  ;;  %v5839_v50 = vld [vmem:[%s7838_s0] sm:$0xff] }
  0x7f   :  { %v143_v53 = vand.u32 2147483647, %v142_v26  ;;  %v852_v15 = vshll.u32 %v849_v6, 16  ;;  %v873_v36 = vmul.u32 %v869_v46, %v845_v19  ;;  %v853_v28 = vshrl.u32 %v849_v6, 16 }
  0x80   :  { %v854_v24 = vshll.u32 %v850_v18, 16  ;;  %v874_v8 = vshll.u32 %v871_v23, 16  ;;  %v876_v14 = vshll.u32 %v872_v56, 16  ;;  %v875_v60 = vshrl.u32 %v871_v23, 16 }
  0x81   :  { %v146_v61 = vmul.f32 %v145_v21, %v143_v53  ;;  %vm856_vm9 = vc.u32 %v848_v32, %v852_v15  ;;  %v858_v11 = vadd.s32 %v852_v15, %v848_v32  ;;  %v501_v2 = vand.u32 31, %v499_v20 }
  0x82   :  { %v857_v40 = vsel %vm856_vm9, 1, %v7871_v43  ;;  %vm878_vm10 = vc.u32 %v870_v54, %v874_v8  ;;  %v880_v44 = vadd.s32 %v874_v8, %v870_v54  ;;  %v855_v26 = vshrl.u32 %v850_v18, 16 }
  0x83   :  { %v147_v39 = vxor.u32 2147483648, %v146_v61  ;;  %v859_v1 = vadd.s32 %v857_v40, %v851_v17  ;;  %vm860_vm11 = vc.u32 %v858_v11, %v854_v24  ;;  %v879_v57 = vsel %vm878_vm10, 1, %v7871_v43 }
  0x84   :  { %v5831_v62 = vsub.s32 32, %v501_v2  ;;  %v861_v41 = vsel %vm860_vm11, 1, %v7871_v43  ;;  %v881_v47 = vadd.s32 %v879_v57, %v873_v36  ;;  %vm882_vm12 = vc.u32 %v880_v44, %v876_v14 }
  0x85   :  { %v148_v19 = vsel %vm27_vm14, %v147_v39, %v146_v61  ;;  %v863_v21 = vadd.s32 %v861_v41, %v859_v1  ;;  %v883_v32 = vsel %vm882_vm12, 1, %v7871_v43  ;;  %v5845_v4 = vand.u32 3, %v2633_v35 }
  0x86   :  { %v151_v46 = vsel %vm5756_vm1, %v5839_v50, %v148_v19  ;;  %v877_v53 = vshrl.u32 %v872_v56, 16  ;;  %v885_v54 = vadd.s32 %v883_v32, %v881_v47  ;;  %v5847_v17 = vadd.s32 %v880_v44, %v876_v14 }
  0x87   :  { %v153_v6 = vmul.f32 %v151_v46, %v151_v46  ;;  %v864_v23 = vadd.s32 %v863_v21, %v853_v28  ;;  %v504_v15 = vshll.u32 %v7862_v25, %v501_v2  ;;  %v505_v24 = vshrl.u32 %v7860_v27, %v5831_v62 }
  0x88   :  { %v886_v61 = vadd.s32 %v885_v54, %v875_v60  ;;  %v507_v18 = vshll.u32 %v7860_v27, %v501_v2  ;;  %v508_v35 = vshrl.u32 %v7858_v29, %v5831_v62  ;;  %v510_v56 = vshll.u32 %v7858_v29, %v501_v2 }
  0x89   :  { %v154_v36 = vmul.f32 -0.001358992, %v153_v6  ;;  %v161_v30 = vmul.f32 -0.00019511016, %v153_v6  ;;  %v5853_v8 = vadd.s32 %v864_v23, %v855_v26  ;;  %v511_v28 = vshrl.u32 %v7856_v31, %v5831_v62 }
  0x8a   :  { %v887_v39 = vadd.s32 %v886_v61, %v877_v53  ;;  %v513_v40 = vshll.u32 %v7856_v31, %v501_v2  ;;  %v888_v60 = vmul.u32 %v5730_v13, %v5827_v58  ;;  %v5865_v44 = vshrl.u32 %v499_v20, 5 }
  0x8b   :  { %v155_v14 = vadd.f32 0.041655596, %v154_v36  ;;  %v162_v11 = vadd.f32 0.008332121, %v161_v30  ;;  %vm890_vm13 = vc.u32 %v5853_v8, %v5847_v17  ;;  %v514_v1 = vshrl.u32 %v7852_v33, %v5831_v62 }
  0x8c   :  { %v891_v41 = vadd.s32 1, %v887_v39  ;;  %v516_v47 = vshll.u32 %v7852_v33, %v501_v2  ;;  %v5870_v26 = vor.u32 %v505_v24, %v504_v15  ;;  %v5872_v21 = vor.u32 %v508_v35, %v507_v18 }
  0x8d   :  { %v156_v57 = vmul.f32 %v155_v14, %v153_v6  ;;  %v163_v19 = vmul.f32 %v162_v11, %v153_v6  ;;  %v515_v32 = vor.u32 %v514_v1, %v513_v40  ;;  %v517_v13 = vshrl.u32 %v7850_v42, %v5831_v62 }
  0x8e   :  { %v892_v20 = vsel %vm890_vm13, %v891_v41, %v887_v39  ;;  %v5876_v54 = vor.u32 %v511_v28, %v510_v56  ;;  %vm519_vm14 = vcmp.lt.s32.totalorder %v5865_v44, 1  ;;  %vm521_vm0 = vcmp.lt.s32.totalorder %v5865_v44, 3 }
  0x8f   :  { %v157_v58 = vadd.f32 -0.4999988, %v156_v57  ;;  %v164_v53 = vadd.f32 -0.16666654, %v163_v19  ;;  %v893_v23 = vadd.s32 %v892_v20, %v888_v60  ;;  %vm522_vm1 = vcmp.lt.s32.totalorder %v5865_v44, 4 }
  0x90   :  { %v495_v24 = vor.u32 8388608, %v5812_v37  ;;  %v518_v36 = vor.u32 %v517_v13, %v516_v47  ;;  %vm520_vm2 = vcmp.lt.s32.totalorder %v5865_v44, 2  ;;  %v528_v61 = vsel %vm522_vm1, %v515_v32, 920167782 }
  0x91   :  { %v158_v2 = vmul.f32 %v157_v58, %v153_v6  ;;  %v165_v15 = vmul.f32 %v164_v53, %v153_v6  ;;  %v894_v30 = vadd.s32 536870912, %v893_v23  ;;  %v527_v56 = vsel %vm519_vm14, %v5870_v26, %v5872_v21 }
  0x92   :  { %v529_v6 = vsel %vm521_vm0, %v5876_v54, %v528_v61  ;;  %vm2635_vm3 = vcmp.lt.s32.totalorder %v5845_v4, 2  ;;  %vm2639_vm4 = vcmp.eq.s32.totalorder %v5845_v4, 2  ;;  %v531_v28 = vsel %vm519_vm14, %v5872_v21, %v5876_v54 }
  0x93   :  { %v5885_v18 = vadd.f32 1.0, %v158_v2  ;;  %v166_v35 = vadd.f32 1.0, %v165_v15  ;;  %v5896_v37 = vshrl.u32 %v894_v30, 30  ;;  %v532_v39 = vsel %vm522_vm1, %v518_v36, 1326507024 }
  0x94   :  { %v5907_v40 = vshll.u32 %v495_v24, 8  ;;  %vm2636_vm5 = vcmp.eq.s32.totalorder %v5845_v4, 0  ;;  %v530_v1 = vsel %vm520_vm2, %v527_v56, %v529_v6  ;;  %v533_v57 = vsel %vm521_vm0, %v515_v32, %v532_v39 }
  0x95   :  { %v5902_v14 = vmul.f32 %v166_v35, %v151_v46  ;;  %v7842_v11 = vxor.u32 2147483648, %v5885_v18  ;;  %v896_v60 = vshll.u32 %v5896_v37, 30  ;;  %v534_v41 = vsel %vm520_vm2, %v531_v28, %v533_v57 }
  0x96   :  { %v536_v47 = vand.u32 65535, %v5907_v40  ;;  %vm168_vm6 = vweird.f32 %v5839_v50  ;;  %v537_v58 = vshrl.u32 %v5907_v40, 16  ;;  %v538_v53 = vand.u32 65535, %v534_v41 }
  0x97   :  { %v7843_v46 = vxor.u32 2147483648, %v5902_v14  ;;  %v2641_v19 = vsel %vm2639_vm4, %v7842_v11, %v5902_v14  ;;  %v897_v13 = vsub.s32 %v893_v23, %v896_v60  ;;  %v539_v20 = vshrl.u32 %v534_v41, 16 }
  0x98   :  { %v561_v2 = vshrl.u32 %v530_v1, 16  ;;  %v560_v36 = vand.u32 65535, %v530_v1  ;;  %v540_v23 = vmul.u32 %v538_v53, %v536_v47  ;;  %v542_v35 = vmul.u32 %v538_v53, %v537_v58 }
  0x99   :  { %v2638_v32 = vsel %vm2636_vm5, %v5885_v18, %v7843_v46  ;;  %vm898_vm7 = vcmp.lt.s32.totalorder %v897_v13, 0  ;;  %v899_v24 = vsub.s32 0, %v897_v13  ;;  %v541_v61 = vmul.u32 %v539_v20, %v536_v47 }
  0x9a   :  { %v2642_v15 = vsel %vm2635_vm3, %v2638_v32, %v2641_v19  ;;  %v563_v6 = vmul.u32 %v561_v2, %v536_v47  ;;  %v543_v39 = vmul.u32 %v539_v20, %v537_v58  ;;  %v546_v4 = vshll.u32 %v542_v35, 16 }
  0x9b   :  { %v5931_v30 = vsel %vm168_vm6, nan, %v2642_v15  ;;  %v900_v56 = vsel %vm898_vm7, %v899_v24, %v897_v13  ;;  %v544_v60 = vshll.u32 %v541_v61, 16  ;;  %v562_v57 = vmul.u32 %v560_v36, %v536_v47 }
  0x9c   :  { %5001 = vrot.lane.b32.xlu0 %v5931_v30, %s5407_s16  ;;  %v901_v28 = vclz %v900_v56  ;;  %v564_v19 = vmul.u32 %v560_v36, %v537_v58  ;;  %v566_v41 = vshll.u32 %v563_v6, 16  ;;  %v889_v15 = vadd.s32 %v5847_v17, %v5853_v8 }
  0x9d   :  { %vm548_vm9 = vc.u32 %v540_v23, %v544_v60  ;;  %v550_v32 = vadd.s32 %v544_v60, %v540_v23  ;;  %v919_v53 = vsub.s32 4, %v5896_v37  ;;  %v545_v16 = vshrl.u32 %v541_v61, 16 }
  0x9e   :  { %v5278_v1 = vadd.s32 4294967294, %v901_v28  ;;  %v549_v49 = vsel %vm548_vm9, 1, %v7871_v43  ;;  %vm5941_vm10 = vcmp.le.f32.partialorder %v795_v22, 0.7853982  ;;  %v565_v24 = vmul.u32 %v561_v2, %v537_v58  ;;  %v5949_v22 = vld [vmem:[%s7838_s0 + $0x8] sm:$0xff] }
  0x9f   :  { %v551_v47 = vadd.s32 %v549_v49, %v543_v39  ;;  %vm552_vm12 = vc.u32 %v550_v32, %v546_v4  ;;  %v568_v56 = vshll.u32 %v564_v19, 16  ;;  %vm570_vm13 = vc.u32 %v562_v57, %v566_v41  ;;  %7972 = vst [vmem:[#allocation11_spill] sm:$0xff] %v5949_v22 }
  0xa0   :  { %vm5279_vm11 = vcmp.lt.s32.totalorder %v5278_v1, 0  ;;  %v553_v23 = vsel %vm552_vm12, 1, %v7871_v43  ;;  %vm797_vm3 = vcmp.lt.s32.totalorder %v5670_v63, 0  ;;  %v503_v49 = vshrl.u32 %v7862_v25, %v5831_v62 }
  0xa1   :  { %v904_v36 = vsel %vm5279_vm11, 0, %v5278_v1  ;;  %v555_v28 = vadd.s32 %v553_v23, %v551_v47  ;;  %v524_v58 = vsel %vm522_vm1, %v5876_v54, 2102212464  ;;  %v571_v2 = vsel %vm570_vm13, 1, %v7871_v43 }
  0xa2   :  { %v905_v17 = vsub.s32 32, %v904_v36  ;;  %v906_v8 = vshll.u32 %v897_v13, %v904_v36  ;;  %v909_v61 = vsub.s32 4294967266, %v904_v36  ;;  %v920_v60 = vsel %vm797_vm3, %v919_v53, %v5896_v37 }
  0xa3   :  { %v572_v4 = vadd.s32 %v566_v41, %v562_v57  ;;  %v547_v1 = vshrl.u32 %v542_v35, 16  ;;  %v556_v32 = vadd.s32 %v555_v28, %v545_v16  ;;  %v573_v47 = vadd.s32 %v571_v2, %v565_v24 }
  0xa4   :  { %v907_v39 = vshrl.u32 %v889_v15, %v905_v17  ;;  %v910_v13 = vadd.s32 127, %v909_v61  ;;  %v182_v36 = vand.u32 2139095040, %v5949_v22  ;;  %v567_v11 = vshrl.u32 %v563_v6, 16 }
  0xa5   :  { %vm574_vm4 = vc.u32 %v572_v4, %v568_v56  ;;  %v523_v54 = vsel %vm519_vm14, %v503_v49, %v5870_v26  ;;  %v525_v15 = vsel %vm521_vm0, %v5872_v21, %v524_v58  ;;  %v569_v41 = vshrl.u32 %v564_v19, 16 }
  0xa6   :  { %v908_v23 = vor.u32 %v907_v39, %v906_v8  ;;  %v911_v62 = vshll.u32 %v910_v13, 23  ;;  %v575_v37 = vsel %vm574_vm4, 1, %v7871_v43  ;;  %v183_v57 = vshrl.u32 %v182_v36, 23 }
  0xa7   :  { %v577_v53 = vadd.s32 %v575_v37, %v573_v47  ;;  %v5971_v24 = vsel %vm5941_vm10, 0, %v920_v60  ;;  %v5973_v6 = vadd.s32 %v556_v32, %v547_v1  ;;  %v5975_v17 = vadd.s32 %v572_v4, %v568_v56 }
  0xa8   :  { %v912_v35 = vor.u32 4788187, %v911_v62  ;;  %v915_v16 = vcvt.s32.f32 %v908_v23  ;;  %v5265_v26 = vadd.s32 4294967169, %v183_v57  ;;  %v526_v21 = vsel %vm520_vm2, %v523_v54, %v525_v15  ;;  %v6000_v23 = vld [vmem:[%s7838_s0 + $0x40] sm:$0xff] }
  0xa9   :  { %v578_v61 = vadd.s32 %v577_v53, %v567_v11  ;;  %v3408_v58 = vadd.s32 3, %v5971_v24  ;;  %v580_v2 = vmul.u32 %v5907_v40, %v526_v21  ;;  %vm582_vm14 = vc.u32 %v5973_v6, %v5975_v17  ;;  %7973 = vst [vmem:[#allocation12_spill] sm:$0xff] %v6000_v23 }
  0xaa   :  { %v913_v8 = vand.u32 2147483647, %v912_v35  ;;  %v189_v28 = vadd.s32 1, %v5265_v26  ;;  %v7849_v39 = vand.u32 2147483647, %v5949_v22  ;;  %vm938_vm13 = vweird.f32 %v5670_v63 }
  0xab   :  { %v579_v19 = vadd.s32 %v578_v61, %v569_v41  ;;  %v5986_v11 = vand.u32 3, %v3408_v58  ;;  %v7848_v15 = vand.u32 2147483647, %v6000_v23  ;;  %vm6064_vm4 = vcmp.le.f32.partialorder %v487_v9, 0.7853982 }
  0xac   :  { %v916_v49 = vmul.f32 %v915_v16, %v913_v8  ;;  %vm190_vm0 = vcmp.gt.s32.totalorder %v189_v28, 0  ;;  %v186_v47 = vand.u32 8388607, %v7849_v39 }
  0xad   :  { %v583_v13 = vadd.s32 1, %v579_v19  ;;  %v191_v60 = vsel %vm190_vm0, %v189_v28, 0  ;;  %vm3414_vm1 = vcmp.eq.s32.totalorder %v5986_v11, 2  ;;  %vm3411_vm5 = vcmp.eq.s32.totalorder %v5986_v11, 0 }
  0xae   :  { %v917_v56 = vxor.u32 2147483648, %v916_v49  ;;  %v193_v4 = vand.u32 31, %v191_v60  ;;  %v6004_v54 = vshrl.u32 %v191_v60, 5  ;;  %v187_v61 = vor.u32 8388608, %v186_v47 }
  0xaf   :  { %v584_v1 = vsel %vm582_vm14, %v583_v13, %v579_v19  ;;  %vm3410_vm9 = vcmp.lt.s32.totalorder %v5986_v11, 2 }
  0xb0   :  { %v918_v44 = vsel %vm797_vm3, %v917_v56, %v916_v49  ;;  %v585_v32 = vadd.s32 %v584_v1, %v580_v2  ;;  %v5995_v36 = vsub.s32 32, %v193_v4  ;;  %v196_v20 = vshll.u32 %v7862_v25, %v193_v4 }
  0xb1   :  { %v5991_v40 = vsel %vm5941_vm10, %v5670_v63, %v918_v44  ;;  %v199_v35 = vshll.u32 %v7860_v27, %v193_v4  ;;  %v205_v26 = vshll.u32 %v7856_v31, %v193_v4  ;;  %v202_v28 = vshll.u32 %v7858_v29, %v193_v4 }
  0xb2   :  { %v923_v62 = vmul.f32 %v5991_v40, %v5991_v40  ;;  %v586_v37 = vadd.s32 536870912, %v585_v32  ;;  %v197_v57 = vshrl.u32 %v7860_v27, %v5995_v36  ;;  %v200_v16 = vshrl.u32 %v7858_v29, %v5995_v36 }
  0xb3   :  { %v206_v8 = vshrl.u32 %v7852_v33, %v5995_v36  ;;  %v203_v49 = vshrl.u32 %v7856_v31, %v5995_v36  ;;  %v1260_v56 = vand.u32 2139095040, %v6000_v23  ;;  %v208_v44 = vshll.u32 %v7852_v33, %v193_v4 }
  0xb4   :  { %v924_v41 = vmul.f32 -0.001358992, %v923_v62  ;;  %v931_v53 = vmul.f32 -0.00019511016, %v923_v62  ;;  %v6016_v21 = vshrl.u32 %v586_v37, 30  ;;  %v6021_v2 = vor.u32 %v197_v57, %v196_v20 }
  0xb5   :  { %v6026_v60 = vor.u32 %v200_v16, %v199_v35  ;;  %v209_v1 = vshrl.u32 %v7850_v42, %v5995_v36  ;;  %v207_v46 = vor.u32 %v206_v8, %v205_v26  ;;  %vm211_vm2 = vcmp.lt.s32.totalorder %v6004_v54, 1 }
  0xb6   :  { %v925_v58 = vadd.f32 0.041655596, %v924_v41  ;;  %v932_v19 = vadd.f32 0.008332121, %v931_v53  ;;  %v588_v13 = vshll.u32 %v6016_v21, 30  ;;  %v204_v57 = vor.u32 %v203_v49, %v202_v28 }
  0xb7   :  { %vm214_vm7 = vcmp.lt.s32.totalorder %v6004_v54, 4  ;;  %v6036_v41 = vshll.u32 %v187_v61, 8  ;;  %vm489_vm10 = vcmp.lt.s32.totalorder %v5702_v55, 0  ;;  %vm212_vm11 = vcmp.lt.s32.totalorder %v6004_v54, 2 }
  0xb8   :  { %v926_v47 = vmul.f32 %v925_v58, %v923_v62  ;;  %v933_v37 = vmul.f32 %v932_v19, %v923_v62  ;;  %v6033_v20 = vsub.s32 %v585_v32, %v588_v13  ;;  %vm213_vm12 = vcmp.lt.s32.totalorder %v6004_v54, 3 }
  0xb9   :  { %v210_v32 = vor.u32 %v209_v1, %v208_v44  ;;  %v219_v53 = vsel %vm211_vm2, %v6021_v2, %v6026_v60  ;;  %v581_v61 = vadd.s32 %v5975_v17, %v5973_v6  ;;  %v220_v28 = vsel %vm214_vm7, %v207_v46, 920167782 }
  0xba   :  { %v927_v35 = vadd.f32 -0.4999988, %v926_v47  ;;  %v934_v16 = vadd.f32 -0.16666654, %v933_v37  ;;  %vm590_vm3 = vcmp.lt.s32.totalorder %v6033_v20, 0  ;;  %v591_v4 = vsub.s32 0, %v6033_v20 }
  0xbb   :  { %v221_v58 = vsel %vm213_vm12, %v204_v57, %v220_v28  ;;  %v1261_v19 = vshrl.u32 %v1260_v56, 23  ;;  %v6058_v13 = vand.u32 8388607, %v7848_v15  ;;  %v611_v47 = vsub.s32 4, %v6016_v21 }
  0xbc   :  { %v928_v26 = vmul.f32 %v927_v35, %v923_v62  ;;  %v935_v8 = vmul.f32 %v934_v16, %v923_v62  ;;  %v592_v49 = vsel %vm590_vm3, %v591_v4, %v6033_v20  ;;  %v222_v62 = vsel %vm212_vm11, %v219_v53, %v221_v58 }
  0xbd   :  { %v593_v17 = vclz %v592_v49  ;;  %v224_v56 = vsel %vm214_vm7, %v210_v32, 1326507024  ;;  %v228_v37 = vand.u32 65535, %v6036_v41  ;;  %v229_v35 = vshrl.u32 %v6036_v41, 16 }
  0xbe   :  { %v6060_v44 = vadd.f32 1.0, %v928_v26  ;;  %v936_v1 = vadd.f32 1.0, %v935_v8  ;;  %v223_v26 = vsel %vm211_vm2, %v6026_v60, %v204_v57  ;;  %v195_v53 = vshrl.u32 %v7862_v25, %v5995_v36 }
  0xbf   :  { %v5272_v4 = vadd.s32 4294967294, %v593_v17  ;;  %v225_v32 = vsel %vm213_vm12, %v207_v46, %v224_v56  ;;  %v253_v8 = vshrl.u32 %v222_v62, 16  ;;  %v5286_v28 = vadd.s32 4294967169, %v1261_v19 }
  0xc0   :  { %v6076_v16 = vmul.f32 %v936_v1, %v5991_v40  ;;  %v7844_v9 = vxor.u32 2147483648, %v6060_v44  ;;  %v216_v58 = vsel %vm214_vm7, %v204_v57, 2102212464  ;;  %v612_v36 = vsel %vm489_vm10, %v611_v47, %v6016_v21 }
  0xc1   :  { %vm5273_vm14 = vcmp.lt.s32.totalorder %v5272_v4, 0  ;;  %v226_v46 = vsel %vm212_vm11, %v223_v26, %v225_v32  ;;  %v252_v19 = vand.u32 65535, %v222_v62  ;;  %v215_v21 = vsel %vm211_vm2, %v195_v53, %v6021_v2 }
  0xc2   :  { %v7846_v49 = vxor.u32 2147483648, %v6076_v16  ;;  %v3416_v40 = vsel %vm3414_vm1, %v7844_v9, %v6076_v16  ;;  %v596_v1 = vsel %vm5273_vm14, 0, %v5272_v4  ;;  %v217_v62 = vsel %vm213_vm12, %v6026_v60, %v216_v58 }
  0xc3   :  { %v597_v56 = vsub.s32 32, %v596_v1  ;;  %v598_v9 = vshll.u32 %v6033_v20, %v596_v1  ;;  %v601_v45 = vsub.s32 4294967266, %v596_v1  ;;  %v255_v47 = vmul.u32 %v253_v8, %v228_v37 }
  0xc4   :  { %v3413_v17 = vsel %vm3411_vm5, %v6060_v44, %v7846_v49  ;;  %v230_v20 = vand.u32 65535, %v226_v46  ;;  %v6121_v11 = vsel %vm6064_vm4, 0, %v612_v36  ;;  %v231_v2 = vshrl.u32 %v226_v46, 16 }
  0xc5   :  { %v3417_v57 = vsel %vm3410_vm9, %v3413_v17, %v3416_v40  ;;  %v599_v26 = vshrl.u32 %v581_v61, %v597_v56  ;;  %v602_v32 = vadd.s32 127, %v601_v45  ;;  %v256_v53 = vmul.u32 %v252_v19, %v229_v35 }
  0xc6   :  { %v6115_v4 = vsel %vm938_vm13, nan, %v3417_v57  ;;  %v1267_v40 = vadd.s32 1, %v5286_v28  ;;  %v234_v58 = vmul.u32 %v230_v20, %v229_v35  ;;  %v254_v17 = vmul.u32 %v252_v19, %v228_v37 }
  0xc7   :  { %7976 = vst [vmem:[#allocation13_spill] sm:$0xff] %v6115_v4  ;;  %5011 = vrot.lane.b32.xlu2 %v6115_v4, %s5407_s16  ;;  %v600_v1 = vor.u32 %v599_v26, %v598_v9  ;;  %v603_v60 = vshll.u32 %v602_v32, 23  ;;  %v6125_v57 = vsel %vm212_vm11, %v215_v21, %v217_v62  ;;  %v232_v45 = vmul.u32 %v230_v20, %v228_v37 }
  0xc8   :  { %v233_v61 = vmul.u32 %v231_v2, %v228_v37  ;;  %v258_v56 = vshll.u32 %v255_v47, 16  ;;  %v235_v15 = vmul.u32 %v231_v2, %v229_v35  ;;  %v257_v39 = vmul.u32 %v253_v8, %v229_v35 }
  0xc9   :  { %v604_v49 = vor.u32 4788187, %v603_v60  ;;  %v607_v48 = vcvt.s32.f32 %v600_v1  ;;  %v238_v42 = vshll.u32 %v234_v58, 16  ;;  %v259_v46 = vshrl.u32 %v255_v47, 16 }
  0xca   :  { %v236_v36 = vshll.u32 %v233_v61, 16  ;;  %v260_v33 = vshll.u32 %v256_v53, 16  ;;  %vm262_vm0 = vc.u32 %v254_v17, %v258_v56  ;;  %v264_v9 = vadd.s32 %v258_v56, %v254_v17 }
  0xcb   :  { %v605_v28 = vand.u32 2147483647, %v604_v49  ;;  %vm1268_vm1 = vcmp.gt.s32.totalorder %v1267_v40, 0  ;;  %v263_v54 = vsel %vm262_vm0, 1, %v7871_v43  ;;  %v237_v32 = vshrl.u32 %v233_v61, 16 }
  0xcc   :  { %vm240_vm2 = vc.u32 %v232_v45, %v236_v36  ;;  %v242_v19 = vadd.s32 %v236_v36, %v232_v45  ;;  %v1269_v21 = vsel %vm1268_vm1, %v1267_v40, 0  ;;  %v265_v26 = vadd.s32 %v263_v54, %v257_v39 }
  0xcd   :  { %v608_v62 = vmul.f32 %v607_v48, %v605_v28  ;;  %v241_v37 = vsel %vm240_vm2, 1, %v7871_v43  ;;  %vm266_vm5 = vc.u32 %v264_v9, %v260_v33  ;;  %v261_v20 = vshrl.u32 %v256_v53, 16 }
  0xce   :  { %v243_v35 = vadd.s32 %v241_v37, %v235_v15  ;;  %vm244_vm7 = vc.u32 %v242_v19, %v238_v42  ;;  %v267_v8 = vsel %vm266_vm5, 1, %v7871_v43  ;;  %v3098_v1 = vadd.s32 3, %v6121_v11 }
  0xcf   :  { %v609_v47 = vxor.u32 2147483648, %v608_v62  ;;  %v245_v49 = vsel %vm244_vm7, 1, %v7871_v43  ;;  %v269_v2 = vadd.s32 %v267_v8, %v265_v26  ;;  %v239_v60 = vshrl.u32 %v234_v58, 16 }
  0xd0   :  { %v247_v17 = vadd.s32 %v245_v49, %v243_v35  ;;  %v1271_v40 = vand.u32 31, %v1269_v21  ;;  %v6134_v39 = vadd.s32 %v264_v9, %v260_v33  ;;  %v1265_v42 = vor.u32 8388608, %v6058_v13 }
  0xd1   :  { %v610_v48 = vsel %vm489_vm10, %v609_v47, %v608_v62  ;;  %v270_v45 = vadd.s32 %v269_v2, %v259_v46  ;;  %v6140_v53 = vshrl.u32 %v1269_v21, 5  ;;  %v272_v28 = vmul.u32 %v6036_v41, %v6125_v57 }
  0xd2   :  { %v613_v15 = vsel %vm6064_vm4, %v5702_v55, %v610_v48  ;;  %v248_v61 = vadd.s32 %v247_v17, %v237_v32  ;;  %v6142_v56 = vsub.s32 32, %v1271_v40  ;;  %v1274_v33 = vshll.u32 %v7862_v25, %v1271_v40 }
  0xd3   :  { %v615_v58 = vmul.f32 %v613_v15, %v613_v15  ;;  %v271_v36 = vadd.s32 %v270_v45, %v261_v20  ;;  %v6147_v9 = vand.u32 3, %v3098_v1  ;;  %v1277_v55 = vshll.u32 %v7860_v27, %v1271_v40 }
  0xd4   :  { %v6149_v46 = vadd.s32 %v248_v61, %v239_v60  ;;  %v1275_v13 = vshrl.u32 %v7860_v27, %v6142_v56  ;;  %v1278_v21 = vshrl.u32 %v7858_v29, %v6142_v56  ;;  %v1280_v41 = vshll.u32 %v7858_v29, %v1271_v40 }
  0xd5   :  { %v616_v6 = vmul.f32 -0.001358992, %v615_v58  ;;  %v623_v19 = vmul.f32 -0.00019511016, %v615_v58  ;;  %v275_v54 = vadd.s32 1, %v271_v36  ;;  %v1281_v57 = vshrl.u32 %v7856_v31, %v6142_v56 }
  0xd6   :  { %vm274_vm9 = vc.u32 %v6149_v46, %v6134_v39  ;;  %vm1289_vm10 = vcmp.lt.s32.totalorder %v6140_v53, 1  ;;  %v6162_v32 = vor.u32 %v1275_v13, %v1274_v33  ;;  %v1283_v8 = vshll.u32 %v7856_v31, %v1271_v40 }
  0xd7   :  { %v617_v62 = vadd.f32 0.041655596, %v616_v6  ;;  %v624_v37 = vadd.f32 0.008332121, %v623_v19  ;;  %v276_v26 = vsel %vm274_vm9, %v275_v54, %v271_v36  ;;  %v7977_v47 = vmov 920167782  }
  0xd8   :  { %v277_v35 = vadd.s32 %v276_v26, %v272_v28  ;;  %v1284_v49 = vshrl.u32 %v7977_v47, %v6142_v56  ;;  %v1286_v20 = vshll.u32 %v7977_v47, %v1271_v40  ;;  %v6168_v60 = vor.u32 %v1278_v21, %v1277_v55 }
  0xd9   :  { %v618_v2 = vmul.f32 %v617_v62, %v615_v58  ;;  %v625_v1 = vmul.f32 %v624_v37, %v615_v58  ;;  %v7978_v17 = vmov 1326507024   ;;  %v6172_v61 = vor.u32 %v1281_v57, %v1280_v41 }
  0xda   :  { %v1287_v48 = vshrl.u32 %v7978_v17, %v6142_v56  ;;  %v278_v45 = vadd.s32 536870912, %v277_v35  ;;  %v1285_v36 = vor.u32 %v1284_v49, %v1283_v8  ;;  %vm1292_vm11 = vcmp.lt.s32.totalorder %v6140_v53, 4 }
  0xdb   :  { %v619_v28 = vadd.f32 -0.4999988, %v618_v2  ;;  %v626_v33 = vadd.f32 -0.16666654, %v625_v1  ;;  %vm1291_vm12 = vcmp.lt.s32.totalorder %v6140_v53, 3  ;;  %vm3100_vm3 = vcmp.lt.s32.totalorder %v6147_v9, 2 }
  0xdc   :  { %v1288_v13 = vor.u32 %v1287_v48, %v1286_v20  ;;  %v6176_v6 = vshrl.u32 %v278_v45, 30  ;;  %v1298_v40 = vsel %vm1292_vm11, %v1285_v36, 920167782  ;;  %v6181_v54 = vshll.u32 %v1265_v42, 8 }
  0xdd   :  { %v620_v55 = vmul.f32 %v619_v28, %v615_v58  ;;  %v627_v19 = vmul.f32 %v626_v33, %v615_v58  ;;  %vm1290_vm4 = vcmp.lt.s32.totalorder %v6140_v53, 2  ;;  %v1297_v41 = vsel %vm1289_vm10, %v6162_v32, %v6168_v60 }
  0xde   :  { %v280_v21 = vshll.u32 %v6176_v6, 30  ;;  %v1299_v57 = vsel %vm1291_vm12, %v6172_v61, %v1298_v40  ;;  %v1301_v42 = vsel %vm1289_vm10, %v6168_v60, %v6172_v61  ;;  %v1302_v37 = vsel %vm1292_vm11, %v1288_v13, 1326507024  ;;  %v6220_v13 = vld [vmem:[%s7838_s0 + $0x18] sm:$0xff] }
  0xdf   :  { %v6192_v62 = vadd.f32 1.0, %v620_v55  ;;  %v628_v58 = vadd.f32 1.0, %v627_v19  ;;  %vm3101_vm14 = vcmp.eq.s32.totalorder %v6147_v9, 0  ;;  %vm3104_vm0 = vcmp.eq.s32.totalorder %v6147_v9, 2 }
  0xe0   :  { %v281_v26 = vsub.s32 %v277_v35, %v280_v21  ;;  %v1303_v8 = vsel %vm1291_vm12, %v1285_v36, %v1302_v37  ;;  %v1300_v2 = vsel %vm1290_vm4, %v1297_v41, %v1299_v57  ;;  %v1306_v1 = vand.u32 65535, %v6181_v54 }
  0xe1   :  { %v6204_v49 = vmul.f32 %v628_v58, %v613_v15  ;;  %v7854_v20 = vxor.u32 2147483648, %v6192_v62  ;;  %v1304_v45 = vsel %vm1290_vm4, %v1301_v42, %v1303_v8  ;;  %v1307_v28 = vshrl.u32 %v6181_v54, 16 }
  0xe2   :  { %vm282_vm1 = vcmp.lt.s32.totalorder %v281_v26, 0  ;;  %v283_v48 = vsub.s32 0, %v281_v26  ;;  %v1308_v36 = vand.u32 65535, %v1304_v45  ;;  %v1309_v33 = vshrl.u32 %v1304_v45, 16 }
  0xe3   :  { %v7855_v35 = vxor.u32 2147483648, %v6204_v49  ;;  %v3106_v15 = vsel %vm3104_vm0, %v7854_v20, %v6204_v49  ;;  %vm630_vm2 = vweird.f32 %v6220_v13  ;;  %v1331_v42 = vshrl.u32 %v1300_v2, 16  ;;  %v6237_v20 = vld [vmem:[%s7838_s0 + $0x38] sm:$0xff] }
  0xe4   :  { %v284_v40 = vsel %vm282_vm1, %v283_v48, %v281_v26  ;;  %v1310_v21 = vmul.u32 %v1308_v36, %v1306_v1  ;;  %v1311_v41 = vmul.u32 %v1309_v33, %v1306_v1  ;;  %v1312_v58 = vmul.u32 %v1308_v36, %v1307_v28  ;;  %7980 = vst [vmem:[#allocation15_spill] sm:$0xff] %v6237_v20 }
  0xe5   :  { %v3103_v55 = vsel %vm3101_vm14, %v6192_v62, %v7855_v35  ;;  %v285_v19 = vclz %v284_v40  ;;  %v1313_v48 = vmul.u32 %v1309_v33, %v1307_v28  ;;  %vm181_vm5 = vcmp.lt.s32.totalorder %v5949_v22, 0 }
  0xe6   :  { %v3107_v57 = vsel %vm3100_vm3, %v3103_v55, %v3106_v15  ;;  %v1314_v45 = vshll.u32 %v1311_v41, 16  ;;  %v1316_v9 = vshll.u32 %v1312_v58, 16  ;;  %v1330_v15 = vand.u32 65535, %v1300_v2 }
  0xe7   :  { %v6232_v37 = vsel %vm630_vm2, nan, %v3107_v57  ;;  %v5266_v8 = vadd.s32 4294967294, %v285_v19  ;;  %v273_v40 = vadd.s32 %v6134_v39, %v6149_v46  ;;  %v303_v19 = vsub.s32 4, %v6176_v6 }
  0xe8   :  { %7979 = vst [vmem:[#allocation14_spill] sm:$0xff] %v6232_v37  ;;  %5007 = vrot.lane.b32.xlu1 %v6232_v37, %s5407_s16  ;;  %vm1318_vm9 = vc.u32 %v1310_v21, %v1314_v45  ;;  %v1320_v33 = vadd.s32 %v1314_v45, %v1310_v21  ;;  %v1333_v35 = vmul.u32 %v1331_v42, %v1306_v1  ;;  %v7981_v31 = vand.u32 2147483647, %v5949_v22 }
  0xe9   :  { %vm5267_vm7 = vcmp.lt.s32.totalorder %v5266_v8, 0  ;;  %v1319_v57 = vsel %vm1318_vm9, 1, %v7871_v43  ;;  %v7984_v39 = vmov 683565275   ;;  %v1315_v21 = vshrl.u32 %v1311_v41, 16 }
  0xea   :  { %v288_v55 = vsel %vm5267_vm7, 0, %v5266_v8  ;;  %vm6249_vm3 = vcmp.le.f32.partialorder %v7981_v31, 0.7853982  ;;  %v1321_v25 = vadd.s32 %v1319_v57, %v1313_v48  ;;  %v1273_v46 = vshrl.u32 %v7984_v39, %v6142_v56 }
  0xeb   :  { %v289_v2 = vsub.s32 32, %v288_v55  ;;  %v290_v27 = vshll.u32 %v281_v26, %v288_v55  ;;  %v293_v36 = vsub.s32 4294967266, %v288_v55  ;;  %vm1322_vm14 = vc.u32 %v1320_v33, %v1316_v9 }
  0xec   :  { %v1332_v8 = vmul.u32 %v1330_v15, %v1306_v1  ;;  %v1323_v59 = vsel %vm1322_vm14, 1, %v7871_v43  ;;  %v1334_v0 = vmul.u32 %v1330_v15, %v1307_v28  ;;  %v1294_v31 = vsel %vm1292_vm11, %v6172_v61, 2102212464 }
  0xed   :  { %v291_v45 = vshrl.u32 %v273_v40, %v289_v2  ;;  %v294_v4 = vadd.s32 127, %v293_v36  ;;  %v1325_v7 = vadd.s32 %v1323_v59, %v1321_v25  ;;  %v1335_v52 = vmul.u32 %v1331_v42, %v1307_v28 }
  0xee   :  { %v1336_v26 = vshll.u32 %v1333_v35, 16  ;;  %v304_v56 = vsel %vm181_vm5, %v303_v19, %v6176_v6  ;;  %v1338_v41 = vshll.u32 %v1334_v0, 16  ;;  %v1317_v1 = vshrl.u32 %v1312_v58, 16 }
  0xef   :  { %v292_v55 = vor.u32 %v291_v45, %v290_v27  ;;  %v295_v48 = vshll.u32 %v294_v4, 23  ;;  %v1106_v36 = vand.u32 2139095040, %v6237_v20  ;;  %v1326_v33 = vadd.s32 %v1325_v7, %v1315_v21 }
  0xf0   :  { %vm1340_vm0 = vc.u32 %v1332_v8, %v1336_v26  ;;  %v1342_v9 = vadd.s32 %v1336_v26, %v1332_v8  ;;  %v1293_v25 = vsel %vm1289_vm10, %v1273_v46, %v6162_v32  ;;  %v1337_v27 = vshrl.u32 %v1333_v35, 16 }
  0xf1   :  { %v296_v15 = vor.u32 4788187, %v295_v48  ;;  %v299_v40 = vcvt.s32.f32 %v292_v55  ;;  %v1341_v61 = vsel %vm1340_vm0, 1, %v7871_v43  ;;  %v1295_v6 = vsel %vm1291_vm12, %v6168_v60, %v1294_v31 }
  0xf2   :  { %v1343_v59 = vadd.s32 %v1341_v61, %v1335_v52  ;;  %vm1344_vm11 = vc.u32 %v1342_v9, %v1338_v41  ;;  %v1107_v58 = vshrl.u32 %v1106_v36, 23  ;;  %v6273_v7 = vsel %vm6249_vm3, 0, %v304_v56 }
  0xf3   :  { %v297_v4 = vand.u32 2147483647, %v296_v15  ;;  %v1345_v28 = vsel %vm1344_vm11, 1, %v7871_v43  ;;  %7985 = vst [vmem:[#allocation16_spill] sm:$0xff] %v6273_v7  ;;  %v1339_v42 = vshrl.u32 %v1334_v0, 16  ;;  %v1327_v2 = vadd.s32 %v1326_v33, %v1317_v1 }
  0xf4   :  { %v1347_v19 = vadd.s32 %v1345_v28, %v1343_v59  ;;  %v1346_v32 = vadd.s32 %v1342_v9, %v1338_v41  ;;  %v5283_v35 = vadd.s32 4294967169, %v1107_v58  ;;  %v1296_v52 = vsel %vm1290_vm4, %v1293_v25, %v1295_v6 }
  0xf5   :  { %v300_v57 = vmul.f32 %v299_v40, %v297_v4  ;;  %v7986_v21 = vand.u32 2147483647, %v6237_v20  ;;  %v2788_v31 = vadd.s32 3, %v6273_v7  ;;  %v1350_v55 = vmul.u32 %v6181_v54, %v1296_v52  ;;  %v6291_v40 = vld [vmem:[%s7838_s0 + $0x30] sm:$0xff] }
  0xf6   :  { %v1348_v46 = vadd.s32 %v1347_v19, %v1337_v27  ;;  %v1113_v45 = vadd.s32 1, %v5283_v35  ;;  %vm1352_vm10 = vc.u32 %v1327_v2, %v1346_v32  ;;  %7987 = vst [vmem:[#allocation17_spill] sm:$0xff] %v6291_v40  ;;  %v6293_v25 = vadd.s32 %v1346_v32, %v1327_v2 }
  0xf7   :  { %v1110_v60 = vand.u32 8388607, %v7986_v21  ;;  %v301_v8 = vxor.u32 2147483648, %v300_v57  ;;  %v6286_v36 = vand.u32 3, %v2788_v31  ;;  %v952_v28 = vand.u32 2139095040, %v6291_v40 }
  0xf8   :  { %v1349_v26 = vadd.s32 %v1348_v46, %v1339_v42  ;;  %vm1114_vm12 = vcmp.gt.s32.totalorder %v1113_v45, 0  ;;  %v7988_v19 = vmov 2475754826   ;;  %v7989_v46 = vmov 2131351028  }
  0xf9   :  { %v302_v0 = vsel %vm181_vm5, %v301_v8, %v300_v57  ;;  %v1111_v56 = vor.u32 8388608, %v1110_v60  ;;  %v1115_v41 = vsel %vm1114_vm12, %v1113_v45, 0  ;;  %vm2794_vm4 = vcmp.eq.s32.totalorder %v6286_v36, 2 }
  0xfa   :  { %v305_v53 = vsel %vm6249_vm3, %v5949_v22, %v302_v0  ;;  %v1353_v48 = vadd.s32 1, %v1349_v26  ;;  %v1117_v9 = vand.u32 31, %v1115_v41  ;;  %v6299_v58 = vshrl.u32 %v1115_v41, 5 }
  0xfb   :  { %v307_v1 = vmul.f32 %v305_v53, %v305_v53  ;;  %v6295_v27 = vshll.u32 %v1111_v56, 8  ;;  %vm2791_vm1 = vcmp.eq.s32.totalorder %v6286_v36, 0  ;;  %v7990_v8 = vmov 2102212464  }
  0xfc   :  { %v1354_v15 = vsel %vm1352_vm10, %v1353_v48, %v1349_v26  ;;  %v1118_v29 = vsub.s32 32, %v1117_v9  ;;  %v1120_v42 = vshll.u32 %v7984_v39, %v1117_v9  ;;  %v1123_v35 = vshll.u32 %v7988_v19, %v1117_v9 }
  0xfd   :  { %v308_v54 = vmul.f32 -0.001358992, %v307_v1  ;;  %v315_v33 = vmul.f32 -0.00019511016, %v307_v1  ;;  %v1355_v61 = vadd.s32 %v1354_v15, %v1350_v55  ;;  %v1126_v60 = vshll.u32 %v7989_v46, %v1117_v9 }
  0xfe   :  { %v1121_v57 = vshrl.u32 %v7988_v19, %v1118_v29  ;;  %v1124_v21 = vshrl.u32 %v7989_v46, %v1118_v29  ;;  %v1127_v45 = vshrl.u32 %v7990_v8, %v1118_v29  ;;  %v1129_v31 = vshll.u32 %v7990_v8, %v1117_v9 }
  0xff   :  { %v309_v59 = vadd.f32 0.041655596, %v308_v54  ;;  %v316_v4 = vadd.f32 0.008332121, %v315_v33  ;;  %v1356_v6 = vadd.s32 536870912, %v1355_v61  ;;  %v1130_v26 = vshrl.u32 %v7977_v47, %v1118_v29 }
 0x100   :  { %vm2790_vm5 = vcmp.lt.s32.totalorder %v6286_v36, 2  ;;  %v6315_v56 = vand.u32 65535, %v6295_v27  ;;  %vm7918_vm7 = vweird.f32 %v5949_v22  ;;  %v1122_v41 = vor.u32 %v1121_v57, %v1120_v42 }
 0x101   :  { %v310_v2 = vmul.f32 %v309_v59, %v307_v1  ;;  %v317_v32 = vmul.f32 %v316_v4, %v307_v1  ;;  %v6304_v52 = vshrl.u32 %v1356_v6, 30  ;;  %v1132_v15 = vshll.u32 %v7977_v47, %v1117_v9 }
 0x102   :  { %v1133_v54 = vshrl.u32 %v7978_v17, %v1118_v29  ;;  %v6321_v33 = vshrl.u32 %v6295_v27, 16  ;;  %v1131_v43 = vor.u32 %v1130_v26, %v1129_v31  ;;  %vm1135_vm9 = vcmp.lt.s32.totalorder %v6299_v58, 1 }
 0x103   :  { %v311_v0 = vadd.f32 -0.4999988, %v310_v2  ;;  %v318_v55 = vadd.f32 -0.16666654, %v317_v32  ;;  %v1358_v48 = vshll.u32 %v6304_v52, 30  ;;  %v1125_v2 = vor.u32 %v1124_v21, %v1123_v35 }
 0x104   :  { %v1128_v32 = vor.u32 %v1127_v45, %v1126_v60  ;;  %v1134_v51 = vor.u32 %v1133_v54, %v1132_v15  ;;  %v1119_v9 = vshrl.u32 %v7984_v39, %v1118_v29  ;;  %vm1137_vm14 = vcmp.lt.s32.totalorder %v6299_v58, 3 }
 0x105   :  { %v312_v59 = vmul.f32 %v311_v0, %v307_v1  ;;  %v319_v4 = vmul.f32 %v318_v55, %v307_v1  ;;  %v1359_v6 = vsub.s32 %v1355_v61, %v1358_v48  ;;  %vm1138_vm0 = vcmp.lt.s32.totalorder %v6299_v58, 4 }
 0x106   :  { %v953_v57 = vshrl.u32 %v952_v28, 23  ;;  %vm1136_vm11 = vcmp.lt.s32.totalorder %v6299_v58, 2  ;;  %v1144_v60 = vsel %vm1138_vm0, %v1131_v43, 920167782  ;;  %v1147_v45 = vsel %vm1135_vm9, %v1125_v2, %v1128_v32 }
 0x107   :  { %v6324_v10 = vadd.f32 1.0, %v312_v59  ;;  %v320_v7 = vadd.f32 1.0, %v319_v4  ;;  %vm1360_vm3 = vcmp.lt.s32.totalorder %v1359_v6, 0  ;;  %v1361_v42 = vsub.s32 0, %v1359_v6 }
 0x108   :  { %v1148_v29 = vsel %vm1138_vm0, %v1134_v51, 1326507024  ;;  %v1145_v28 = vsel %vm1137_vm14, %v1128_v32, %v1144_v60  ;;  %v1381_v0 = vsub.s32 4, %v6304_v52  ;;  %v5280_v55 = vadd.s32 4294967169, %v953_v57 }
 0x109   :  { %7991 = vst [vmem:[#allocation18_spill] sm:$0xff] %v6324_v10  ;;  %v6329_v1 = vmul.f32 %v320_v7, %v305_v53  ;;  %v7876_v61 = vxor.u32 2147483648, %v6324_v10  ;;  %v1362_v35 = vsel %vm1360_vm3, %v1361_v42, %v1359_v6  ;;  %v1143_v53 = vsel %vm1135_vm9, %v1122_v41, %v1125_v2 }
 0x10a   :  { %v1363_v21 = vclz %v1362_v35  ;;  %v1149_v51 = vsel %vm1137_vm14, %v1131_v43, %v1148_v29  ;;  %v1139_v15 = vsel %vm1135_vm9, %v1119_v9, %v1122_v41  ;;  %v1140_v54 = vsel %vm1138_vm0, %v1128_v32, 2102212464 }
 0x10b   :  { %7992 = vst [vmem:[#allocation19_spill] sm:$0xff] %v6329_v1  ;;  %v7877_v31 = vxor.u32 2147483648, %v6329_v1  ;;  %v2796_v7 = vsel %vm2794_vm4, %v7876_v61, %v6329_v1  ;;  %v1150_v59 = vsel %vm1136_vm11, %v1147_v45, %v1149_v51  ;;  %v1146_v43 = vsel %vm1136_vm11, %v1143_v53, %v1145_v28 }
 0x10c   :  { %v5287_v26 = vadd.s32 4294967294, %v1363_v21  ;;  %v1154_v42 = vand.u32 65535, %v1150_v59  ;;  %v1155_v41 = vshrl.u32 %v1150_v59, 16  ;;  %v1176_v9 = vand.u32 65535, %v1146_v43 }
 0x10d   :  { %v2793_v48 = vsel %vm2791_vm1, %v6324_v10, %v7877_v31  ;;  %v1141_v36 = vsel %vm1137_vm14, %v1125_v2, %v1140_v54  ;;  %vm1259_vm12 = vcmp.lt.s32.totalorder %v6000_v23, 0  ;;  %v631_v50 = vand.u32 3, %v6121_v11 }
 0x10e   :  { %v2797_v4 = vsel %vm2790_vm5, %v2793_v48, %v2796_v7  ;;  %vm5288_vm10 = vcmp.lt.s32.totalorder %v5287_v26, 0  ;;  %v1156_v45 = vmul.u32 %v1154_v42, %v6315_v56  ;;  %v959_v7 = vadd.s32 1, %v5280_v55 }
 0x10f   :  { %v6369_v57 = vsel %vm7918_vm7, nan, %v2797_v4  ;;  %v1366_v35 = vsel %vm5288_vm10, 0, %v5287_v26  ;;  %v1157_v26 = vmul.u32 %v1155_v41, %v6315_v56  ;;  %v1158_v51 = vmul.u32 %v1154_v42, %v6321_v33 }
 0x110   :  { %7993 = vst [vmem:[#allocation20_spill] sm:$0xff] %v6369_v57  ;;  %5003 = vrot.lane.b32.xlu0 %v6369_v57, %s5407_s16  ;;  %v1367_v32 = vsub.s32 32, %v1366_v35  ;;  %v1368_v21 = vshll.u32 %v1359_v6, %v1366_v35  ;;  %v1371_v60 = vsub.s32 4294967266, %v1366_v35  ;;  %v1382_v6 = vsel %vm1259_vm12, %v1381_v0, %v6304_v52 }
 0x111   :  { %v6386_v2 = vsel %vm1136_vm11, %v1139_v15, %v1141_v36  ;;  %v1177_v48 = vshrl.u32 %v1146_v43, 16  ;;  %v1180_v54 = vmul.u32 %v1176_v9, %v6321_v33  ;;  %v7994_v55 = vand.u32 2147483647, %v6000_v23 }
 0x112   :  { %v1369_v53 = vshrl.u32 %v6293_v25, %v1367_v32  ;;  %v1372_v28 = vadd.s32 127, %v1371_v60  ;;  %v1159_v42 = vmul.u32 %v1155_v41, %v6321_v33  ;;  %v1160_v35 = vshll.u32 %v1157_v26, 16 }
 0x113   :  { %vm6391_vm4 = vcmp.le.f32.partialorder %v7994_v55, 0.7853982  ;;  %v1161_v32 = vshrl.u32 %v1157_v26, 16  ;;  %v1162_v52 = vshll.u32 %v1158_v51, 16  ;;  %v1178_v58 = vmul.u32 %v1176_v9, %v6315_v56 }
 0x114   :  { %v1370_v59 = vor.u32 %v1369_v53, %v1368_v21  ;;  %v1373_v4 = vshll.u32 %v1372_v28, 23  ;;  %v1179_v0 = vmul.u32 %v1177_v48, %v6315_v56  ;;  %vm1164_vm1 = vc.u32 %v1156_v45, %v1160_v35 }
 0x115   :  { %v1166_v60 = vadd.s32 %v1160_v35, %v1156_v45  ;;  %v7997_v36 = vmov 0   ;;  %v1181_v61 = vmul.u32 %v1177_v48, %v6321_v33  ;;  %v1184_v21 = vshll.u32 %v1180_v54, 16 }
 0x116   :  { %v1374_v15 = vor.u32 4788187, %v1373_v4  ;;  %v1377_v43 = vcvt.s32.f32 %v1370_v59  ;;  %v1165_v55 = vsel %vm1164_vm1, 1, %v7997_v36  ;;  %v1182_v31 = vshll.u32 %v1179_v0, 16 }
 0x117   :  { %v1163_v28 = vshrl.u32 %v1158_v51, 16  ;;  %v1167_v41 = vadd.s32 %v1165_v55, %v1159_v42  ;;  %vm1168_vm5 = vc.u32 %v1166_v60, %v1162_v52  ;;  %vm960_vm3 = vcmp.gt.s32.totalorder %v959_v7, 0 }
 0x118   :  { %v1375_v53 = vand.u32 2147483647, %v1374_v15  ;;  %v1169_v26 = vsel %vm1168_vm5, 1, %v7997_v36  ;;  %vm1186_vm9 = vc.u32 %v1178_v58, %v1182_v31  ;;  %v1188_v9 = vadd.s32 %v1182_v31, %v1178_v58 }
 0x119   :  { %v1171_v4 = vadd.s32 %v1169_v26, %v1167_v41  ;;  %v1187_v59 = vsel %vm1186_vm9, 1, %v7997_v36  ;;  %v961_v45 = vsel %vm960_vm3, %v959_v7, 0  ;;  %v1183_v35 = vshrl.u32 %v1179_v0, 16 }
 0x11a   :  { %v1378_v56 = vmul.f32 %v1377_v43, %v1375_v53  ;;  %v1189_v29 = vadd.s32 %v1187_v59, %v1181_v61  ;;  %vm1190_vm14 = vc.u32 %v1188_v9, %v1184_v21  ;;  %v6402_v33 = vadd.s32 %v1188_v9, %v1184_v21 }
 0x11b   :  { %v1172_v15 = vadd.s32 %v1171_v4, %v1161_v32  ;;  %v1191_v51 = vsel %vm1190_vm14, 1, %v7997_v36  ;;  %v963_v42 = vand.u32 31, %v961_v45  ;;  %v6407_v52 = vsel %vm6391_vm4, 0, %v1382_v6 }
 0x11c   :  { %v1379_v48 = vxor.u32 2147483648, %v1378_v56  ;;  %7998 = vst [vmem:[#allocation21_spill] sm:$0xff] %v6407_v52  ;;  %v1185_v31 = vshrl.u32 %v1180_v54, 16  ;;  %v1193_v58 = vadd.s32 %v1191_v51, %v1189_v29  ;;  %v7999_v43 = vand.u32 2147483647, %v6291_v40 }
 0x11d   :  { %v6413_v7 = vadd.s32 %v1172_v15, %v1163_v28  ;;  %v1196_v32 = vmul.u32 %v6295_v27, %v6386_v2  ;;  %v6417_v0 = vsub.s32 32, %v963_v42  ;;  %v6422_v54 = vshrl.u32 %v961_v45, 5 }
 0x11e   :  { %v956_v60 = vand.u32 8388607, %v7999_v43  ;;  %v1380_v61 = vsel %vm1259_vm12, %v1379_v48, %v1378_v56  ;;  %v1194_v55 = vadd.s32 %v1193_v58, %v1183_v35  ;;  %v966_v29 = vshll.u32 %v7984_v39, %v963_v42 }
 0x11f   :  { %v1383_v6 = vsel %vm6391_vm4, %v6000_v23, %v1380_v61  ;;  %vm1198_vm0 = vc.u32 %v6413_v7, %v6402_v33  ;;  %v969_v53 = vshll.u32 %v7988_v19, %v963_v42  ;;  %v972_v28 = vshll.u32 %v7989_v46, %v963_v42 }
 0x120   :  { %v1385_v21 = vmul.f32 %v1383_v6, %v1383_v6  ;;  %v1195_v27 = vadd.s32 %v1194_v55, %v1185_v31  ;;  %v967_v2 = vshrl.u32 %v7988_v19, %v6417_v0  ;;  %v970_v25 = vshrl.u32 %v7989_v46, %v6417_v0 }
 0x121   :  { %v973_v41 = vshrl.u32 %v7990_v8, %v6417_v0  ;;  %v975_v56 = vshll.u32 %v7990_v8, %v963_v42  ;;  %v976_v4 = vshrl.u32 %v7977_v47, %v6417_v0  ;;  %v3873_v59 = vadd.s32 3, %v6407_v52 }
 0x122   :  { %v1386_v26 = vmul.f32 -0.001358992, %v1385_v21  ;;  %v1393_v9 = vmul.f32 -0.00019511016, %v1385_v21  ;;  %v1199_v45 = vadd.s32 1, %v1195_v27  ;;  %v6439_v35 = vor.u32 %v967_v2, %v966_v29 }
 0x123   :  { %vm981_vm11 = vcmp.lt.s32.totalorder %v6422_v54, 1  ;;  %v6442_v51 = vor.u32 %v970_v25, %v969_v53  ;;  %v978_v31 = vshll.u32 %v7977_v47, %v963_v42  ;;  %v6448_v43 = vor.u32 %v973_v41, %v972_v28 }
 0x124   :  { %v1387_v48 = vadd.f32 0.041655596, %v1386_v26  ;;  %v1394_v15 = vadd.f32 0.008332121, %v1393_v9  ;;  %v1200_v58 = vsel %vm1198_vm0, %v1199_v45, %v1195_v27  ;;  %v977_v61 = vor.u32 %v976_v4, %v975_v56 }
 0x125   :  { %v979_v55 = vshrl.u32 %v7978_v17, %v6417_v0  ;;  %v1201_v52 = vadd.s32 %v1200_v58, %v1196_v32  ;;  %vm984_vm10 = vcmp.lt.s32.totalorder %v6422_v54, 4  ;;  %v3874_v26 = vand.u32 3, %v3873_v59 }
 0x126   :  { %v1388_v29 = vmul.f32 %v1387_v48, %v1385_v21  ;;  %v1395_v2 = vmul.f32 %v1394_v15, %v1385_v21  ;;  %v957_v53 = vor.u32 8388608, %v956_v60  ;;  %vm983_vm12 = vcmp.lt.s32.totalorder %v6422_v54, 3 }
 0x127   :  { %v980_v25 = vor.u32 %v979_v55, %v978_v31  ;;  %v1202_v22 = vadd.s32 536870912, %v1201_v52  ;;  %vm982_vm4 = vcmp.lt.s32.totalorder %v6422_v54, 2  ;;  %v989_v28 = vsel %vm981_vm11, %v6439_v35, %v6442_v51 }
 0x128   :  { %v1389_v42 = vadd.f32 -0.4999988, %v1388_v29  ;;  %v1396_v9 = vadd.f32 -0.16666654, %v1395_v2  ;;  %v990_v32 = vsel %vm984_vm10, %v977_v61, 920167782  ;;  %v993_v60 = vsel %vm981_vm11, %v6442_v51, %v6448_v43 }
 0x129   :  { %v994_v27 = vsel %vm984_vm10, %v980_v25, 1326507024  ;;  %v6467_v4 = vshrl.u32 %v1202_v22, 30  ;;  %v991_v59 = vsel %vm983_vm12, %v6448_v43, %v990_v32  ;;  %v6474_v48 = vshll.u32 %v957_v53, 8 }
 0x12a   :  { %v1390_v41 = vmul.f32 %v1389_v42, %v1385_v21  ;;  %v1397_v56 = vmul.f32 %v1396_v9, %v1385_v21  ;;  %v995_v45 = vsel %vm983_vm12, %v977_v61, %v994_v27  ;;  %v992_v55 = vsel %vm982_vm4, %v989_v28, %v991_v59 }
 0x12b   :  { %v1204_v58 = vshll.u32 %v6467_v4, 30  ;;  %vm3879_vm1 = vcmp.eq.s32.totalorder %v3874_v26, 2  ;;  %v996_v22 = vsel %vm982_vm4, %v993_v60, %v995_v45  ;;  %v998_v21 = vand.u32 65535, %v6474_v48 }
 0x12c   :  { %v6476_v15 = vadd.f32 1.0, %v1390_v41  ;;  %v1398_v31 = vadd.f32 1.0, %v1397_v56  ;;  %v999_v29 = vshrl.u32 %v6474_v48, 16  ;;  %vm3875_vm5 = vcmp.lt.s32.totalorder %v3874_v26, 2 }
 0x12d   :  { %v1205_v53 = vsub.s32 %v1201_v52, %v1204_v58  ;;  %vm3876_vm9 = vcmp.eq.s32.totalorder %v3874_v26, 0  ;;  %v1000_v25 = vand.u32 65535, %v996_v22  ;;  %v1001_v42 = vshrl.u32 %v996_v22, 16 }
 0x12e   :  { %8000 = vst [vmem:[#allocation22_spill] sm:$0xff] %v6476_v15  ;;  %v6485_v2 = vmul.f32 %v1398_v31, %v1383_v6  ;;  %v7880_v61 = vxor.u32 2147483648, %v6476_v15  ;;  %v1023_v9 = vshrl.u32 %v992_v55, 16  ;;  %vm7889_vm14 = vweird.f32 %v6000_v23 }
 0x12f   :  { %vm1206_vm3 = vcmp.lt.s32.totalorder %v1205_v53, 0  ;;  %v1207_v60 = vsub.s32 0, %v1205_v53  ;;  %v1002_v6 = vmul.u32 %v1000_v25, %v998_v21  ;;  %v1003_v27 = vmul.u32 %v1001_v42, %v998_v21 }
 0x130   :  { %8001 = vst [vmem:[#allocation23_spill] sm:$0xff] %v6485_v2  ;;  %v7885_v28 = vxor.u32 2147483648, %v6485_v2  ;;  %v3881_v32 = vsel %vm3879_vm1, %v7880_v61, %v6485_v2  ;;  %v6493_v41 = vmul.u32 %v1000_v25, %v999_v29  ;;  %v1022_v59 = vand.u32 65535, %v992_v55 }
 0x131   :  { %v1208_v56 = vsel %vm1206_vm3, %v1207_v60, %v1205_v53  ;;  %v1005_v58 = vmul.u32 %v1001_v42, %v999_v29  ;;  %v1006_v22 = vshll.u32 %v1003_v27, 16  ;;  %v1025_v1 = vmul.u32 %v1023_v9, %v998_v21 }
 0x132   :  { %v3878_v52 = vsel %vm3876_vm9, %v6476_v15, %v7885_v28  ;;  %v1209_v31 = vclz %v1208_v56  ;;  %v1008_v10 = vshll.u32 %v6493_v41, 16  ;;  %v1197_v25 = vadd.s32 %v6402_v33, %v6413_v7 }
 0x133   :  { %v3882_v45 = vsel %vm3875_vm5, %v3878_v52, %v3881_v32  ;;  %vm1010_vm0 = vc.u32 %v1002_v6, %v1006_v22  ;;  %v1012_v26 = vadd.s32 %v1006_v22, %v1002_v6  ;;  %v1227_v55 = vsub.s32 4, %v6467_v4 }
 0x134   :  { %v6501_v61 = vsel %vm7889_vm14, nan, %v3882_v45  ;;  %v5284_v60 = vadd.s32 4294967294, %v1209_v31  ;;  %v965_v42 = vshrl.u32 %v7984_v39, %v6417_v0  ;;  %v1011_v32 = vsel %vm1010_vm0, 1, %v7997_v36  ;;  %v6516_v0 = vld [vmem:[%s7838_s0 + $0x58] sm:$0xff] }
 0x135   :  { %8002 = vst [vmem:[#allocation24_spill] sm:$0xff] %v6501_v61  ;;  %5017 = vrot.lane.b32.xlu2 %v6501_v61, %s5407_s16  ;;  %v1026_v52 = vmul.u32 %v1022_v59, %v999_v29  ;;  %v1013_v56 = vadd.s32 %v1011_v32, %v1005_v58  ;;  %vm1014_vm5 = vc.u32 %v1012_v26, %v1008_v10  ;;  %v1007_v61 = vshrl.u32 %v1003_v27, 16 }
 0x136   :  { %vm5285_vm1 = vcmp.lt.s32.totalorder %v5284_v60, 0  ;;  %v1024_v45 = vmul.u32 %v1022_v59, %v998_v21  ;;  %v1015_v23 = vsel %vm1014_vm5, 1, %v7997_v36  ;;  %v1028_v33 = vshll.u32 %v1025_v1, 16  ;;  %8003 = vst [vmem:[#allocation25_spill] sm:$0xff] %v6516_v0 }
 0x137   :  { %v1212_v28 = vsel %vm5285_vm1, 0, %v5284_v60  ;;  %v1017_v22 = vadd.s32 %v1015_v23, %v1013_v56  ;;  %vm1105_vm9 = vcmp.lt.s32.totalorder %v6237_v20, 0  ;;  %v985_v10 = vsel %vm981_vm11, %v965_v42, %v6439_v35 }
 0x138   :  { %v1213_v7 = vsub.s32 32, %v1212_v28  ;;  %v1214_v31 = vshll.u32 %v1205_v53, %v1212_v28  ;;  %v1217_v6 = vsub.s32 4294967266, %v1212_v28  ;;  %v1027_v21 = vmul.u32 %v1023_v9, %v999_v29 }
 0x139   :  { %v1030_v27 = vshll.u32 %v1026_v52, 16  ;;  %v1228_v53 = vsel %vm1105_vm9, %v1227_v55, %v6467_v4  ;;  %v986_v23 = vsel %vm984_vm10, %v6448_v43, 2102212464  ;;  %v1009_v28 = vshrl.u32 %v6493_v41, 16 }
 0x13a   :  { %v1215_v59 = vshrl.u32 %v1197_v25, %v1213_v7  ;;  %v1218_v58 = vadd.s32 127, %v1217_v6  ;;  %vm1032_vm3 = vc.u32 %v1024_v45, %v1028_v33  ;;  %v1034_v60 = vadd.s32 %v1028_v33, %v1024_v45 }
 0x13b   :  { %v1722_v26 = vand.u32 2139095040, %v6516_v0  ;;  %v1018_v29 = vadd.s32 %v1017_v22, %v1007_v61  ;;  %v1033_v9 = vsel %vm1032_vm3, 1, %v7997_v36  ;;  %v1029_v25 = vshrl.u32 %v1025_v1, 16 }
 0x13c   :  { %v1216_v32 = vor.u32 %v1215_v59, %v1214_v31  ;;  %v1219_v35 = vshll.u32 %v1218_v58, 23  ;;  %v1035_v42 = vadd.s32 %v1033_v9, %v1027_v21  ;;  %vm1036_vm11 = vc.u32 %v1034_v60, %v1030_v27 }
 0x13d   :  { %v1723_v56 = vshrl.u32 %v1722_v26, 23  ;;  %v987_v43 = vsel %vm983_vm12, %v6442_v51, %v986_v23  ;;  %v1037_v41 = vsel %vm1036_vm11, 1, %v7997_v36  ;;  %v8004_v45 = vand.u32 2147483647, %v6237_v20 }
 0x13e   :  { %v1220_v4 = vor.u32 4788187, %v1219_v35  ;;  %v1223_v55 = vcvt.s32.f32 %v1216_v32  ;;  %v1031_v61 = vshrl.u32 %v1026_v52, 16  ;;  %v1039_v7 = vadd.s32 %v1037_v41, %v1035_v42 }
 0x13f   :  { %vm6537_vm10 = vcmp.le.f32.partialorder %v8004_v45, 0.7853982  ;;  %v5295_v1 = vadd.s32 4294967169, %v1723_v56  ;;  %v1019_v22 = vadd.s32 %v1018_v29, %v1009_v28  ;;  %v1038_v21 = vadd.s32 %v1034_v60, %v1030_v27 }
 0x140   :  { %v1221_v31 = vand.u32 2147483647, %v1220_v4  ;;  %v6543_v6 = vsel %vm6537_vm10, 0, %v1228_v53  ;;  %v988_v51 = vsel %vm982_vm4, %v985_v10, %v987_v43  ;;  %v1040_v59 = vadd.s32 %v1039_v7, %v1029_v25 }
 0x141   :  { %8007 = vst [vmem:[#allocation26_spill] sm:$0xff] %v6543_v6  ;;  %v1729_v58 = vadd.s32 1, %v5295_v1  ;;  %v3718_v26 = vadd.s32 3, %v6543_v6  ;;  %v7888_v52 = vand.u32 2147483647, %v6516_v0  ;;  %v1042_v9 = vmul.u32 %v6474_v48, %v988_v51 }
 0x142   :  { %v1224_v23 = vmul.f32 %v1223_v55, %v1221_v31  ;;  %v1041_v32 = vadd.s32 %v1040_v59, %v1031_v61  ;;  %vm1044_vm0 = vc.u32 %v1019_v22, %v1038_v21  ;;  %vm7915_vm11 = vweird.f32 %v6237_v20 }
 0x143   :  { %vm1730_vm12 = vcmp.gt.s32.totalorder %v1729_v58, 0  ;;  %v6561_v25 = vand.u32 3, %v3718_v26  ;;  %v1726_v56 = vand.u32 8388607, %v7888_v52  ;;  %v8064_v11 = vxor.u32 2147483648, %v6204_v49 }
 0x144   :  { %v1225_v35 = vxor.u32 2147483648, %v1224_v23  ;;  %v1731_v53 = vsel %vm1730_vm12, %v1729_v58, 0  ;;  %v1045_v42 = vadd.s32 1, %v1041_v32  ;;  %v8065_v63 = vxor.u32 2147483648, %v6192_v62 }
 0x145   :  { %v1733_v28 = vand.u32 31, %v1731_v53  ;;  %v6565_v4 = vshrl.u32 %v1731_v53, 5  ;;  %vm3724_vm4 = vcmp.eq.s32.totalorder %v6561_v25, 2  ;;  %vm3721_vm1 = vcmp.eq.s32.totalorder %v6561_v25, 0 }
 0x146   :  { %v1226_v54 = vsel %vm1105_vm9, %v1225_v35, %v1224_v23  ;;  %v1046_v27 = vsel %vm1044_vm0, %v1045_v42, %v1041_v32  ;;  %v6582_v32 = vadd.s32 %v1038_v21, %v1019_v22  ;;  %v1727_v35 = vor.u32 8388608, %v1726_v56 }
 0x147   :  { %v6555_v10 = vsel %vm6537_vm10, %v6237_v20, %v1226_v54  ;;  %v6557_v60 = vsub.s32 32, %v1733_v28  ;;  %v1047_v48 = vadd.s32 %v1046_v27, %v1042_v9  ;;  %v1736_v55 = vshll.u32 %v7984_v39, %v1733_v28 }
 0x148   :  { %v1231_v29 = vmul.f32 %v6555_v10, %v6555_v10  ;;  %v1739_v43 = vshll.u32 %v7988_v19, %v1733_v28  ;;  %v1742_v41 = vshll.u32 %v7989_v46, %v1733_v28  ;;  %v1745_v51 = vshll.u32 %v7990_v8, %v1733_v28 }
 0x149   :  { %v1048_v61 = vadd.s32 536870912, %v1047_v48  ;;  %v1737_v7 = vshrl.u32 %v7988_v19, %v6557_v60  ;;  %v1740_v1 = vshrl.u32 %v7989_v46, %v6557_v60  ;;  %v1743_v31 = vshrl.u32 %v7990_v8, %v6557_v60 }
 0x14a   :  { %v1232_v45 = vmul.f32 -0.001358992, %v1231_v29  ;;  %v1239_v33 = vmul.f32 -0.00019511016, %v1231_v29  ;;  %v1746_v59 = vshrl.u32 %v7977_v47, %v6557_v60  ;;  %v1748_v9 = vshll.u32 %v7977_v47, %v1733_v28 }
 0x14b   :  { %v6579_v26 = vshrl.u32 %v1048_v61, 30  ;;  %v1749_v53 = vshrl.u32 %v7978_v17, %v6557_v60  ;;  %v1738_v52 = vor.u32 %v1737_v7, %v1736_v55  ;;  %v6594_v22 = vor.u32 %v1740_v1, %v1739_v43 }
 0x14c   :  { %v1233_v58 = vadd.f32 0.041655596, %v1232_v45  ;;  %v1240_v23 = vadd.f32 0.008332121, %v1239_v33  ;;  %v6591_v45 = vld [vmem:[%s7838_s0 + $0x50] sm:$0xff]  ;;  %v1744_v21 = vor.u32 %v1743_v31, %v1742_v41  ;;  %v1747_v56 = vor.u32 %v1746_v59, %v1745_v51 }
 0x14d   :  { %v1050_v27 = vshll.u32 %v6579_v26, 30  ;;  %8008 = vst [vmem:[#allocation27_spill] sm:$0xff] %v6591_v45  ;;  %vm1751_vm5 = vcmp.lt.s32.totalorder %v6565_v4, 1  ;;  %vm3720_vm9 = vcmp.lt.s32.totalorder %v6561_v25, 2  ;;  %vm1754_vm3 = vcmp.lt.s32.totalorder %v6565_v4, 4 }
 0x14e   :  { %v1234_v42 = vmul.f32 %v1233_v58, %v1231_v29  ;;  %v1241_v54 = vmul.f32 %v1240_v23, %v1231_v29  ;;  %v1750_v55 = vor.u32 %v1749_v53, %v1748_v9  ;;  %vm1753_vm10 = vcmp.lt.s32.totalorder %v6565_v4, 3 }
 0x14f   :  { %v6598_v61 = vsub.s32 %v1047_v48, %v1050_v27  ;;  %v6603_v7 = vshll.u32 %v1727_v35, 8  ;;  %v1568_v43 = vand.u32 2139095040, %v6591_v45  ;;  %vm951_vm0 = vcmp.lt.s32.totalorder %v6291_v40, 0 }
 0x150   :  { %v1235_v28 = vadd.f32 -0.4999988, %v1234_v42  ;;  %v1242_v33 = vadd.f32 -0.16666654, %v1241_v54  ;;  %vm1752_vm14 = vcmp.lt.s32.totalorder %v6565_v4, 2  ;;  %v1759_v48 = vsel %vm1751_vm5, %v1738_v52, %v6594_v22 }
 0x151   :  { %vm1052_vm12 = vcmp.lt.s32.totalorder %v6598_v61, 0  ;;  %v1053_v31 = vsub.s32 0, %v6598_v61  ;;  %v1760_v51 = vsel %vm1754_vm3, %v1747_v56, 920167782  ;;  %v1763_v35 = vsel %vm1751_vm5, %v6594_v22, %v1744_v21 }
 0x152   :  { %v1236_v41 = vmul.f32 %v1235_v28, %v1231_v29  ;;  %v1243_v1 = vmul.f32 %v1242_v33, %v1231_v29  ;;  %v1761_v53 = vsel %vm1753_vm10, %v1744_v21, %v1760_v51  ;;  %v1764_v42 = vsel %vm1754_vm3, %v1750_v55, 1326507024 }
 0x153   :  { %v1054_v23 = vsel %vm1052_vm12, %v1053_v31, %v6598_v61  ;;  %v1569_v54 = vshrl.u32 %v1568_v43, 23  ;;  %v1765_v33 = vsel %vm1753_vm10, %v1747_v56, %v1764_v42  ;;  %v1762_v55 = vsel %vm1752_vm14, %v1759_v48, %v1761_v53 }
 0x154   :  { %v6616_v58 = vadd.f32 1.0, %v1236_v41  ;;  %v1244_v29 = vadd.f32 1.0, %v1243_v1  ;;  %v1055_v9 = vclz %v1054_v23  ;;  %v1768_v41 = vand.u32 65535, %v6603_v7 }
 0x155   :  { %v8011_v1 = vand.u32 2147483647, %v6291_v40  ;;  %v1769_v43 = vshrl.u32 %v6603_v7, 16  ;;  %v1073_v23 = vsub.s32 4, %v6579_v26  ;;  %v5292_v42 = vadd.s32 4294967169, %v1569_v54 }
 0x156   :  { %8009 = vst [vmem:[#allocation28_spill] sm:$0xff] %v6616_v58  ;;  %v6627_v27 = vmul.f32 %v1244_v29, %v6555_v10  ;;  %v7891_v28 = vxor.u32 2147483648, %v6616_v58  ;;  %v5281_v51 = vadd.s32 4294967294, %v1055_v9  ;;  %v1766_v10 = vsel %vm1752_vm14, %v1763_v35, %v1765_v33 }
 0x157   :  { %vm6635_vm12 = vcmp.le.f32.partialorder %v8011_v1, 0.7853982  ;;  %v1735_v9 = vshrl.u32 %v7984_v39, %v6557_v60  ;;  %v1770_v48 = vand.u32 65535, %v1766_v10  ;;  %v1771_v53 = vshrl.u32 %v1766_v10, 16 }
 0x158   :  { %8010 = vst [vmem:[#allocation29_spill] sm:$0xff] %v6627_v27  ;;  %v7895_v29 = vxor.u32 2147483648, %v6627_v27  ;;  %v3726_v56 = vsel %vm3724_vm4, %v7891_v28, %v6627_v27  ;;  %vm5282_vm8 = vcmp.lt.s32.totalorder %v5281_v51, 0  ;;  %v1792_v1 = vand.u32 65535, %v1762_v55 }
 0x159   :  { %v1058_v33 = vsel %vm5282_vm8, 0, %v5281_v51  ;;  %v1793_v59 = vshrl.u32 %v1762_v55, 16  ;;  %v1074_v54 = vsel %vm951_vm0, %v1073_v23, %v6579_v26  ;;  %v1755_v51 = vsel %vm1751_vm5, %v1735_v9, %v1738_v52 }
 0x15a   :  { %v3723_v35 = vsel %vm3721_vm1, %v6616_v58, %v7895_v29  ;;  %v1059_v6 = vsub.s32 32, %v1058_v33  ;;  %v1060_v15 = vshll.u32 %v6598_v61, %v1058_v33  ;;  %v1063_v60 = vsub.s32 4294967266, %v1058_v33 }
 0x15b   :  { %v3727_v28 = vsel %vm3720_vm9, %v3723_v35, %v3726_v56  ;;  %v1756_v55 = vsel %vm1754_vm3, %v1744_v21, 2102212464  ;;  %v1772_v56 = vmul.u32 %v1770_v48, %v1768_v41  ;;  %v1773_v35 = vmul.u32 %v1771_v53, %v1768_v41 }
 0x15c   :  { %v6663_v10 = vsel %vm7915_vm11, nan, %v3727_v28  ;;  %v1061_v25 = vshrl.u32 %v6582_v32, %v1059_v6  ;;  %v1064_v61 = vadd.s32 127, %v1063_v60  ;;  %v1774_v28 = vmul.u32 %v1770_v48, %v1769_v43 }
 0x15d   :  { %8014 = vst [vmem:[#allocation30_spill] sm:$0xff] %v6663_v10  ;;  %5015 = vrot.lane.b32.xlu1 %v6663_v10, %s5407_s16  ;;  %v1794_v33 = vmul.u32 %v1792_v1, %v1768_v41  ;;  %v1795_v29 = vmul.u32 %v1793_v59, %v1768_v41  ;;  %v1796_v20 = vmul.u32 %v1792_v1, %v1769_v43  ;;  %v1776_v27 = vshll.u32 %v1773_v35, 16 }
 0x15e   :  { %v1062_v58 = vor.u32 %v1061_v25, %v1060_v15  ;;  %v1065_v26 = vshll.u32 %v1064_v61, 23  ;;  %v1775_v23 = vmul.u32 %v1771_v53, %v1769_v43  ;;  %v6677_v52 = vsel %vm6635_vm12, 0, %v1074_v54 }
 0x15f   :  { %8015 = vst [vmem:[#allocation31_spill] sm:$0xff] %v6677_v52  ;;  %v1778_v21 = vshll.u32 %v1774_v28, 16  ;;  %v1797_v9 = vmul.u32 %v1793_v59, %v1769_v43  ;;  %v1798_v2 = vshll.u32 %v1795_v29, 16  ;;  %vm1780_vm8 = vc.u32 %v1772_v56, %v1776_v27 }
 0x160   :  { %v1066_v10 = vor.u32 4788187, %v1065_v26  ;;  %v1069_v6 = vcvt.s32.f32 %v1062_v58  ;;  %v1782_v32 = vadd.s32 %v1776_v27, %v1772_v56  ;;  %v1757_v41 = vsel %vm1753_vm10, %v6594_v22, %v1756_v55 }
 0x161   :  { %v1777_v48 = vshrl.u32 %v1773_v35, 16  ;;  %v1781_v15 = vsel %vm1780_vm8, 1, %v7997_v36  ;;  %v1800_v53 = vshll.u32 %v1796_v20, 16  ;;  %vm1802_vm1 = vc.u32 %v1794_v33, %v1798_v2 }
 0x162   :  { %v1067_v1 = vand.u32 2147483647, %v1066_v10  ;;  %v1783_v60 = vadd.s32 %v1781_v15, %v1775_v23  ;;  %vm1784_vm4 = vc.u32 %v1782_v32, %v1778_v21  ;;  %v1803_v59 = vsel %vm1802_vm1, 1, %v7997_v36 }
 0x163   :  { %v1785_v54 = vsel %vm1784_vm4, 1, %v7997_v36  ;;  %v1804_v43 = vadd.s32 %v1798_v2, %v1794_v33  ;;  %v1575_v58 = vadd.s32 1, %v5292_v42  ;;  %v1779_v27 = vshrl.u32 %v1774_v28, 16 }
 0x164   :  { %v1070_v25 = vmul.f32 %v1069_v6, %v1067_v1  ;;  %v1787_v61 = vadd.s32 %v1785_v54, %v1783_v60  ;;  %v1805_v56 = vadd.s32 %v1803_v59, %v1797_v9  ;;  %v1758_v22 = vsel %vm1752_vm14, %v1755_v51, %v1757_v41 }
 0x165   :  { %v1799_v55 = vshrl.u32 %v1795_v29, 16  ;;  %vm1806_vm5 = vc.u32 %v1804_v43, %v1800_v53  ;;  %vm1576_vm9 = vcmp.gt.s32.totalorder %v1575_v58, 0  ;;  %v3563_v21 = vadd.s32 3, %v6677_v52 }
 0x166   :  { %v1071_v10 = vxor.u32 2147483648, %v1070_v25  ;;  %v1788_v35 = vadd.s32 %v1787_v61, %v1777_v48  ;;  %v1807_v26 = vsel %vm1806_vm5, 1, %v7997_v36  ;;  %v1577_v23 = vsel %vm1576_vm9, %v1575_v58, 0 }
 0x167   :  { %v1801_v32 = vshrl.u32 %v1796_v20, 16  ;;  %v1809_v2 = vadd.s32 %v1807_v26, %v1805_v56  ;;  %v1579_v42 = vand.u32 31, %v1577_v23  ;;  %v6693_v4 = vadd.s32 %v1804_v43, %v1800_v53 }
 0x168   :  { %v1072_v28 = vsel %vm951_vm0, %v1071_v10, %v1070_v25  ;;  %v6691_v33 = vadd.s32 %v1788_v35, %v1779_v27  ;;  %v1812_v41 = vmul.u32 %v6603_v7, %v1758_v22  ;;  %v8016_v20 = vand.u32 2147483647, %v6591_v45 }
 0x169   :  { %v1075_v29 = vsel %vm6635_vm12, %v6291_v40, %v1072_v28  ;;  %v1810_v51 = vadd.s32 %v1809_v2, %v1799_v55  ;;  %v6698_v9 = vsub.s32 32, %v1579_v42  ;;  %v6703_v15 = vand.u32 3, %v3563_v21 }
 0x16a   :  { %v1077_v6 = vmul.f32 %v1075_v29, %v1075_v29  ;;  %v1572_v48 = vand.u32 8388607, %v8016_v20  ;;  %v6705_v60 = vshrl.u32 %v1577_v23, 5  ;;  %v1582_v53 = vshll.u32 %v7984_v39, %v1579_v42 }
 0x16b   :  { %v1811_v1 = vadd.s32 %v1810_v51, %v1801_v32  ;;  %vm1814_vm14 = vc.u32 %v6691_v33, %v6693_v4  ;;  %v1585_v31 = vshll.u32 %v7988_v19, %v1579_v42  ;;  %v1586_v7 = vshrl.u32 %v7989_v46, %v6698_v9 }
 0x16c   :  { %v1078_v54 = vmul.f32 -0.001358992, %v1077_v6  ;;  %v1085_v59 = vmul.f32 -0.00019511016, %v1077_v6  ;;  %v1588_v58 = vshll.u32 %v7989_v46, %v1579_v42  ;;  %v1591_v25 = vshll.u32 %v7990_v8, %v1579_v42 }
 0x16d   :  { %v1815_v43 = vadd.s32 1, %v1811_v1  ;;  %v1589_v56 = vshrl.u32 %v7990_v8, %v6698_v9  ;;  %v1592_v22 = vshrl.u32 %v7977_v47, %v6698_v9  ;;  %v1583_v10 = vshrl.u32 %v7988_v19, %v6698_v9 }
 0x16e   :  { %v1079_v27 = vadd.f32 0.041655596, %v1078_v54  ;;  %v1086_v61 = vadd.f32 0.008332121, %v1085_v59  ;;  %v1594_v35 = vshll.u32 %v7977_v47, %v1579_v42  ;;  %v1595_v26 = vshrl.u32 %v7978_v17, %v6698_v9 }
 0x16f   :  { %v1816_v55 = vsel %vm1814_vm14, %v1815_v43, %v1811_v1  ;;  %v1573_v2 = vor.u32 8388608, %v1572_v48  ;;  %v6724_v28 = vor.u32 %v1586_v7, %v1585_v31  ;;  %v1593_v51 = vor.u32 %v1592_v22, %v1591_v25  ;;  %v6736_v31 = vld [vmem:[%s7838_s0 + $0x48] sm:$0xff] }
 0x170   :  { %v1080_v23 = vmul.f32 %v1079_v27, %v1077_v6  ;;  %v1087_v21 = vmul.f32 %v1086_v61, %v1077_v6  ;;  %v1817_v32 = vadd.s32 %v1816_v55, %v1812_v41  ;;  %v1596_v20 = vor.u32 %v1595_v26, %v1594_v35  ;;  %8017 = vst [vmem:[#allocation32_spill] sm:$0xff] %v6736_v31 }
 0x171   :  { %v1590_v1 = vor.u32 %v1589_v56, %v1588_v58  ;;  %vm1092_vm3 = vweird.f32 %v6291_v40  ;;  %vm3565_vm10 = vcmp.lt.s32.totalorder %v6703_v15, 2  ;;  %v1584_v42 = vor.u32 %v1583_v10, %v1582_v53 }
 0x172   :  { %v1081_v54 = vadd.f32 -0.4999988, %v1080_v23  ;;  %v1088_v59 = vadd.f32 -0.16666654, %v1087_v21  ;;  %v1818_v57 = vadd.s32 536870912, %v1817_v32  ;;  %vm1597_vm0 = vcmp.lt.s32.totalorder %v6705_v60, 1 }
 0x173   :  { %vm1600_vm12 = vcmp.lt.s32.totalorder %v6705_v60, 4  ;;  %vm1599_vm8 = vcmp.lt.s32.totalorder %v6705_v60, 3  ;;  %vm1598_vm4 = vcmp.lt.s32.totalorder %v6705_v60, 2  ;;  %v6743_v58 = vshll.u32 %v1573_v2, 8 }
 0x174   :  { %v1082_v43 = vmul.f32 %v1081_v54, %v1077_v6  ;;  %v1089_v41 = vmul.f32 %v1088_v59, %v1077_v6  ;;  %v6730_v48 = vshrl.u32 %v1818_v57, 30  ;;  %v1606_v53 = vsel %vm1600_vm12, %v1593_v51, 920167782 }
 0x175   :  { %v1610_v7 = vsel %vm1600_vm12, %v1596_v20, 1326507024  ;;  %v1609_v27 = vsel %vm1597_vm0, %v6724_v28, %v1590_v1  ;;  %vm3569_vm1 = vcmp.eq.s32.totalorder %v6703_v15, 2  ;;  %v1605_v61 = vsel %vm1597_vm0, %v1584_v42, %v6724_v28 }
 0x176   :  { %v6745_v6 = vadd.f32 1.0, %v1082_v43  ;;  %v1090_v57 = vadd.f32 1.0, %v1089_v41  ;;  %v1820_v25 = vshll.u32 %v6730_v48, 30  ;;  %v1611_v56 = vsel %vm1599_vm8, %v1593_v51, %v1610_v7 }
 0x177   :  { %v1414_v22 = vand.u32 2139095040, %v6736_v31  ;;  %v1607_v26 = vsel %vm1599_vm8, %v1590_v1, %v1606_v53  ;;  %vm3566_vm5 = vcmp.eq.s32.totalorder %v6703_v15, 0  ;;  %v1612_v23 = vsel %vm1598_vm4, %v1609_v27, %v1611_v56 }
 0x178   :  { %8018 = vst [vmem:[#allocation33_spill] sm:$0xff] %v6745_v6  ;;  %v6758_v55 = vmul.f32 %v1090_v57, %v1075_v29  ;;  %v7905_v10 = vxor.u32 2147483648, %v6745_v6  ;;  %v1821_v35 = vsub.s32 %v1817_v32, %v1820_v25  ;;  %v1614_v21 = vand.u32 65535, %v6743_v58 }
 0x179   :  { %v1615_v2 = vshrl.u32 %v6743_v58, 16  ;;  %v1581_v20 = vshrl.u32 %v7984_v39, %v6698_v9  ;;  %v1608_v54 = vsel %vm1598_vm4, %v1605_v61, %v1607_v26  ;;  %v1616_v59 = vand.u32 65535, %v1612_v23 }
 0x17a   :  { %8019 = vst [vmem:[#allocation34_spill] sm:$0xff] %v6758_v55  ;;  %v7906_v51 = vxor.u32 2147483648, %v6758_v55  ;;  %v3571_v29 = vsel %vm3569_vm1, %v7905_v10, %v6758_v55  ;;  %vm1822_vm9 = vcmp.lt.s32.totalorder %v1821_v35, 0  ;;  %v1823_v32 = vsub.s32 0, %v1821_v35 }
 0x17b   :  { %v1617_v43 = vshrl.u32 %v1612_v23, 16  ;;  %v1602_v7 = vsel %vm1600_vm12, %v1590_v1, 2102212464  ;;  %v1415_v57 = vshrl.u32 %v1414_v22, 23  ;;  %v1618_v56 = vmul.u32 %v1616_v59, %v1614_v21 }
 0x17c   :  { %v3568_v41 = vsel %vm3566_vm5, %v6745_v6, %v7906_v51  ;;  %v1824_v53 = vsel %vm1822_vm9, %v1823_v32, %v1821_v35  ;;  %v1620_v26 = vmul.u32 %v1616_v59, %v1615_v2  ;;  %v1638_v23 = vand.u32 65535, %v1608_v54 }
 0x17d   :  { %v3572_v25 = vsel %vm3565_vm10, %v3568_v41, %v3571_v29  ;;  %v1825_v27 = vclz %v1824_v53  ;;  %v1619_v9 = vmul.u32 %v1617_v43, %v1614_v21  ;;  %v1639_v10 = vshrl.u32 %v1608_v54, 16 }
 0x17e   :  { %v6785_v61 = vsel %vm1092_vm3, nan, %v3572_v25  ;;  %v1621_v51 = vmul.u32 %v1617_v43, %v1615_v2  ;;  %v1813_v15 = vadd.s32 %v6693_v4, %v6691_v33  ;;  %v1601_v29 = vsel %vm1597_vm0, %v1581_v20, %v1584_v42 }
 0x17f   :  { %8020 = vst [vmem:[#allocation35_spill] sm:$0xff] %v6785_v61  ;;  %5013 = vrot.lane.b32.xlu0 %v6785_v61, %s5407_s16  ;;  %v5296_v32 = vadd.s32 4294967294, %v1825_v27  ;;  %v1622_v1 = vshll.u32 %v1619_v9, 16  ;;  %v1624_v41 = vshll.u32 %v1620_v26, 16  ;;  %v5289_v53 = vadd.s32 4294967169, %v1415_v57 }
 0x180   :  { %vm1721_vm14 = vcmp.lt.s32.totalorder %v6516_v0, 0  ;;  %v1603_v54 = vsel %vm1599_vm8, %v6724_v28, %v1602_v7  ;;  %v1641_v27 = vmul.u32 %v1639_v10, %v1614_v21  ;;  %v1642_v22 = vmul.u32 %v1638_v23, %v1615_v2 }
 0x181   :  { %vm5297_vm10 = vcmp.lt.s32.totalorder %v5296_v32, 0  ;;  %vm1626_vm12 = vc.u32 %v1618_v56, %v1622_v1  ;;  %v1628_v59 = vadd.s32 %v1622_v1, %v1618_v56  ;;  %v1623_v20 = vshrl.u32 %v1619_v9, 16 }
 0x182   :  { %v1828_v43 = vsel %vm5297_vm10, 0, %v5296_v32  ;;  %v1627_v25 = vsel %vm1626_vm12, 1, %v7997_v36  ;;  %v1640_v57 = vmul.u32 %v1638_v23, %v1614_v21  ;;  %v1421_v37 = vadd.s32 1, %v5289_v53 }
 0x183   :  { %v1829_v33 = vsub.s32 32, %v1828_v43  ;;  %v1830_v4 = vshll.u32 %v1821_v35, %v1828_v43  ;;  %v1833_v61 = vsub.s32 4294967266, %v1828_v43  ;;  %v1629_v42 = vadd.s32 %v1627_v25, %v1621_v51 }
 0x184   :  { %vm1630_vm0 = vc.u32 %v1628_v59, %v1624_v41  ;;  %v1843_v55 = vsub.s32 4, %v6730_v48  ;;  %v1643_v56 = vmul.u32 %v1639_v10, %v1615_v2  ;;  %v1644_v32 = vshll.u32 %v1641_v27, 16 }
 0x185   :  { %v1831_v40 = vshrl.u32 %v1813_v15, %v1829_v33  ;;  %v1834_v6 = vadd.s32 127, %v1833_v61  ;;  %v1631_v28 = vsel %vm1630_vm0, 1, %v7997_v36  ;;  %v1646_v1 = vshll.u32 %v1642_v22, 16 }
 0x186   :  { %v1633_v7 = vadd.s32 %v1631_v28, %v1629_v42  ;;  %v8021_v52 = vand.u32 2147483647, %v6516_v0  ;;  %v1604_v21 = vsel %vm1598_vm4, %v1601_v29, %v1603_v54  ;;  %v1625_v61 = vshrl.u32 %v1620_v26, 16 }
 0x187   :  { %v1832_v51 = vor.u32 %v1831_v40, %v1830_v4  ;;  %v1835_v9 = vshll.u32 %v1834_v6, 23  ;;  %vm1648_vm1 = vc.u32 %v1640_v57, %v1644_v32  ;;  %v1650_v15 = vadd.s32 %v1644_v32, %v1640_v57 }
 0x188   :  { %vm6803_vm8 = vcmp.le.f32.partialorder %v8021_v52, 0.7853982  ;;  %v1634_v23 = vadd.s32 %v1633_v7, %v1623_v20  ;;  %vm1422_vm5 = vcmp.gt.s32.totalorder %v1421_v37, 0  ;;  %v1649_v2 = vsel %vm1648_vm1, 1, %v7997_v36 }
 0x189   :  { %v1836_v41 = vor.u32 4788187, %v1835_v9  ;;  %v1839_v10 = vcvt.s32.f32 %v1832_v51  ;;  %v1423_v53 = vsel %vm1422_vm5, %v1421_v37, 0  ;;  %v1844_v52 = vsel %vm1721_vm14, %v1843_v55, %v6730_v48 }
 0x18a   :  { %v1645_v59 = vshrl.u32 %v1641_v27, 16  ;;  %v1651_v40 = vadd.s32 %v1649_v2, %v1643_v56  ;;  %vm1652_vm9 = vc.u32 %v1650_v15, %v1646_v1  ;;  %v8024_v26 = vand.u32 2147483647, %v6736_v31 }
 0x18b   :  { %v1837_v6 = vand.u32 2147483647, %v1836_v41  ;;  %v1653_v60 = vsel %vm1652_vm9, 1, %v7997_v36  ;;  %v1425_v54 = vand.u32 31, %v1423_v53  ;;  %v6816_v43 = vadd.s32 %v1634_v23, %v1625_v61 }
 0x18c   :  { %v1418_v29 = vand.u32 8388607, %v8024_v26  ;;  %v1647_v25 = vshrl.u32 %v1642_v22, 16  ;;  %v6818_v33 = vadd.s32 %v1650_v15, %v1646_v1  ;;  %v1655_v37 = vadd.s32 %v1653_v60, %v1651_v40 }
 0x18d   :  { %v1840_v4 = vmul.f32 %v1839_v10, %v1837_v6  ;;  %v6820_v42 = vshrl.u32 %v1423_v53, 5  ;;  %v6822_v48 = vsub.s32 32, %v1425_v54  ;;  %v1428_v55 = vshll.u32 %v7984_v39, %v1425_v54 }
 0x18e   :  { %v1656_v27 = vadd.s32 %v1655_v37, %v1645_v59  ;;  %v1431_v20 = vshll.u32 %v7988_v19, %v1425_v54  ;;  %v1434_v57 = vshll.u32 %v7989_v46, %v1425_v54  ;;  %v1437_v28 = vshll.u32 %v7990_v8, %v1425_v54 }
 0x18f   :  { %v1841_v7 = vxor.u32 2147483648, %v1840_v4  ;;  %v1429_v22 = vshrl.u32 %v7988_v19, %v6822_v48  ;;  %v1432_v56 = vshrl.u32 %v7989_v46, %v6822_v48  ;;  %v1440_v32 = vshll.u32 %v7977_v47, %v1425_v54 }
 0x190   :  { %v1657_v1 = vadd.s32 %v1656_v27, %v1647_v25  ;;  %v1435_v51 = vshrl.u32 %v7990_v8, %v6822_v48  ;;  %v1438_v9 = vshrl.u32 %v7977_v47, %v6822_v48  ;;  %v1441_v61 = vshrl.u32 %v7978_v17, %v6822_v48 }
 0x191   :  { %v1842_v23 = vsel %vm1721_vm14, %v1841_v7, %v1840_v4  ;;  %v6843_v15 = vsel %vm6803_vm8, 0, %v1844_v52  ;;  %v1658_v41 = vmul.u32 %v6743_v58, %v1604_v21  ;;  %vm1660_vm4 = vc.u32 %v6816_v43, %v6818_v33 }
 0x192   :  { %8025 = vst [vmem:[#allocation36_spill] sm:$0xff] %v6843_v15  ;;  %v1845_v10 = vsel %vm6803_vm8, %v6516_v0, %v1842_v23  ;;  %v1661_v2 = vadd.s32 1, %v1657_v1  ;;  %v1419_v53 = vor.u32 8388608, %v1418_v29  ;;  %v1439_v59 = vor.u32 %v1438_v9, %v1437_v28 }
 0x193   :  { %v1847_v40 = vmul.f32 %v1845_v10, %v1845_v10  ;;  %v6851_v6 = vor.u32 %v1429_v22, %v1428_v55  ;;  %v6853_v60 = vor.u32 %v1432_v56, %v1431_v20  ;;  %vm1443_vm14 = vcmp.lt.s32.totalorder %v6820_v42, 1 }
 0x194   :  { %v1662_v52 = vsel %vm1660_vm4, %v1661_v2, %v1657_v1  ;;  %v6856_v26 = vor.u32 %v1435_v51, %v1434_v57  ;;  %v1442_v58 = vor.u32 %v1441_v61, %v1440_v32  ;;  %vm1446_vm10 = vcmp.lt.s32.totalorder %v6820_v42, 4 }
 0x195   :  { %v1848_v21 = vmul.f32 -0.001358992, %v1847_v40  ;;  %v1855_v54 = vmul.f32 -0.00019511016, %v1847_v40  ;;  %v1663_v35 = vadd.s32 %v1662_v52, %v1658_v41  ;;  %vm1445_vm12 = vcmp.lt.s32.totalorder %v6820_v42, 3 }
 0x196   :  { %v4338_v29 = vadd.s32 3, %v6843_v15  ;;  %v1452_v25 = vsel %vm1446_vm10, %v1439_v59, 920167782  ;;  %v6863_v27 = vshll.u32 %v1419_v53, 8  ;;  %vm1444_vm0 = vcmp.lt.s32.totalorder %v6820_v42, 2 }
 0x197   :  { %v1849_v37 = vadd.f32 0.041655596, %v1848_v21  ;;  %v1856_v4 = vadd.f32 0.008332121, %v1855_v54  ;;  %v1664_v55 = vadd.s32 536870912, %v1663_v35  ;;  %v1451_v20 = vsel %vm1443_vm14, %v6851_v6, %v6853_v60 }
 0x198   :  { %v1453_v57 = vsel %vm1445_vm12, %v6856_v26, %v1452_v25  ;;  %v1456_v28 = vsel %vm1446_vm10, %v1442_v58, 1326507024  ;;  %v1455_v32 = vsel %vm1443_vm14, %v6853_v60, %v6856_v26  ;;  %v4339_v1 = vand.u32 3, %v4338_v29 }
 0x199   :  { %v1850_v7 = vmul.f32 %v1849_v37, %v1847_v40  ;;  %v1857_v22 = vmul.f32 %v1856_v4, %v1847_v40  ;;  %v6875_v56 = vshrl.u32 %v1664_v55, 30  ;;  %v1457_v51 = vsel %vm1445_vm12, %v1439_v59, %v1456_v28 }
 0x19a   :  { %v1454_v41 = vsel %vm1444_vm0, %v1451_v20, %v1453_v57  ;;  %v1458_v2 = vsel %vm1444_vm0, %v1455_v32, %v1457_v51  ;;  %v1460_v53 = vand.u32 65535, %v6863_v27  ;;  %v1461_v52 = vshrl.u32 %v6863_v27, 16 }
 0x19b   :  { %v1851_v9 = vadd.f32 -0.4999988, %v1850_v7  ;;  %v1858_v61 = vadd.f32 -0.16666654, %v1857_v22  ;;  %v1666_v23 = vshll.u32 %v6875_v56, 30  ;;  %vm7923_vm8 = vweird.f32 %v6516_v0 }
 0x19c   :  { %vm4341_vm1 = vcmp.eq.s32.totalorder %v4339_v1, 0  ;;  %v1462_v59 = vand.u32 65535, %v1458_v2  ;;  %v1463_v29 = vshrl.u32 %v1458_v2, 16  ;;  %v1485_v25 = vshrl.u32 %v1454_v41, 16 }
 0x19d   :  { %v1852_v58 = vmul.f32 %v1851_v9, %v1847_v40  ;;  %v1859_v21 = vmul.f32 %v1858_v61, %v1847_v40  ;;  %v1667_v54 = vsub.s32 %v1663_v35, %v1666_v23  ;;  %vm4344_vm9 = vcmp.eq.s32.totalorder %v4339_v1, 2 }
 0x19e   :  { %v1464_v20 = vmul.u32 %v1462_v59, %v1460_v53  ;;  %v1465_v57 = vmul.u32 %v1463_v29, %v1460_v53  ;;  %v6893_v28 = vmul.u32 %v1462_v59, %v1461_v52  ;;  %v1484_v35 = vand.u32 65535, %v1454_v41 }
 0x19f   :  { %v6891_v37 = vadd.f32 1.0, %v1852_v58  ;;  %v1860_v4 = vadd.f32 1.0, %v1859_v21  ;;  %vm1668_vm5 = vcmp.lt.s32.totalorder %v1667_v54, 0  ;;  %v1669_v55 = vsub.s32 0, %v1667_v54 }
 0x1a0   :  { %v1467_v51 = vmul.u32 %v1463_v29, %v1461_v52  ;;  %v1468_v9 = vshll.u32 %v1465_v57, 16  ;;  %v1487_v61 = vmul.u32 %v1485_v25, %v1460_v53  ;;  %vm4340_vm4 = vcmp.lt.s32.totalorder %v4339_v1, 2 }
 0x1a1   :  { %8026 = vst [vmem:[#allocation37_spill] sm:$0xff] %v6891_v37  ;;  %v6895_v7 = vmul.f32 %v1860_v4, %v1845_v10  ;;  %v7916_v40 = vxor.u32 2147483648, %v6891_v37  ;;  %v1670_v22 = vsel %vm1668_vm5, %v1669_v55, %v1667_v54  ;;  %v1470_v58 = vshll.u32 %v6893_v28, 16 }
 0x1a2   :  { %v1671_v32 = vclz %v1670_v22  ;;  %v1659_v10 = vadd.s32 %v6818_v33, %v6816_v43  ;;  %vm1472_vm11 = vc.u32 %v1464_v20, %v1468_v9  ;;  %v1474_v59 = vadd.s32 %v1468_v9, %v1464_v20 }
 0x1a3   :  { %8027 = vst [vmem:[#allocation38_spill] sm:$0xff] %v6895_v7  ;;  %v7919_v23 = vxor.u32 2147483648, %v6895_v7  ;;  %v4346_v2 = vsel %vm4344_vm9, %v7916_v40, %v6895_v7  ;;  %v1473_v29 = vsel %vm1472_vm11, 1, %v7997_v36  ;;  %v1486_v4 = vmul.u32 %v1484_v35, %v1460_v53 }
 0x1a4   :  { %v5293_v21 = vadd.s32 4294967294, %v1671_v32  ;;  %v1488_v55 = vmul.u32 %v1484_v35, %v1461_v52  ;;  %vm1567_vm5 = vcmp.lt.s32.totalorder %v6591_v45, 0  ;;  %v1475_v40 = vadd.s32 %v1473_v29, %v1467_v51 }
 0x1a5   :  { %v4343_v41 = vsel %vm4341_vm1, %v6891_v37, %v7919_v23  ;;  %v1490_v15 = vshll.u32 %v1487_v61, 16  ;;  %vm1476_vm7 = vc.u32 %v1474_v59, %v1470_v58  ;;  %v1489_v20 = vmul.u32 %v1485_v25, %v1461_v52 }
 0x1a6   :  { %v4347_v22 = vsel %vm4340_vm4, %v4343_v41, %v4346_v2  ;;  %vm5294_vm9 = vcmp.lt.s32.totalorder %v5293_v21, 0  ;;  %v1469_v35 = vshrl.u32 %v1465_v57, 16  ;;  %v1427_v9 = vshrl.u32 %v7984_v39, %v6822_v48 }
 0x1a7   :  { %v6913_v43 = vsel %vm7923_vm8, nan, %v4347_v22  ;;  %v1674_v33 = vsel %vm5294_vm9, 0, %v5293_v21  ;;  %v1448_v51 = vsel %vm1446_vm10, %v6856_v26, 2102212464  ;;  %v1477_v2 = vsel %vm1476_vm7, 1, %v7997_v36 }
 0x1a8   :  { %8028 = vst [vmem:[#allocation39_spill] sm:$0xff] %v6913_v43  ;;  %5023 = vrot.lane.b32.xlu2 %v6913_v43, %s5407_s16  ;;  %v1675_v1 = vsub.s32 32, %v1674_v33  ;;  %v1676_v32 = vshll.u32 %v1667_v54, %v1674_v33  ;;  %v1679_v53 = vsub.s32 4294967266, %v1674_v33  ;;  %v1492_v41 = vshll.u32 %v1488_v55, 16  ;;  %v6926_v54 = vld [vmem:[%s7838_s0 + $0x70] sm:$0xff] }
 0x1a9   :  { %v1479_v52 = vadd.s32 %v1477_v2, %v1475_v40  ;;  %vm1494_vm11 = vc.u32 %v1486_v4, %v1490_v15  ;;  %8029 = vst [vmem:[#allocation40_spill] sm:$0xff] %v6926_v54  ;;  %v1689_v25 = vsub.s32 4, %v6875_v56  ;;  %v1471_v48 = vshrl.u32 %v6893_v28, 16 }
 0x1aa   :  { %v1677_v21 = vshrl.u32 %v1659_v10, %v1675_v1  ;;  %v1680_v58 = vadd.s32 127, %v1679_v53  ;;  %v1495_v57 = vsel %vm1494_vm11, 1, %v7997_v36  ;;  %v1496_v59 = vadd.s32 %v1490_v15, %v1486_v4 }
 0x1ab   :  { %v1480_v22 = vadd.s32 %v1479_v52, %v1469_v35  ;;  %v1497_v33 = vadd.s32 %v1495_v57, %v1489_v20  ;;  %v1447_v40 = vsel %vm1443_vm14, %v1427_v9, %v6851_v6  ;;  %v1491_v10 = vshrl.u32 %v1487_v61, 16 }
 0x1ac   :  { %v1678_v26 = vor.u32 %v1677_v21, %v1676_v32  ;;  %v1681_v29 = vshll.u32 %v1680_v58, 23  ;;  %vm1498_vm7 = vc.u32 %v1496_v59, %v1492_v41  ;;  %v2184_v1 = vand.u32 2139095040, %v6926_v54 }
 0x1ad   :  { %v1449_v28 = vsel %vm1445_vm12, %v6853_v60, %v1448_v51  ;;  %v1499_v15 = vsel %vm1498_vm7, 1, %v7997_v36  ;;  %v1690_v4 = vsel %vm1567_vm5, %v1689_v25, %v6875_v56  ;;  %v1493_v20 = vshrl.u32 %v1488_v55, 16 }
 0x1ae   :  { %v1682_v53 = vor.u32 4788187, %v1681_v29  ;;  %v1685_v2 = vcvt.s32.f32 %v1678_v26  ;;  %v1501_v32 = vadd.s32 %v1499_v15, %v1497_v33  ;;  %v2185_v35 = vshrl.u32 %v2184_v1, 23 }
 0x1af   :  { %v8030_v6 = vand.u32 2147483647, %v6591_v45  ;;  %v6948_v21 = vadd.s32 %v1480_v22, %v1471_v48  ;;  %v6950_v58 = vadd.s32 %v1496_v59, %v1492_v41  ;;  %v1450_v60 = vsel %vm1444_vm0, %v1447_v40, %v1449_v28  ;;  %v6970_v40 = vld [vmem:[%s7838_s0 + $0x68] sm:$0xff] }
 0x1b0   :  { %v1683_v9 = vand.u32 2147483647, %v1682_v53  ;;  %v1502_v51 = vadd.s32 %v1501_v32, %v1491_v10  ;;  %v7920_v56 = vand.u32 2147483647, %v6926_v54  ;;  %v5304_v55 = vadd.s32 4294967169, %v2185_v35 }
 0x1b1   :  { %vm6944_vm14 = vcmp.le.f32.partialorder %v8030_v6, 0.7853982  ;;  %v1504_v48 = vmul.u32 %v6863_v27, %v1450_v60  ;;  %vm1506_vm10 = vc.u32 %v6948_v21, %v6950_v58  ;;  %vm7945_vm9 = vweird.f32 %v6591_v45 }
 0x1b2   :  { %v1686_v52 = vmul.f32 %v1685_v2, %v1683_v9  ;;  %v6957_v25 = vsel %vm6944_vm14, 0, %v1690_v4  ;;  %v1503_v57 = vadd.s32 %v1502_v51, %v1493_v20  ;;  %v2191_v26 = vadd.s32 1, %v5304_v55 }
 0x1b3   :  { %8033 = vst [vmem:[#allocation41_spill] sm:$0xff] %v6957_v25  ;;  %v4183_v42 = vadd.s32 3, %v6957_v25  ;;  %v2188_v59 = vand.u32 8388607, %v7920_v56  ;;  %v2030_v20 = vand.u32 2139095040, %v6970_v40 }
 0x1b4   :  { %v1687_v29 = vxor.u32 2147483648, %v1686_v52  ;;  %v1507_v41 = vadd.s32 1, %v1503_v57  ;;  %vm2192_vm12 = vcmp.gt.s32.totalorder %v2191_v26, 0 }
 0x1b5   :  { %v2193_v33 = vsel %vm2192_vm12, %v2191_v26, 0  ;;  %v6979_v28 = vand.u32 3, %v4183_v42  ;;  %v2189_v15 = vor.u32 8388608, %v2188_v59 }
 0x1b6   :  { %v1688_v22 = vsel %vm1567_vm5, %v1687_v29, %v1686_v52  ;;  %v1508_v10 = vsel %vm1506_vm10, %v1507_v41, %v1503_v57  ;;  %v2195_v1 = vand.u32 31, %v2193_v33  ;;  %vm1413_vm5 = vcmp.lt.s32.totalorder %v6736_v31, 0 }
 0x1b7   :  { %v6975_v27 = vsel %vm6944_vm14, %v6591_v45, %v1688_v22  ;;  %v1509_v2 = vadd.s32 %v1508_v10, %v1504_v48  ;;  %vm4189_vm0 = vcmp.eq.s32.totalorder %v6979_v28, 2  ;;  %v6994_v48 = vshrl.u32 %v2193_v33, 5 }
 0x1b8   :  { %v1693_v53 = vmul.f32 %v6975_v27, %v6975_v27  ;;  %v6981_v4 = vsub.s32 32, %v2195_v1  ;;  %v2198_v61 = vshll.u32 %v7984_v39, %v2195_v1  ;;  %v2201_v60 = vshll.u32 %v7988_v19, %v2195_v1 }
 0x1b9   :  { %v1510_v6 = vadd.s32 536870912, %v1509_v2  ;;  %v2207_v55 = vshll.u32 %v7990_v8, %v2195_v1  ;;  %v2204_v42 = vshll.u32 %v7989_v46, %v2195_v1  ;;  %vm4186_vm1 = vcmp.eq.s32.totalorder %v6979_v28, 0 }
 0x1ba   :  { %v1694_v32 = vmul.f32 -0.001358992, %v1693_v53  ;;  %v1701_v35 = vmul.f32 -0.00019511016, %v1693_v53  ;;  %v2199_v9 = vshrl.u32 %v7988_v19, %v6981_v4  ;;  %v2202_v51 = vshrl.u32 %v7989_v46, %v6981_v4 }
 0x1bb   :  { %v1511_v26 = vshrl.u32 %v1510_v6, 30  ;;  %v2208_v29 = vshrl.u32 %v7977_v47, %v6981_v4  ;;  %v2205_v41 = vshrl.u32 %v7990_v8, %v6981_v4  ;;  %v2210_v56 = vshll.u32 %v7977_v47, %v2195_v1 }
 0x1bc   :  { %v1695_v52 = vadd.f32 0.041655596, %v1694_v32  ;;  %v1702_v57 = vadd.f32 0.008332121, %v1701_v35  ;;  %v2031_v32 = vshrl.u32 %v2030_v20, 23  ;;  %v7001_v35 = vor.u32 %v2199_v9, %v2198_v61 }
 0x1bd   :  { %v1512_v23 = vshll.u32 %v1511_v26, 30  ;;  %v2209_v6 = vor.u32 %v2208_v29, %v2207_v55  ;;  %v2211_v33 = vshrl.u32 %v7978_v17, %v6981_v4  ;;  %vm4185_vm4 = vcmp.lt.s32.totalorder %v6979_v28, 2 }
 0x1be   :  { %v1696_v22 = vmul.f32 %v1695_v52, %v1693_v53  ;;  %v1703_v10 = vmul.f32 %v1702_v57, %v1693_v53  ;;  %v7008_v57 = vor.u32 %v2202_v51, %v2201_v60  ;;  %v2206_v20 = vor.u32 %v2205_v41, %v2204_v42 }
 0x1bf   :  { %v1513_v52 = vsub.s32 %v1509_v2, %v1512_v23  ;;  %vm2213_vm11 = vcmp.lt.s32.totalorder %v6994_v48, 1  ;;  %vm2215_vm7 = vcmp.lt.s32.totalorder %v6994_v48, 3  ;;  %vm2216_vm14 = vcmp.lt.s32.totalorder %v6994_v48, 4 }
 0x1c0   :  { %v1697_v25 = vadd.f32 -0.4999988, %v1696_v22  ;;  %v1704_v43 = vadd.f32 -0.16666654, %v1703_v10  ;;  %v2212_v55 = vor.u32 %v2211_v33, %v2210_v56  ;;  %vm2214_vm12 = vcmp.lt.s32.totalorder %v6994_v48, 2 }
 0x1c1   :  { %vm1514_vm10 = vcmp.lt.s32.totalorder %v1513_v52, 0  ;;  %v1515_v9 = vsub.s32 0, %v1513_v52  ;;  %v2222_v23 = vsel %vm2216_vm14, %v2209_v6, 920167782  ;;  %v7017_v2 = vshll.u32 %v2189_v15, 8 }
 0x1c2   :  { %v1698_v1 = vmul.f32 %v1697_v25, %v1693_v53  ;;  %v1705_v61 = vmul.f32 %v1704_v43, %v1693_v53  ;;  %v2221_v25 = vsel %vm2213_vm11, %v7001_v35, %v7008_v57  ;;  %v8035_v43 = vand.u32 2147483647, %v6736_v31 }
 0x1c3   :  { %v1516_v29 = vsel %vm1514_vm10, %v1515_v9, %v1513_v52  ;;  %v1535_v42 = vsub.s32 4, %v1511_v26  ;;  %v2223_v15 = vsel %vm2215_vm7, %v2206_v20, %v2222_v23  ;;  %v5301_v41 = vadd.s32 4294967169, %v2031_v32 }
 0x1c4   :  { %v7019_v60 = vadd.f32 1.0, %v1698_v1  ;;  %v1706_v51 = vadd.f32 1.0, %v1705_v61  ;;  %vm7027_vm8 = vcmp.le.f32.partialorder %v8035_v43, 0.7853982  ;;  %v1517_v53 = vclz %v1516_v29 }
 0x1c5   :  { %v1505_v33 = vadd.s32 %v6950_v58, %v6948_v21  ;;  %v2225_v1 = vsel %vm2213_vm11, %v7008_v57, %v2206_v20  ;;  %v2224_v9 = vsel %vm2214_vm12, %v2221_v25, %v2223_v15  ;;  %v2226_v23 = vsel %vm2216_vm14, %v2212_v55, 1326507024 }
 0x1c6   :  { %8034 = vst [vmem:[#allocation42_spill] sm:$0xff] %v7019_v60  ;;  %v7034_v22 = vmul.f32 %v1706_v51, %v6975_v27  ;;  %v7924_v10 = vxor.u32 2147483648, %v7019_v60  ;;  %v5290_v61 = vadd.s32 4294967294, %v1517_v53  ;;  %v2230_v32 = vand.u32 65535, %v7017_v2 }
 0x1c7   :  { %v2227_v58 = vsel %vm2215_vm7, %v2209_v6, %v2226_v23  ;;  %v2231_v51 = vshrl.u32 %v7017_v2, 16  ;;  %v1536_v29 = vsel %vm1413_vm5, %v1535_v42, %v1511_v26  ;;  %v2037_v25 = vadd.s32 1, %v5301_v41 }
 0x1c8   :  { %8038 = vst [vmem:[#allocation43_spill] sm:$0xff] %v7034_v22  ;;  %v7926_v27 = vxor.u32 2147483648, %v7034_v22  ;;  %v4191_v21 = vsel %vm4189_vm0, %v7924_v10, %v7034_v22  ;;  %vm5291_vm10 = vcmp.lt.s32.totalorder %v5290_v61, 0  ;;  %v2228_v55 = vsel %vm2214_vm12, %v2225_v1, %v2227_v58 }
 0x1c9   :  { %v1520_v53 = vsel %vm5291_vm10, 0, %v5290_v61  ;;  %v2232_v15 = vand.u32 65535, %v2228_v55  ;;  %v2255_v10 = vshrl.u32 %v2224_v9, 16  ;;  %v2197_v42 = vshrl.u32 %v7984_v39, %v6981_v4 }
 0x1ca   :  { %v4188_v43 = vsel %vm4186_vm1, %v7019_v60, %v7926_v27  ;;  %v1521_v23 = vsub.s32 32, %v1520_v53  ;;  %v1522_v59 = vshll.u32 %v1513_v52, %v1520_v53  ;;  %v1525_v0 = vsub.s32 4294967266, %v1520_v53 }
 0x1cb   :  { %v4192_v6 = vsel %vm4185_vm4, %v4188_v43, %v4191_v21  ;;  %v2254_v41 = vand.u32 65535, %v2224_v9  ;;  %v8040_v1 = vand.u32 2147483647, %v6970_v40  ;;  %v2233_v21 = vshrl.u32 %v2228_v55, 16 }
 0x1cc   :  { %v7069_v26 = vsel %vm7945_vm9, nan, %v4192_v6  ;;  %v1523_v28 = vshrl.u32 %v1505_v33, %v1521_v23  ;;  %v1526_v61 = vadd.s32 127, %v1525_v0  ;;  %vm2038_vm0 = vcmp.gt.s32.totalorder %v2037_v25, 0 }
 0x1cd   :  { %8039 = vst [vmem:[#allocation44_spill] sm:$0xff] %v7069_v26  ;;  %v7075_v58 = vand.u32 8388607, %v8040_v1  ;;  %5021 = vrot.lane.b32.xlu1 %v7069_v26, %s5407_s16  ;;  %v7081_v52 = vsel %vm7027_vm8, 0, %v1536_v29  ;;  %v2218_v43 = vsel %vm2216_vm14, %v2206_v20, 2102212464  ;;  %v2236_v4 = vmul.u32 %v2232_v15, %v2231_v51 }
 0x1ce   :  { %8041 = vst [vmem:[#allocation45_spill] sm:$0xff] %v7081_v52  ;;  %v2257_v9 = vmul.u32 %v2255_v10, %v2230_v32  ;;  %v1524_v53 = vor.u32 %v1523_v28, %v1522_v59  ;;  %v1527_v6 = vshll.u32 %v1526_v61, 23  ;;  %v2234_v1 = vmul.u32 %v2232_v15, %v2230_v32 }
 0x1cf   :  { %v2235_v27 = vmul.u32 %v2233_v21, %v2230_v32  ;;  %v2217_v33 = vsel %vm2213_vm11, %v2197_v42, %v7001_v35  ;;  %v2237_v0 = vmul.u32 %v2233_v21, %v2231_v51  ;;  %v2256_v55 = vmul.u32 %v2254_v41, %v2230_v32 }
 0x1d0   :  { %v2258_v23 = vmul.u32 %v2254_v41, %v2231_v51  ;;  %v1528_v45 = vor.u32 4788187, %v1527_v6  ;;  %v1531_v60 = vcvt.s32.f32 %v1524_v53  ;;  %v2240_v22 = vshll.u32 %v2236_v4, 16 }
 0x1d1   :  { %v2238_v29 = vshll.u32 %v2235_v27, 16  ;;  %v2219_v20 = vsel %vm2215_vm7, %v7008_v57, %v2218_v43  ;;  %v2259_v37 = vmul.u32 %v2255_v10, %v2231_v51  ;;  %v2260_v59 = vshll.u32 %v2257_v9, 16 }
 0x1d2   :  { %v2262_v28 = vshll.u32 %v2258_v23, 16  ;;  %v1529_v15 = vand.u32 2147483647, %v1528_v45  ;;  %v2239_v61 = vshrl.u32 %v2235_v27, 16  ;;  %v2039_v42 = vsel %vm2038_vm0, %v2037_v25, 0 }
 0x1d3   :  { %vm2242_vm1 = vc.u32 %v2234_v1, %v2238_v29  ;;  %v2244_v7 = vadd.s32 %v2238_v29, %v2234_v1  ;;  %vm2264_vm4 = vc.u32 %v2256_v55, %v2260_v59  ;;  %v2266_v32 = vadd.s32 %v2260_v59, %v2256_v55 }
 0x1d4   :  { %v2243_v35 = vsel %vm2242_vm1, 1, %v7997_v36  ;;  %v1532_v41 = vmul.f32 %v1531_v60, %v1529_v15  ;;  %v2265_v53 = vsel %vm2264_vm4, 1, %v7997_v36  ;;  %v2261_v10 = vshrl.u32 %v2257_v9, 16 }
 0x1d5   :  { %v2245_v21 = vadd.s32 %v2243_v35, %v2237_v0  ;;  %vm2246_vm11 = vc.u32 %v2244_v7, %v2240_v22  ;;  %v2267_v51 = vadd.s32 %v2265_v53, %v2259_v37  ;;  %vm2268_vm7 = vc.u32 %v2266_v32, %v2262_v28 }
 0x1d6   :  { %v2247_v57 = vsel %vm2246_vm11, 1, %v7997_v36  ;;  %v1533_v45 = vxor.u32 2147483648, %v1532_v41  ;;  %v2241_v27 = vshrl.u32 %v2236_v4, 16  ;;  %v2269_v6 = vsel %vm2268_vm7, 1, %v7997_v36 }
 0x1d7   :  { %v2249_v43 = vadd.s32 %v2247_v57, %v2245_v21  ;;  %v2220_v1 = vsel %vm2214_vm12, %v2217_v33, %v2219_v20  ;;  %v2263_v55 = vshrl.u32 %v2258_v23, 16  ;;  %v2271_v25 = vadd.s32 %v2269_v6, %v2267_v51 }
 0x1d8   :  { %v2041_v60 = vand.u32 31, %v2039_v42  ;;  %v1534_v7 = vsel %vm1413_vm5, %v1533_v45, %v1532_v41  ;;  %v7100_v0 = vadd.s32 %v2266_v32, %v2262_v28  ;;  %v2035_v37 = vor.u32 8388608, %v7075_v58 }
 0x1d9   :  { %v2250_v22 = vadd.s32 %v2249_v43, %v2239_v61  ;;  %v1537_v4 = vsel %vm7027_vm8, %v6736_v31, %v1534_v7  ;;  %v2272_v9 = vadd.s32 %v2271_v25, %v2261_v10  ;;  %v7106_v29 = vshrl.u32 %v2039_v42, 5 }
 0x1da   :  { %v7108_v48 = vsub.s32 32, %v2041_v60  ;;  %v1539_v33 = vmul.f32 %v1537_v4, %v1537_v4  ;;  %v4028_v23 = vadd.s32 3, %v7081_v52  ;;  %v2274_v59 = vmul.u32 %v7017_v2, %v2220_v1 }
 0x1db   :  { %v7111_v20 = vadd.s32 %v2250_v22, %v2241_v27  ;;  %v2273_v28 = vadd.s32 %v2272_v9, %v2263_v55  ;;  %v2044_v15 = vshll.u32 %v7984_v39, %v2041_v60  ;;  %v2047_v56 = vshll.u32 %v7988_v19, %v2041_v60 }
 0x1dc   :  { %v2045_v58 = vshrl.u32 %v7988_v19, %v7108_v48  ;;  %v1540_v61 = vmul.f32 -0.001358992, %v1539_v33  ;;  %v1547_v35 = vmul.f32 -0.00019511016, %v1539_v33  ;;  %v2048_v32 = vshrl.u32 %v7989_v46, %v7108_v48 }
 0x1dd   :  { %vm2276_vm8 = vc.u32 %v7111_v20, %v7100_v0  ;;  %v2277_v42 = vadd.s32 1, %v2273_v28  ;;  %v2050_v41 = vshll.u32 %v7989_v46, %v2041_v60  ;;  %v2051_v2 = vshrl.u32 %v7990_v8, %v7108_v48 }
 0x1de   :  { %vm2059_vm5 = vcmp.lt.s32.totalorder %v7106_v29, 1  ;;  %v1541_v21 = vadd.f32 0.041655596, %v1540_v61  ;;  %v1548_v53 = vadd.f32 0.008332121, %v1547_v35  ;;  %v2053_v57 = vshll.u32 %v7990_v8, %v2041_v60 }
 0x1df   :  { %v2054_v10 = vshrl.u32 %v7977_v47, %v7108_v48  ;;  %v2278_v51 = vsel %vm2276_vm8, %v2277_v42, %v2273_v28  ;;  %v7129_v45 = vor.u32 %v2045_v58, %v2044_v15  ;;  %v2056_v27 = vshll.u32 %v7977_v47, %v2041_v60 }
 0x1e0   :  { %v2057_v43 = vshrl.u32 %v7978_v17, %v7108_v48  ;;  %v1542_v6 = vmul.f32 %v1541_v21, %v1539_v33  ;;  %v1549_v1 = vmul.f32 %v1548_v53, %v1539_v33  ;;  %v2279_v55 = vadd.s32 %v2278_v51, %v2274_v59 }
 0x1e1   :  { %v2049_v25 = vor.u32 %v2048_v32, %v2047_v56  ;;  %v2052_v7 = vor.u32 %v2051_v2, %v2050_v41  ;;  %v2055_v22 = vor.u32 %v2054_v10, %v2053_v57  ;;  %vm2061_vm14 = vcmp.lt.s32.totalorder %v7106_v29, 3 }
 0x1e2   :  { %v2058_v9 = vor.u32 %v2057_v43, %v2056_v27  ;;  %v1543_v61 = vadd.f32 -0.4999988, %v1542_v6  ;;  %v1550_v35 = vadd.f32 -0.16666654, %v1549_v1  ;;  %v2280_v52 = vadd.s32 536870912, %v2279_v55 }
 0x1e3   :  { %vm2062_vm12 = vcmp.lt.s32.totalorder %v7106_v29, 4  ;;  %v4029_v28 = vand.u32 3, %v4028_v23  ;;  %vm2060_vm10 = vcmp.lt.s32.totalorder %v7106_v29, 2  ;;  %v2067_v56 = vsel %vm2059_vm5, %v7129_v45, %v2049_v25 }
 0x1e4   :  { %v2068_v60 = vsel %vm2062_vm12, %v2055_v22, 920167782  ;;  %v1544_v15 = vmul.f32 %v1543_v61, %v1539_v33  ;;  %v1551_v58 = vmul.f32 %v1550_v35, %v1539_v33  ;;  %v7139_v59 = vshrl.u32 %v2280_v52, 30 }
 0x1e5   :  { %v2069_v32 = vsel %vm2061_vm14, %v2052_v7, %v2068_v60  ;;  %v2072_v42 = vsel %vm2062_vm12, %v2058_v9, 1326507024  ;;  %v7148_v23 = vshll.u32 %v2035_v37, 8  ;;  %v2071_v52 = vsel %vm2059_vm5, %v2049_v25, %v2052_v7 }
 0x1e6   :  { %v7150_v41 = vadd.f32 1.0, %v1544_v15  ;;  %v1552_v2 = vadd.f32 1.0, %v1551_v58  ;;  %v2282_v21 = vshll.u32 %v7139_v59, 30  ;;  %vm4030_vm0 = vcmp.lt.s32.totalorder %v4029_v28, 2 }
 0x1e7   :  { %vm4034_vm1 = vcmp.eq.s32.totalorder %v4029_v28, 2  ;;  %v2070_v33 = vsel %vm2060_vm10, %v2067_v56, %v2069_v32  ;;  %v2073_v53 = vsel %vm2061_vm14, %v2055_v22, %v2072_v42  ;;  %vm4031_vm4 = vcmp.eq.s32.totalorder %v4029_v28, 0 }
 0x1e8   :  { %8042 = vst [vmem:[#allocation46_spill] sm:$0xff] %v7150_v41  ;;  %v7159_v57 = vmul.f32 %v1552_v2, %v1537_v4  ;;  %v7937_v37 = vxor.u32 2147483648, %v7150_v41  ;;  %v2283_v10 = vsub.s32 %v2279_v55, %v2282_v21  ;;  %v2074_v51 = vsel %vm2060_vm10, %v2071_v52, %v2073_v53 }
 0x1e9   :  { %v2076_v27 = vand.u32 65535, %v7148_v23  ;;  %v2077_v43 = vshrl.u32 %v7148_v23, 16  ;;  %v2101_v6 = vshrl.u32 %v2070_v33, 16  ;;  %vm7946_vm7 = vweird.f32 %v6736_v31 }
 0x1ea   :  { %8043 = vst [vmem:[#allocation47_spill] sm:$0xff] %v7159_v57  ;;  %v7938_v1 = vxor.u32 2147483648, %v7159_v57  ;;  %v4036_v22 = vsel %vm4034_vm1, %v7937_v37, %v7159_v57  ;;  %vm2284_vm11 = vcmp.lt.s32.totalorder %v2283_v10, 0  ;;  %v2285_v4 = vsub.s32 0, %v2283_v10 }
 0x1eb   :  { %v2043_v55 = vshrl.u32 %v7984_v39, %v7108_v48  ;;  %v2078_v9 = vand.u32 65535, %v2074_v51  ;;  %v2079_v61 = vshrl.u32 %v2074_v51, 16  ;;  %v2064_v15 = vsel %vm2062_vm12, %v2052_v7, 2102212464 }
 0x1ec   :  { %v4033_v35 = vsel %vm4031_vm4, %v7150_v41, %v7938_v1  ;;  %v2286_v60 = vsel %vm2284_vm11, %v2285_v4, %v2283_v10  ;;  %v2100_v58 = vand.u32 65535, %v2070_v33  ;;  %vm2183_vm8 = vcmp.lt.s32.totalorder %v6926_v54, 0  ;;  %v7204_v41 = vld [vmem:[%s7838_s0 + $0x60] sm:$0xff] }
 0x1ed   :  { %v4037_v56 = vsel %vm4030_vm0, %v4033_v35, %v4036_v22  ;;  %v2287_v32 = vclz %v2286_v60  ;;  %v2080_v42 = vmul.u32 %v2078_v9, %v2076_v27  ;;  %v2081_v2 = vmul.u32 %v2079_v61, %v2076_v27 }
 0x1ee   :  { %v7181_v21 = vsel %vm7946_vm7, nan, %v4037_v56  ;;  %v2082_v48 = vmul.u32 %v2078_v9, %v2077_v43  ;;  %v2103_v52 = vmul.u32 %v2101_v6, %v2076_v27  ;;  %v2275_v7 = vadd.s32 %v7100_v0, %v7111_v20 }
 0x1ef   :  { %8044 = vst [vmem:[#allocation48_spill] sm:$0xff] %v7181_v21  ;;  %5019 = vrot.lane.b32.xlu0 %v7181_v21, %s5407_s16  ;;  %v5305_v33 = vadd.s32 4294967294, %v2287_v32  ;;  %v2083_v28 = vmul.u32 %v2079_v61, %v2077_v43  ;;  %v2084_v53 = vshll.u32 %v2081_v2, 16  ;;  %v2063_v51 = vsel %vm2059_vm5, %v2043_v55, %v7129_v45 }
 0x1f0   :  { %v2065_v22 = vsel %vm2061_vm14, %v2049_v25, %v2064_v15  ;;  %v2086_v4 = vshll.u32 %v2082_v48, 16  ;;  %v2104_v35 = vmul.u32 %v2100_v58, %v2077_v43  ;;  %v8045_v9 = vand.u32 2147483647, %v6926_v54 }
 0x1f1   :  { %vm5306_vm0 = vcmp.lt.s32.totalorder %v5305_v33, 0  ;;  %v2305_v0 = vsub.s32 4, %v7139_v59  ;;  %vm2088_vm1 = vc.u32 %v2080_v42, %v2084_v53  ;;  %v2090_v20 = vadd.s32 %v2084_v53, %v2080_v42 }
 0x1f2   :  { %vm7195_vm12 = vcmp.le.f32.partialorder %v8045_v9, 0.7853982  ;;  %v2290_v61 = vsel %vm5306_vm0, 0, %v5305_v33  ;;  %v2089_v56 = vsel %vm2088_vm1, 1, %v7997_v36  ;;  %v2102_v45 = vmul.u32 %v2100_v58, %v2076_v27 }
 0x1f3   :  { %v2106_v55 = vshll.u32 %v2103_v52, 16  ;;  %v2291_v32 = vsub.s32 32, %v2290_v61  ;;  %v2292_v25 = vshll.u32 %v2283_v10, %v2290_v61  ;;  %v2295_v15 = vsub.s32 4294967266, %v2290_v61 }
 0x1f4   :  { %v2091_v37 = vadd.s32 %v2089_v56, %v2083_v28  ;;  %v2085_v1 = vshrl.u32 %v2081_v2, 16  ;;  %vm2092_vm5 = vc.u32 %v2090_v20, %v2086_v4  ;;  %v2105_v9 = vmul.u32 %v2101_v6, %v2077_v43 }
 0x1f5   :  { %v2108_v31 = vshll.u32 %v2104_v35, 16  ;;  %v2293_v57 = vshrl.u32 %v2275_v7, %v2291_v32  ;;  %v2296_v42 = vadd.s32 127, %v2295_v15  ;;  %v2306_v27 = vsel %vm2183_vm8, %v2305_v0, %v7139_v59 }
 0x1f6   :  { %v2093_v58 = vsel %vm2092_vm5, 1, %v7997_v36  ;;  %v2087_v10 = vshrl.u32 %v2082_v48, 16  ;;  %vm2110_vm14 = vc.u32 %v2102_v45, %v2106_v55  ;;  %v2112_v2 = vadd.s32 %v2106_v55, %v2102_v45 }
 0x1f7   :  { %v2095_v33 = vadd.s32 %v2093_v58, %v2091_v37  ;;  %v2294_v28 = vor.u32 %v2293_v57, %v2292_v25  ;;  %v2297_v43 = vshll.u32 %v2296_v42, 23  ;;  %v2111_v6 = vsel %vm2110_vm14, 1, %v7997_v36 }
 0x1f8   :  { %v1876_v53 = vand.u32 2139095040, %v7204_v41  ;;  %v2107_v20 = vshrl.u32 %v2103_v52, 16  ;;  %v2113_v7 = vadd.s32 %v2111_v6, %v2105_v9  ;;  %vm2114_vm4 = vc.u32 %v2112_v2, %v2108_v31 }
 0x1f9   :  { %v2096_v4 = vadd.s32 %v2095_v33, %v2085_v1  ;;  %v2298_v61 = vor.u32 4788187, %v2297_v43  ;;  %v2301_v56 = vcvt.s32.f32 %v2294_v28  ;;  %v2115_v59 = vsel %vm2114_vm4, 1, %v7997_v36 }
 0x1fa   :  { %v1877_v0 = vshrl.u32 %v1876_v53, 23  ;;  %v7215_v37 = vsel %vm7195_vm12, 0, %v2306_v27  ;;  %v2109_v48 = vshrl.u32 %v2104_v35, 16  ;;  %v2117_v57 = vadd.s32 %v2115_v59, %v2113_v7 }
 0x1fb   :  { %8048 = vst [vmem:[#allocation49_spill] sm:$0xff] %v7215_v37  ;;  %v2299_v45 = vand.u32 2147483647, %v2298_v61  ;;  %v2097_v55 = vadd.s32 %v2096_v4, %v2087_v10  ;;  %v2116_v32 = vadd.s32 %v2112_v2, %v2108_v31  ;;  %v2066_v1 = vsel %vm2060_vm10, %v2063_v51, %v2065_v22  ;;  %v7227_v51 = vld [vmem:[%s7838_s0 + $0x78] sm:$0xff] }
 0x1fc   :  { %v5298_v25 = vadd.s32 4294967169, %v1877_v0  ;;  %v2118_v52 = vadd.s32 %v2117_v57, %v2107_v20  ;;  %v4803_v42 = vadd.s32 3, %v7215_v37  ;;  %v7944_v33 = vand.u32 2147483647, %v7204_v41 }
 0x1fd   :  { %v2302_v15 = vmul.f32 %v2301_v56, %v2299_v45  ;;  %v2120_v27 = vmul.u32 %v7148_v23, %v2066_v1  ;;  %vm2122_vm11 = vc.u32 %v2097_v55, %v2116_v32  ;;  %v7242_v20 = vadd.s32 %v2116_v32, %v2097_v55 }
 0x1fe   :  { %v1883_v9 = vadd.s32 1, %v5298_v25  ;;  %v2119_v58 = vadd.s32 %v2118_v52, %v2109_v48  ;;  %v7234_v2 = vand.u32 3, %v4803_v42  ;;  %v1880_v53 = vand.u32 8388607, %v7944_v33 }
 0x1ff   :  { %v2303_v28 = vxor.u32 2147483648, %v2302_v15  ;;  %v2338_v61 = vand.u32 2139095040, %v7227_v51  ;;  %vm2029_vm1 = vcmp.lt.s32.totalorder %v6970_v40, 0  ;;  %vm2324_vm14 = vweird.f32 %v6926_v54 }
 0x200   :  { %vm1884_vm0 = vcmp.gt.s32.totalorder %v1883_v9, 0  ;;  %v2123_v35 = vadd.s32 1, %v2119_v58  ;;  %vm4809_vm10 = vcmp.eq.s32.totalorder %v7234_v2, 2 }
 0x201   :  { %v1885_v10 = vsel %vm1884_vm0, %v1883_v9, 0  ;;  %v2304_v31 = vsel %vm2183_vm8, %v2303_v28, %v2302_v15  ;;  %v1881_v9 = vor.u32 8388608, %v1880_v53  ;;  %vm4806_vm8 = vcmp.eq.s32.totalorder %v7234_v2, 0 }
 0x202   :  { %v1887_v29 = vand.u32 31, %v1885_v10  ;;  %v7232_v22 = vsel %vm7195_vm12, %v6926_v54, %v2304_v31  ;;  %v2124_v23 = vsel %vm2122_vm11, %v2123_v35, %v2119_v58  ;;  %v7244_v7 = vshrl.u32 %v1885_v10, 5 }
 0x203   :  { %v2309_v43 = vmul.f32 %v7232_v22, %v7232_v22  ;;  %v2125_v6 = vadd.s32 %v2124_v23, %v2120_v27  ;;  %v2339_v31 = vshrl.u32 %v2338_v61, 23  ;;  %vm4805_vm12 = vcmp.lt.s32.totalorder %v7234_v2, 2 }
 0x204   :  { %v7240_v4 = vsub.s32 32, %v1887_v29  ;;  %v1890_v48 = vshll.u32 %v7984_v39, %v1887_v29  ;;  %v1893_v45 = vshll.u32 %v7988_v19, %v1887_v29  ;;  %v1899_v32 = vshll.u32 %v7990_v8, %v1887_v29 }
 0x205   :  { %v2310_v56 = vmul.f32 -0.001358992, %v2309_v43  ;;  %v2317_v59 = vmul.f32 -0.00019511016, %v2309_v43  ;;  %v2126_v0 = vadd.s32 536870912, %v2125_v6  ;;  %v1896_v42 = vshll.u32 %v7989_v46, %v1887_v29 }
 0x206   :  { %v1891_v57 = vshrl.u32 %v7988_v19, %v7240_v4  ;;  %v1894_v55 = vshrl.u32 %v7989_v46, %v7240_v4  ;;  %v1900_v15 = vshrl.u32 %v7977_v47, %v7240_v4  ;;  %v1897_v58 = vshrl.u32 %v7990_v8, %v7240_v4 }
 0x207   :  { %v2311_v25 = vadd.f32 0.041655596, %v2310_v56  ;;  %v2318_v1 = vadd.f32 0.008332121, %v2317_v59  ;;  %v2127_v52 = vshrl.u32 %v2126_v0, 30  ;;  %v1902_v28 = vshll.u32 %v7977_v47, %v1887_v29 }
 0x208   :  { %v7263_v23 = vor.u32 %v1891_v57, %v1890_v48  ;;  %v7265_v56 = vor.u32 %v1894_v55, %v1893_v45  ;;  %v1901_v59 = vor.u32 %v1900_v15, %v1899_v32  ;;  %v1903_v53 = vshrl.u32 %v7978_v17, %v7240_v4 }
 0x209   :  { %v2312_v27 = vmul.f32 %v2311_v25, %v2309_v43  ;;  %v2319_v35 = vmul.f32 %v2318_v1, %v2309_v43  ;;  %v2128_v10 = vshll.u32 %v2127_v52, 30  ;;  %vm1905_vm5 = vcmp.lt.s32.totalorder %v7244_v7, 1 }
 0x20a   :  { %v1898_v61 = vor.u32 %v1897_v58, %v1896_v42  ;;  %v1904_v48 = vor.u32 %v1903_v53, %v1902_v28  ;;  %vm1907_vm4 = vcmp.lt.s32.totalorder %v7244_v7, 3  ;;  %vm1908_vm11 = vcmp.lt.s32.totalorder %v7244_v7, 4 }
 0x20b   :  { %v2313_v0 = vadd.f32 -0.4999988, %v2312_v27  ;;  %v2320_v33 = vadd.f32 -0.16666654, %v2319_v35  ;;  %v2129_v29 = vsub.s32 %v2125_v6, %v2128_v10  ;;  %v8049_v32 = vand.u32 2147483647, %v6970_v40 }
 0x20c   :  { %vm1906_vm7 = vcmp.lt.s32.totalorder %v7244_v7, 2  ;;  %v1913_v6 = vsel %vm1905_vm5, %v7263_v23, %v7265_v56  ;;  %v1914_v1 = vsel %vm1908_vm11, %v1901_v59, 920167782  ;;  %v7288_v15 = vshll.u32 %v1881_v9, 8 }
 0x20d   :  { %v2314_v57 = vmul.f32 %v2313_v0, %v2309_v43  ;;  %v2321_v45 = vmul.f32 %v2320_v33, %v2309_v43  ;;  %vm2130_vm0 = vcmp.lt.s32.totalorder %v2129_v29, 0  ;;  %v2131_v55 = vsub.s32 0, %v2129_v29 }
 0x20e   :  { %vm7277_vm9 = vcmp.le.f32.partialorder %v8049_v32, 0.7853982  ;;  %v5307_v58 = vadd.s32 4294967169, %v2339_v31  ;;  %v2151_v27 = vsub.s32 4, %v2127_v52  ;;  %v1915_v35 = vsel %vm1907_vm4, %v1898_v61, %v1914_v1 }
 0x20f   :  { %v7290_v33 = vadd.f32 1.0, %v2314_v57  ;;  %v2322_v43 = vadd.f32 1.0, %v2321_v45  ;;  %v2132_v42 = vsel %vm2130_vm0, %v2131_v55, %v2129_v29  ;;  %v1917_v10 = vsel %vm1905_vm5, %v7265_v56, %v1898_v61 }
 0x210   :  { %v2133_v28 = vclz %v2132_v42  ;;  %v1916_v0 = vsel %vm1906_vm7, %v1913_v6, %v1915_v35  ;;  %v1918_v31 = vsel %vm1908_vm11, %v1904_v48, 1326507024  ;;  %v1922_v55 = vand.u32 65535, %v7288_v15 }
 0x211   :  { %8052 = vst [vmem:[#allocation50_spill] sm:$0xff] %v7290_v33  ;;  %v7298_v53 = vmul.f32 %v2322_v43, %v7232_v22  ;;  %v7947_v9 = vxor.u32 2147483648, %v7290_v33  ;;  %v1919_v45 = vsel %vm1907_vm4, %v1901_v59, %v1918_v31  ;;  %v1923_v32 = vshrl.u32 %v7288_v15, 16 }
 0x212   :  { %v5302_v57 = vadd.s32 4294967294, %v2133_v28  ;;  %v1889_v6 = vshrl.u32 %v7984_v39, %v7240_v4  ;;  %v1920_v48 = vsel %vm1906_vm7, %v1917_v10, %v1919_v45  ;;  %v2152_v59 = vsel %vm2029_vm1, %v2151_v27, %v2127_v52 }
 0x213   :  { %8053 = vst [vmem:[#allocation51_spill] sm:$0xff] %v7298_v53  ;;  %v7948_v1 = vxor.u32 2147483648, %v7298_v53  ;;  %v4811_v22 = vsel %vm4809_vm10, %v7947_v9, %v7298_v53  ;;  %v1946_v43 = vand.u32 65535, %v1916_v0  ;;  %v1947_v42 = vshrl.u32 %v1916_v0, 16 }
 0x214   :  { %vm5303_vm0 = vcmp.lt.s32.totalorder %v5302_v57, 0  ;;  %v1924_v31 = vand.u32 65535, %v1920_v48  ;;  %v1925_v9 = vshrl.u32 %v1920_v48, 16  ;;  %v7334_v27 = vsel %vm7277_vm9, 0, %v2152_v59 }
 0x215   :  { %v4808_v28 = vsel %vm4806_vm8, %v7290_v33, %v7948_v1  ;;  %v2136_v35 = vsel %vm5303_vm0, 0, %v5302_v57  ;;  %v8055_v0 = vand.u32 2147483647, %v7227_v51  ;;  %v2345_v57 = vadd.s32 1, %v5307_v58 }
 0x216   :  { %v4812_v4 = vsel %vm4805_vm12, %v4808_v28, %v4811_v22  ;;  %v2137_v60 = vsub.s32 32, %v2136_v35  ;;  %v2138_v10 = vshll.u32 %v2129_v29, %v2136_v35  ;;  %v2141_v45 = vsub.s32 4294967266, %v2136_v35 }
 0x217   :  { %v7330_v52 = vsel %vm2324_vm14, nan, %v4812_v4  ;;  %v7338_v1 = vand.u32 8388607, %v8055_v0  ;;  %v1909_v22 = vsel %vm1905_vm5, %v1889_v6, %v7263_v23  ;;  %v1910_v48 = vsel %vm1908_vm11, %v1898_v61, 2102212464 }
 0x218   :  { %8054 = vst [vmem:[#allocation52_spill] sm:$0xff] %v7330_v52  ;;  %5029 = vrot.lane.b32.xlu2 %v7330_v52, %s5407_s16  ;;  %v2139_v2 = vshrl.u32 %v7242_v20, %v2137_v60  ;;  %v2142_v29 = vadd.s32 127, %v2141_v45  ;;  %v1926_v59 = vmul.u32 %v1924_v31, %v1922_v55  ;;  %v1927_v28 = vmul.u32 %v1925_v9, %v1922_v55 }
 0x219   :  { %v1928_v35 = vmul.u32 %v1924_v31, %v1923_v32  ;;  %v1949_v4 = vmul.u32 %v1947_v42, %v1922_v55  ;;  %v1948_v58 = vmul.u32 %v1946_v43, %v1922_v55  ;;  %v1950_v33 = vmul.u32 %v1946_v43, %v1923_v32 }
 0x21a   :  { %v2140_v0 = vor.u32 %v2139_v2, %v2138_v10  ;;  %v2143_v54 = vshll.u32 %v2142_v29, 23  ;;  %v1911_v20 = vsel %vm1907_vm4, %v7265_v56, %v1910_v48  ;;  %v1929_v60 = vmul.u32 %v1925_v9, %v1923_v32 }
 0x21b   :  { %v1930_v45 = vshll.u32 %v1927_v28, 16  ;;  %v1932_v52 = vshll.u32 %v1928_v35, 16  ;;  %v1951_v6 = vmul.u32 %v1947_v42, %v1923_v32  ;;  %v1952_v37 = vshll.u32 %v1949_v4, 16 }
 0x21c   :  { %v2144_v53 = vor.u32 4788187, %v2143_v54  ;;  %v2147_v23 = vcvt.s32.f32 %v2140_v0  ;;  %v1931_v61 = vshrl.u32 %v1927_v28, 16  ;;  %v1954_v31 = vshll.u32 %v1950_v33, 16 }
 0x21d   :  { %vm1934_vm10 = vc.u32 %v1926_v59, %v1930_v45  ;;  %v1936_v26 = vadd.s32 %v1930_v45, %v1926_v59  ;;  %vm1956_vm8 = vc.u32 %v1948_v58, %v1952_v37  ;;  %v1958_v55 = vadd.s32 %v1952_v37, %v1948_v58 }
 0x21e   :  { %v2145_v21 = vand.u32 2147483647, %v2144_v53  ;;  %v1935_v10 = vsel %vm1934_vm10, 1, %v7997_v36  ;;  %v1953_v2 = vshrl.u32 %v1949_v4, 16  ;;  %v1957_v56 = vsel %vm1956_vm8, 1, %v7997_v36 }
 0x21f   :  { %v1937_v43 = vadd.s32 %v1935_v10, %v1929_v60  ;;  %vm1938_vm12 = vc.u32 %v1936_v26, %v1932_v52  ;;  %v1959_v29 = vadd.s32 %v1957_v56, %v1951_v6  ;;  %vm1960_vm5 = vc.u32 %v1958_v55, %v1954_v31 }
 0x220   :  { %v2148_v9 = vmul.f32 %v2147_v23, %v2145_v21  ;;  %v1939_v54 = vsel %vm1938_vm12, 1, %v7997_v36  ;;  %v1933_v32 = vshrl.u32 %v1928_v35, 16  ;;  %v1961_v48 = vsel %vm1960_vm5, 1, %v7997_v36 }
 0x221   :  { %v1941_v42 = vadd.s32 %v1939_v54, %v1937_v43  ;;  %vm2346_vm4 = vcmp.gt.s32.totalorder %v2345_v57, 0  ;;  %v1955_v59 = vshrl.u32 %v1950_v33, 16  ;;  %v1963_v28 = vadd.s32 %v1961_v48, %v1959_v29 }
 0x222   :  { %v2149_v53 = vxor.u32 2147483648, %v2148_v9  ;;  %v2347_v0 = vsel %vm2346_vm4, %v2345_v57, 0  ;;  %v1912_v26 = vsel %vm1906_vm7, %v1909_v22, %v1911_v20  ;;  %v7357_v52 = vadd.s32 %v1958_v55, %v1954_v31 }
 0x223   :  { %v1942_v37 = vadd.s32 %v1941_v42, %v1931_v61  ;;  %v2349_v21 = vand.u32 31, %v2347_v0  ;;  %v1964_v58 = vadd.s32 %v1963_v28, %v1953_v2  ;;  %v2343_v35 = vor.u32 8388608, %v7338_v1 }
 0x224   :  { %v2150_v4 = vsel %vm2029_vm1, %v2149_v53, %v2148_v9  ;;  %v4648_v33 = vadd.s32 3, %v7334_v27  ;;  %v1966_v45 = vmul.u32 %v7288_v15, %v1912_v26  ;;  %v7371_v23 = vshrl.u32 %v2347_v0, 5 }
 0x225   :  { %v2153_v60 = vsel %vm7277_vm9, %v6970_v40, %v2150_v4  ;;  %v7366_v57 = vadd.s32 %v1942_v37, %v1933_v32  ;;  %v7368_v7 = vsub.s32 32, %v2349_v21  ;;  %v1965_v20 = vadd.s32 %v1964_v58, %v1955_v59 }
 0x226   :  { %v2155_v22 = vmul.f32 %v2153_v60, %v2153_v60  ;;  %v2352_v1 = vshll.u32 %v7984_v39, %v2349_v21  ;;  %v2355_v25 = vshll.u32 %v7988_v19, %v2349_v21  ;;  %v2358_v15 = vshll.u32 %v7989_v46, %v2349_v21 }
 0x227   :  { %vm1968_vm7 = vc.u32 %v7366_v57, %v7357_v52  ;;  %v2353_v40 = vshrl.u32 %v7988_v19, %v7368_v7  ;;  %v1969_v31 = vadd.s32 1, %v1965_v20  ;;  %v2356_v10 = vshrl.u32 %v7989_v46, %v7368_v7 }
 0x228   :  { %v2156_v6 = vmul.f32 -0.001358992, %v2155_v22  ;;  %v2163_v61 = vmul.f32 -0.00019511016, %v2155_v22  ;;  %v2359_v55 = vshrl.u32 %v7990_v8, %v7368_v7  ;;  %v2361_v43 = vshll.u32 %v7990_v8, %v2349_v21 }
 0x229   :  { %v2362_v2 = vshrl.u32 %v7977_v47, %v7368_v7  ;;  %v4649_v54 = vand.u32 3, %v4648_v33  ;;  %v1970_v19 = vsel %vm1968_vm7, %v1969_v31, %v1965_v20  ;;  %v7387_v32 = vor.u32 %v2353_v40, %v2352_v1 }
 0x22a   :  { %v2157_v56 = vadd.f32 0.041655596, %v2156_v6  ;;  %v2164_v9 = vadd.f32 0.008332121, %v2163_v61  ;;  %v1971_v29 = vadd.s32 %v1970_v19, %v1966_v45  ;;  %v2364_v48 = vshll.u32 %v7977_v47, %v2349_v21 }
 0x22b   :  { %v2363_v42 = vor.u32 %v2362_v2, %v2361_v43  ;;  %v7390_v59 = vor.u32 %v2356_v10, %v2355_v25  ;;  %v2365_v8 = vshrl.u32 %v7978_v17, %v7368_v7  ;;  %v2360_v0 = vor.u32 %v2359_v55, %v2358_v15 }
 0x22c   :  { %v2158_v53 = vmul.f32 %v2157_v56, %v2155_v22  ;;  %v2165_v46 = vmul.f32 %v2164_v9, %v2155_v22  ;;  %v1972_v28 = vadd.s32 536870912, %v1971_v29  ;;  %vm2367_vm9 = vcmp.lt.s32.totalorder %v7371_v23, 1 }
 0x22d   :  { %vm2370_vm1 = vcmp.lt.s32.totalorder %v7371_v23, 4  ;;  %v2366_v4 = vor.u32 %v2365_v8, %v2364_v48  ;;  %vm2369_vm11 = vcmp.lt.s32.totalorder %v7371_v23, 3  ;;  %vm4650_vm0 = vcmp.lt.s32.totalorder %v4649_v54, 2 }
 0x22e   :  { %v2159_v26 = vadd.f32 -0.4999988, %v2158_v53  ;;  %v2166_v37 = vadd.f32 -0.16666654, %v2165_v46  ;;  %v7397_v58 = vshrl.u32 %v1972_v28, 30  ;;  %v7401_v17 = vshll.u32 %v2343_v35, 8 }
 0x22f   :  { %v2376_v47 = vsel %vm2370_vm1, %v2363_v42, 920167782  ;;  %vm2368_vm10 = vcmp.lt.s32.totalorder %v7371_v23, 2  ;;  %v2375_v45 = vsel %vm2367_vm9, %v7387_v32, %v7390_v59  ;;  %v2379_v35 = vsel %vm2367_vm9, %v7390_v59, %v2360_v0 }
 0x230   :  { %v2160_v21 = vmul.f32 %v2159_v26, %v2155_v22  ;;  %v2167_v33 = vmul.f32 %v2166_v37, %v2155_v22  ;;  %v1974_v20 = vshll.u32 %v7397_v58, 30  ;;  %v2377_v1 = vsel %vm2369_vm11, %v2360_v0, %v2376_v47 }
 0x231   :  { %v2380_v22 = vsel %vm2370_vm1, %v2366_v4, 1326507024  ;;  %vm4651_vm8 = vcmp.eq.s32.totalorder %v4649_v54, 0  ;;  %vm4654_vm12 = vcmp.eq.s32.totalorder %v4649_v54, 2  ;;  %v2378_v15 = vsel %vm2368_vm10, %v2375_v45, %v2377_v1 }
 0x232   :  { %v7411_v40 = vadd.f32 1.0, %v2160_v21  ;;  %v2168_v25 = vadd.f32 1.0, %v2167_v33  ;;  %v1975_v6 = vsub.s32 %v1971_v29, %v1974_v20  ;;  %v2381_v61 = vsel %vm2369_vm11, %v2363_v42, %v2380_v22  ;;  %v7436_v42 = vld [vmem:[%s7838_s0 + $0x68] sm:$0xff]  ;;  %s5408_s0 = smov 96  }
 0x233   :  { %v2384_v55 = vand.u32 65535, %v7401_v17  ;;  %v2382_v2 = vsel %vm2368_vm10, %v2379_v35, %v2381_v61  ;;  %v2385_v56 = vshrl.u32 %v7401_v17, 16  ;;  %vm2170_vm4 = vweird.f32 %v7436_v42 }
 0x234   :  { %v7420_v31 = vmul.f32 %v2168_v25, %v2153_v60  ;;  %v2177_v10 = vxor.u32 2147483648, %v7411_v40  ;;  %vm1976_vm5 = vcmp.lt.s32.totalorder %v1975_v6, 0  ;;  %v1977_v43 = vsub.s32 0, %v1975_v6 }
 0x235   :  { %v2386_v19 = vand.u32 65535, %v2382_v2  ;;  %v2387_v29 = vshrl.u32 %v2382_v2, 16  ;;  %v2409_v53 = vshrl.u32 %v2378_v15, 16  ;;  %v2408_v47 = vand.u32 65535, %v2378_v15 }
 0x236   :  { %v2174_v9 = vxor.u32 2147483648, %v7420_v31  ;;  %v4656_v60 = vsel %vm4654_vm12, %v2177_v10, %v7420_v31  ;;  %v1978_v48 = vsel %vm1976_vm5, %v1977_v43, %v1975_v6  ;;  %v1967_v1 = vadd.s32 %v7357_v52, %v7366_v57 }
 0x237   :  { %v1979_v8 = vclz %v1978_v48  ;;  %v2388_v28 = vmul.u32 %v2386_v19, %v2384_v55  ;;  %v2389_v26 = vmul.u32 %v2387_v29, %v2384_v55  ;;  %v2390_v4 = vmul.u32 %v2386_v19, %v2385_v56 }
 0x238   :  { %v4653_v46 = vsel %vm4651_vm8, %v7411_v40, %v2174_v9  ;;  %v2391_v20 = vmul.u32 %v2387_v29, %v2385_v56  ;;  %v2351_v25 = vshrl.u32 %v7984_v39, %v7368_v7  ;;  %v2372_v54 = vsel %vm2370_vm1, %v2360_v0, 2102212464 }
 0x239   :  { %v4657_v37 = vsel %vm4650_vm0, %v4653_v46, %v4656_v60  ;;  %v5299_v33 = vadd.s32 4294967294, %v1979_v8  ;;  %v2392_v45 = vshll.u32 %v2389_v26, 16  ;;  %v2394_v35 = vshll.u32 %v2390_v4, 16 }
 0x23a   :  { %v7446_v21 = vsel %vm2170_vm4, nan, %v4657_v37  ;;  %v2411_v61 = vmul.u32 %v2409_v53, %v2384_v55  ;;  %v2410_v2 = vmul.u32 %v2408_v47, %v2384_v55  ;;  %v2412_v60 = vmul.u32 %v2408_v47, %v2385_v56 }
 0x23b   :  { %5027 = vrot.lane.b32.xlu1 %v7446_v21, %s5407_s16  ;;  %vm5300_vm7 = vcmp.lt.s32.totalorder %v5299_v33, 0  ;;  %vm2396_vm0 = vc.u32 %v2388_v28, %v2392_v45  ;;  %v2398_v22 = vadd.s32 %v2392_v45, %v2388_v28  ;;  %v2393_v57 = vshrl.u32 %v2389_v26, 16 }
 0x23c   :  { %v1982_v15 = vsel %vm5300_vm7, 0, %v5299_v33  ;;  %v2397_v43 = vsel %vm2396_vm0, 1, %v7997_v36  ;;  %v2413_v39 = vmul.u32 %v2409_v53, %v2385_v56  ;;  %v2414_v8 = vshll.u32 %v2411_v61, 16 }
 0x23d   :  { %v1983_v19 = vsub.s32 32, %v1982_v15  ;;  %v1984_v29 = vshll.u32 %v1975_v6, %v1982_v15  ;;  %v1987_v48 = vsub.s32 4294967266, %v1982_v15  ;;  %v2399_v52 = vadd.s32 %v2397_v43, %v2391_v20 }
 0x23e   :  { %vm2400_vm8 = vc.u32 %v2398_v22, %v2394_v35  ;;  %v2371_v28 = vsel %vm2367_vm9, %v2351_v25, %v7387_v32  ;;  %v2373_v55 = vsel %vm2369_vm11, %v7390_v59, %v2372_v54  ;;  %v2416_v6 = vshll.u32 %v2412_v60, 16 }
 0x23f   :  { %v1985_v7 = vshrl.u32 %v1967_v1, %v1983_v19  ;;  %v1988_v46 = vadd.s32 127, %v1987_v48  ;;  %v2401_v0 = vsel %vm2400_vm8, 1, %v7997_v36  ;;  %vm2418_vm1 = vc.u32 %v2410_v2, %v2414_v8 }
 0x240   :  { %v2403_v37 = vadd.s32 %v2401_v0, %v2399_v52  ;;  %v2420_v26 = vadd.s32 %v2414_v8, %v2410_v2  ;;  %v477_v56 = vand.u32 3, %v5676_v12  ;;  %v2395_v53 = vshrl.u32 %v2390_v4, 16 }
 0x241   :  { %v1986_v47 = vor.u32 %v1985_v7, %v1984_v29  ;;  %v1989_v33 = vshll.u32 %v1988_v46, 23  ;;  %v2419_v45 = vsel %vm2418_vm1, 1, %v7997_v36  ;;  %v2415_v32 = vshrl.u32 %v2411_v61, 16 }
 0x242   :  { %v2404_v20 = vadd.s32 %v2403_v37, %v2393_v57  ;;  %v2421_v22 = vadd.s32 %v2419_v45, %v2413_v39  ;;  %vm2422_vm9 = vc.u32 %v2420_v26, %v2416_v6  ;;  %vm478_vm12 = vcmp.lt.s32.totalorder %v477_v56, 2 }
 0x243   :  { %v1990_v1 = vor.u32 4788187, %v1989_v33  ;;  %v1993_v35 = vcvt.s32.f32 %v1986_v47  ;;  %vm479_vm5 = vcmp.eq.s32.totalorder %v477_v56, 0  ;;  %vm482_vm7 = vcmp.eq.s32.totalorder %v477_v56, 2 }
 0x244   :  { %v8056_v25 = vxor.u32 2147483648, %v5761_v5  ;;  %v8057_v12 = vxor.u32 2147483648, %v5750_v34  ;;  %v2423_v15 = vsel %vm2422_vm9, 1, %v7997_v36  ;;  %v2417_v2 = vshrl.u32 %v2412_v60, 16 }
 0x245   :  { %v1991_v59 = vand.u32 2147483647, %v1990_v1  ;;  %v2425_v19 = vadd.s32 %v2423_v15, %v2421_v22  ;;  %v2405_v61 = vadd.s32 %v2404_v20, %v2395_v53  ;;  %v2424_v52 = vadd.s32 %v2420_v26, %v2416_v6 }
 0x246   :  { %v481_v54 = vsel %vm479_vm5, %v5750_v34, %v8056_v25  ;;  %v484_v4 = vsel %vm482_vm7, %v8057_v12, %v5761_v5  ;;  %vm1875_vm11 = vcmp.lt.s32.totalorder %v7204_v41, 0  ;;  %v1997_v57 = vsub.s32 4, %v7397_v58 }
 0x247   :  { %v485_v43 = vsel %vm478_vm12, %v481_v54, %v484_v4  ;;  %v1994_v29 = vmul.f32 %v1993_v35, %v1991_v59  ;;  %v2374_v34 = vsel %vm2368_vm10, %v2371_v28, %v2373_v55  ;;  %v2426_v5 = vadd.s32 %v2425_v19, %v2415_v32 }
 0x248   :  { %v7475_v48 = vsel %vm476_vm15, nan, %v485_v43  ;;  %v8058_v36 = vand.u32 2147483647, %v7204_v41  ;;  %v2428_v7 = vmul.u32 %v7401_v17, %v2374_v34  ;;  %vm2430_vm15 = vc.u32 %v2405_v61, %v2424_v52 }
 0x249   :  { %5133 = vrot.lane.b32.xlu1 %v7475_v48, %s5408_s0  ;;  %v1995_v3 = vxor.u32 2147483648, %v1994_v29  ;;  %v2427_v60 = vadd.s32 %v2426_v5, %v2417_v2  ;;  %v1998_v46 = vsel %vm1875_vm11, %v1997_v57, %v7397_v58  ;;  %vm2016_vm12 = vweird.f32 %v7204_v41 }
 0x24a   :  { %vm1874_vm0 = vcmp.le.f32.partialorder %v8058_v36, 0.7853982 }
 0x24b   :  { %v1996_v39 = vsel %vm1875_vm11, %v1995_v3, %v1994_v29  ;;  %v2431_v8 = vadd.s32 1, %v2427_v60  ;;  %v7488_v47 = vsel %vm1874_vm0, 0, %v1998_v46  ;;  %v2429_v3 = vadd.s32 %v2424_v52, %v2405_v61 }
 0x24c   :  { %v1999_v0 = vsel %vm1874_vm0, %v7204_v41, %v1996_v39  ;;  %v4493_v53 = vadd.s32 3, %v7488_v47  ;;  %v8059_v61 = vxor.u32 2147483648, %v5902_v14 }
 0x24d   :  { %v2001_v37 = vmul.f32 %v1999_v0, %v1999_v0  ;;  %v2432_v6 = vsel %vm2430_vm15, %v2431_v8, %v2427_v60 }
 0x24e   :  { %v2433_v55 = vadd.s32 %v2432_v6, %v2428_v7  ;;  %v4494_v22 = vand.u32 3, %v4493_v53  ;;  %v169_v7 = vand.u32 3, %v5808_v38  ;;  %v8060_v38 = vxor.u32 2147483648, %v5885_v18 }
 0x24f   :  { %v2002_v23 = vmul.f32 -0.001358992, %v2001_v37  ;;  %v2009_v28 = vmul.f32 -0.00019511016, %v2001_v37 }
 0x250   :  { %v2434_v56 = vadd.s32 536870912, %v2433_v55  ;;  %vm4499_vm8 = vcmp.eq.s32.totalorder %v4494_v22, 2  ;;  %vm4496_vm1 = vcmp.eq.s32.totalorder %v4494_v22, 0  ;;  %vm4495_vm9 = vcmp.lt.s32.totalorder %v4494_v22, 2 }
 0x251   :  { %v2003_v33 = vadd.f32 0.041655596, %v2002_v23  ;;  %v2010_v26 = vadd.f32 0.008332121, %v2009_v28  ;;  %vm171_vm7 = vcmp.eq.s32.totalorder %v169_v7, 0  ;;  %vm170_vm11 = vcmp.lt.s32.totalorder %v169_v7, 2 }
 0x252   :  { %v7491_v45 = vshrl.u32 %v2434_v56, 30  ;;  %v173_v52 = vsel %vm171_vm7, %v5885_v18, %v8059_v61  ;;  %vm174_vm0 = vcmp.eq.s32.totalorder %v169_v7, 2 }
 0x253   :  { %v2004_v20 = vmul.f32 %v2003_v33, %v2001_v37  ;;  %v2011_v17 = vmul.f32 %v2010_v26, %v2001_v37  ;;  %v939_v26 = vand.u32 3, %v5971_v24 }
 0x254   :  { %v2436_v35 = vshll.u32 %v7491_v45, 30 }
 0x255   :  { %v2005_v58 = vadd.f32 -0.4999988, %v2004_v20  ;;  %v2012_v1 = vadd.f32 -0.16666654, %v2011_v17  ;;  %vm940_vm15 = vcmp.lt.s32.totalorder %v939_v26, 2 }
 0x256   :  { %v2437_v25 = vsub.s32 %v2433_v55, %v2436_v35  ;;  %v176_v55 = vsel %vm174_vm0, %v8060_v38, %v5902_v14  ;;  %v8062_v14 = vxor.u32 2147483648, %v6060_v44 }
 0x257   :  { %v2006_v32 = vmul.f32 %v2005_v58, %v2001_v37  ;;  %v2013_v59 = vmul.f32 %v2012_v1, %v2001_v37  ;;  %v177_v33 = vsel %vm170_vm11, %v173_v52, %v176_v55  ;;  %v8061_v58 = vxor.u32 2147483648, %v6076_v16  ;;  %v8072_v55 = vld [vmem:[#allocation14_spill] sm:$0xff] }
 0x258   :  { %vm2438_vm10 = vcmp.lt.s32.totalorder %v2437_v25, 0  ;;  %v2439_v4 = vsub.s32 0, %v2437_v25  ;;  %v7523_v20 = vsel %vm168_vm6, nan, %v177_v33  ;;  %vm2337_vm6 = vcmp.lt.s32.totalorder %v7227_v51, 0 }
 0x259   :  { %v7494_v54 = vadd.f32 1.0, %v2006_v32  ;;  %v2014_v12 = vadd.f32 1.0, %v2013_v59  ;;  %5129 = vrot.lane.b32.xlu2 %v7523_v20, %s5408_s0  ;;  %v2459_v32 = vsub.s32 4, %v7491_v45  ;;  %v4972_v33 = vsub.f32 0.0, %v8072_v55 }
 0x25a   :  { %v2440_v2 = vsel %vm2438_vm10, %v2439_v4, %v2437_v25  ;;  %vm941_vm10 = vcmp.eq.s32.totalorder %v939_v26, 0 }
 0x25b   :  { %v7496_v15 = vmul.f32 %v2014_v12, %v1999_v0  ;;  %v2023_v43 = vxor.u32 2147483648, %v7494_v54  ;;  %v2441_v19 = vclz %v2440_v2  ;;  %v943_v18 = vsel %vm941_vm10, %v6060_v44, %v8061_v58 }
 0x25c   :  { %v8063_v44 = vand.u32 2147483647, %v7227_v51  ;;  %vm2478_vm10 = vweird.f32 %v7227_v51 }
 0x25d   :  { %v2020_v29 = vxor.u32 2147483648, %v7496_v15  ;;  %v4501_v57 = vsel %vm4499_vm8, %v2023_v43, %v7496_v15  ;;  %v5308_v34 = vadd.s32 4294967294, %v2441_v19  ;;  %vm944_vm8 = vcmp.eq.s32.totalorder %v939_v26, 2 }
 0x25e   :  { %v946_v24 = vsel %vm944_vm8, %v8062_v14, %v6076_v16  ;;  %vm2336_vm7 = vcmp.le.f32.partialorder %v8063_v44, 0.7853982  ;;  %v4969_v19 = vsub.f32 0.0, %v5931_v30 }
 0x25f   :  { %v4498_v5 = vsel %vm4496_vm1, %v7494_v54, %v2020_v29  ;;  %vm5309_vm5 = vcmp.lt.s32.totalorder %v5308_v34, 0  ;;  %v947_v1 = vsel %vm940_vm15, %v943_v18, %v946_v24  ;;  %vm632_vm1 = vcmp.lt.s32.totalorder %v631_v50, 2  ;;  %v8073_v18 = vld [vmem:[#allocation20_spill] sm:$0xff] }
 0x260   :  { %v4502_v36 = vsel %vm4495_vm9, %v4498_v5, %v4501_v57  ;;  %v2444_v39 = vsel %vm5309_vm5, 0, %v5308_v34  ;;  %v7537_v22 = vsel %vm938_vm13, nan, %v947_v1  ;;  %vm633_vm9 = vcmp.eq.s32.totalorder %v631_v50, 0 }
 0x261   :  { %v7509_v60 = vsel %vm2016_vm12, nan, %v4502_v36  ;;  %v2445_v46 = vsub.s32 32, %v2444_v39  ;;  %v2446_v0 = vshll.u32 %v2437_v25, %v2444_v39  ;;  %v2449_v8 = vsub.s32 4294967266, %v2444_v39  ;;  %5139 = vrot.lane.b32.xlu1 %v7537_v22, %s5408_s0  ;;  %v8067_v39 = vld [vmem:[#allocation34_spill] sm:$0xff] }
 0x262   :  { %5025 = vrot.lane.b32.xlu0 %v7509_v60, %s5407_s16  ;;  %vm636_vm5 = vcmp.eq.s32.totalorder %v631_v50, 2  ;;  %v635_v59 = vsel %vm633_vm9, %v6192_v62, %v8064_v11  ;;  %v2460_v57 = vsel %vm2337_vm6, %v2459_v32, %v7491_v45  ;;  %v8068_v7 = vxor.u32 2147483648, %v8067_v39  ;;  %v8074_v50 = vld [vmem:[#allocation16_spill] sm:$0xff] }
 0x263   :  { %v2447_v37 = vshrl.u32 %v2429_v3, %v2445_v46  ;;  %v2450_v6 = vadd.s32 127, %v2449_v8  ;;  %v638_v25 = vsel %vm636_vm5, %v8065_v63, %v6204_v49  ;;  %v8066_v49 = vld [vmem:[#allocation31_spill] sm:$0xff]  ;;  %v7564_v36 = vsel %vm2336_vm7, 0, %v2460_v57  ;;  %v8069_v46 = vld [vmem:[#allocation33_spill] sm:$0xff] }
 0x264   :  { %v639_v12 = vsel %vm632_vm1, %v635_v59, %v638_v25  ;;  %v1093_v5 = vand.u32 3, %v8066_v49  ;;  %v8070_v8 = vxor.u32 2147483648, %v8069_v46  ;;  %v4970_v14 = vsub.f32 0.0, %v8073_v18  ;;  %v8079_v49 = vld [vmem:[#allocation18_spill] sm:$0xff] }
 0x265   :  { %v2448_v23 = vor.u32 %v2447_v37, %v2446_v0  ;;  %v2451_v28 = vshll.u32 %v2450_v6, 23  ;;  %v7554_v2 = vsel %vm630_vm2, nan, %v639_v12  ;;  %v4958_v6 = vadd.s32 3, %v7564_v36  ;;  %v8076_v12 = vld [vmem:[#allocation9_spill] sm:$0xff] }
 0x266   :  { %5135 = vrot.lane.b32.xlu2 %v7554_v2, %s5408_s0  ;;  %vm1094_vm13 = vcmp.lt.s32.totalorder %v1093_v5, 2  ;;  %vm1095_vm2 = vcmp.eq.s32.totalorder %v1093_v5, 0  ;;  %vm1098_vm11 = vcmp.eq.s32.totalorder %v1093_v5, 2 }
 0x267   :  { %v2452_v56 = vor.u32 4788187, %v2451_v28  ;;  %v2455_v53 = vcvt.s32.f32 %v2448_v23  ;;  %v1097_v0 = vsel %vm1095_vm2, %v8069_v46, %v8068_v7  ;;  %v1100_v37 = vsel %vm1098_vm11, %v8070_v8, %v8067_v39  ;;  %v8082_v39 = vld [vmem:[#allocation48_spill] sm:$0xff] }
 0x268   :  { %v1101_v61 = vsel %vm1094_vm13, %v1097_v0, %v1100_v37  ;;  %v4978_v7 = vsub.f32 0.0, %v8082_v39  ;;  %v8083_v0 = vld [vmem:[#allocation11_spill] sm:$0xff]  ;;  %v8085_v37 = vld [vmem:[#allocation30_spill] sm:$0xff]  ;;  %vm5177_vm11 = vcmask 261120  }
 0x269   :  { %v2453_v17 = vand.u32 2147483647, %v2452_v56  ;;  %5065 = vrot.lane.b32.xlu1 %v4969_v19, %s5409_s17  ;;  %v7576_v38 = vsel %vm1092_vm3, nan, %v1101_v61  ;;  %v8086_v61 = vld [vmem:[#allocation8_spill] sm:$0xff]  ;;  %v8103_v39 = vld [vmem:[#allocation47_spill] sm:$0xff] }
 0x26b   :  { %v2456_v35 = vmul.f32 %v2455_v53, %v2453_v17  ;;  %v4959_v53 = vand.u32 3, %v4958_v6  ;;  %v4976_v6 = vsub.f32 0.0, %v8085_v37 }
 0x26d   :  { %v2457_v16 = vxor.u32 2147483648, %v2456_v35  ;;  %vm4964_vm0 = vcmp.eq.s32.totalorder %v4959_v53, 2  ;;  %vm4961_vm3 = vcmp.eq.s32.totalorder %v4959_v53, 0  ;;  %vm4960_vm15 = vcmp.lt.s32.totalorder %v4959_v53, 2  ;;  %v8090_v53 = vld [vmem:[#allocation5_spill] sm:$0xff] }
 0x26e   :  { %5141 = vrot.lane.b32.xlu2 %v7576_v38, %s5408_s0  ;;  %vm8091_vm2 = vweird.f32 %v8090_v53  ;;  %v8110_v53 = vld [vmem:[#allocation24_spill] sm:$0xff] }
 0x26f   :  { %v2458_v4 = vsel %vm2337_vm6, %v2457_v16, %v2456_v35  ;;  %v323_v35 = vand.u32 3, %v8074_v50  ;;  %v8075_v16 = vld [vmem:[#allocation35_spill] sm:$0xff] }
 0x270   :  { %v2461_v34 = vsel %vm2336_vm7, %v7227_v51, %v2458_v4  ;;  %v4975_v11 = vsub.f32 0.0, %v8075_v16  ;;  %v4973_v4 = vsub.f32 0.0, %v8076_v12  ;;  %vm8084_vm7 = vweird.f32 %v8083_v0 }
 0x271   :  { %v2463_v62 = vmul.f32 %v2461_v34, %v2461_v34  ;;  %5071 = vrot.lane.b32.xlu1 %v4972_v33, %s5409_s17  ;;  %vm325_vm8 = vcmp.eq.s32.totalorder %v323_v35, 0  ;;  %vm328_vm6 = vcmp.eq.s32.totalorder %v323_v35, 2  ;;  %vm324_vm1 = vcmp.lt.s32.totalorder %v323_v35, 2 }
 0x272   :  { %v4982_v16 = vsub.f32 0.0, %v7446_v21  ;;  %v8097_v21 = vld [vmem:[#allocation23_spill] sm:$0xff] }
 0x273   :  { %v2464_v3 = vmul.f32 -0.001358992, %v2463_v62  ;;  %v2471_v13 = vmul.f32 -0.00019511016, %v2463_v62 }
 0x275   :  { %v2465_v30 = vadd.f32 0.041655596, %v2464_v3  ;;  %v2472_v45 = vadd.f32 0.008332121, %v2471_v13  ;;  %v8080_v3 = vxor.u32 2147483648, %v8079_v49 }
 0x276   :  { %5067 = vrot.lane.b32.xlu2 %v4970_v14, %s5409_s17  ;;  %v5010_v14 = vpop.permute.xlu2 %5009 }
 0x277   :  { %v2466_v52 = vmul.f32 %v2465_v30, %v2463_v62  ;;  %v2473_v23 = vmul.f32 %v2472_v45, %v2463_v62  ;;  %v8081_v30 = vld [vmem:[#allocation6_spill] sm:$0xff] }
 0x278   :  { %v785_v45 = vand.u32 3, %v8081_v30  ;;  %v8101_v30 = vld [vmem:[#allocation12_spill] sm:$0xff] }
 0x279   :  { %v2467_v26 = vadd.f32 -0.4999988, %v2466_v52  ;;  %v2474_v56 = vadd.f32 -0.16666654, %v2473_v23  ;;  %5077 = vrot.lane.b32.xlu1 %v4975_v11, %s5409_s17  ;;  %v8087_v52 = vxor.u32 2147483648, %v8086_v61  ;;  %v8088_v23 = vld [vmem:[#allocation7_spill] sm:$0xff] }
 0x27a   :  { %vm787_vm9 = vcmp.eq.s32.totalorder %v785_v45, 0  ;;  %vm790_vm5 = vcmp.eq.s32.totalorder %v785_v45, 2  ;;  %vm786_vm13 = vcmp.lt.s32.totalorder %v785_v45, 2  ;;  %v8089_v55 = vxor.u32 2147483648, %v8088_v23 }
 0x27b   :  { %v2468_v17 = vmul.f32 %v2467_v26, %v2463_v62  ;;  %v2475_v58 = vmul.f32 %v2474_v56, %v2463_v62  ;;  %v789_v28 = vsel %vm787_vm9, %v8088_v23, %v8087_v52  ;;  %v4981_v26 = vsub.f32 0.0, %v7509_v60  ;;  %v8093_v60 = vld [vmem:[#allocation10_spill] sm:$0xff]  ;;  %v8107_v23 = vld [vmem:[#allocation32_spill] sm:$0xff] }
 0x27c   :  { %v792_v33 = vsel %vm790_vm5, %v8089_v55, %v8086_v61  ;;  %v4971_v35 = vsub.f32 0.0, %v8093_v60  ;;  %vm8102_vm9 = vweird.f32 %v8101_v30  ;;  %vm8108_vm5 = vweird.f32 %v8107_v23 }
 0x27d   :  { %v7583_v24 = vadd.f32 1.0, %v2468_v17  ;;  %v2476_v1 = vadd.f32 1.0, %v2475_v58  ;;  %v793_v56 = vsel %vm786_vm13, %v789_v28, %v792_v33  ;;  %v8092_v58 = vld [vmem:[#allocation44_spill] sm:$0xff] }
 0x27e   :  { %5073 = vrot.lane.b32.xlu2 %v4973_v4, %s5409_s17  ;;  %v794_v17 = vsel %vm8091_vm2, nan, %v793_v56  ;;  %v4979_v18 = vsub.f32 0.0, %v8092_v58  ;;  %v5012_v11 = vpop.permute.xlu2 %5011  ;;  %v8095_v4 = vld [vmem:[#allocation45_spill] sm:$0xff]  ;;  %v8109_v33 = vld [vmem:[#allocation36_spill] sm:$0xff]  ;;  %v2017_v56 = vand.u32 3, %v7488_v47  ;;  %v8111_v58 = vld [vmem:[#allocation38_spill] sm:$0xff] }
 0x27f   :  { %v7586_v32 = vmul.f32 %v2476_v1, %v2461_v34  ;;  %v2485_v44 = vxor.u32 2147483648, %v7583_v24  ;;  %v8077_v34 = vld [vmem:[#allocation19_spill] sm:$0xff]  ;;  %v7635_v1 = vsel %vm5177_vm11, %v794_v17, %v5010_v14  ;;  %v8113_v14 = vld [vmem:[#allocation37_spill] sm:$0xff] }
 0x280   :  { %v8078_v62 = vxor.u32 2147483648, %v8077_v34  ;;  %v330_v13 = vsel %vm328_vm6, %v8080_v3, %v8077_v34  ;;  %v8114_v60 = vxor.u32 2147483648, %v8113_v14 }
 0x281   :  { %v2482_v59 = vxor.u32 2147483648, %v7586_v32  ;;  %v4966_v63 = vsel %vm4964_vm0, %v2485_v44, %v7586_v32  ;;  %5083 = vrot.lane.b32.xlu1 %v4978_v7, %s5409_s17  ;;  %v8104_v7 = vxor.u32 2147483648, %v8103_v39 }
 0x282   :  { %v327_v5 = vsel %vm325_vm8, %v8079_v49, %v8078_v62  ;;  %v8098_v62 = vxor.u32 2147483648, %v8097_v21  ;;  %v8099_v49 = vld [vmem:[#allocation22_spill] sm:$0xff] }
 0x283   :  { %v4963_v25 = vsel %vm4961_vm3, %v7583_v24, %v2482_v59  ;;  %v331_v46 = vsel %vm324_vm1, %v327_v5, %v330_v13  ;;  %v8100_v3 = vxor.u32 2147483648, %v8099_v49 }
 0x284   :  { %v4967_v19 = vsel %vm4960_vm15, %v4963_v25, %v4966_v63  ;;  %v7615_v8 = vsel %vm8084_vm7, nan, %v331_v46  ;;  %v7644_v63 = vsel %vm5177_vm11, %v7537_v22, %v5012_v11  ;;  %v8094_v25 = vld [vmem:[#allocation21_spill] sm:$0xff]  ;;  %v8105_v46 = vld [vmem:[#allocation46_spill] sm:$0xff] }
 0x285   :  { %v4968_v57 = vsel %vm2478_vm10, nan, %v4967_v19  ;;  %v1401_v12 = vand.u32 3, %v8094_v25  ;;  %v1555_v19 = vand.u32 3, %v8095_v4  ;;  %v8106_v37 = vxor.u32 2147483648, %v8105_v46  ;;  %v8115_v11 = vld [vmem:[#allocation25_spill] sm:$0xff] }
 0x286   :  { %5031 = vrot.lane.b32.xlu0 %v4968_v57, %s5407_s16  ;;  %5079 = vrot.lane.b32.xlu2 %v4976_v6, %s5409_s17  ;;  %v4984_v50 = vsub.f32 0.0, %v4968_v57  ;;  %v8096_v57 = vld [vmem:[#allocation13_spill] sm:$0xff]  ;;  %v5018_v52 = vpop.permute.xlu2 %5017  ;;  %s5410_s16 = smov [#allocation2]  }
 0x287   :  { %v4974_v34 = vsub.f32 0.0, %v8096_v57  ;;  %vm1403_vm0 = vcmp.eq.s32.totalorder %v1401_v12, 0  ;;  %vm1406_vm3 = vcmp.eq.s32.totalorder %v1401_v12, 2  ;;  %vm1402_vm15 = vcmp.lt.s32.totalorder %v1401_v12, 2  ;;  %v7694_v57 = vpop.permute.xlu1 %5005  ;;  %s5248_s18 = sshll.u32 %s5410_s16, 4  ;;  %s5249_s18 = int_to_ptr.vmem [resolvable:$true] %s5248_s18 }
 0x288   :  { %v1405_v5 = vsel %vm1403_vm0, %v8099_v49, %v8098_v62  ;;  %v1408_v22 = vsel %vm1406_vm3, %v8100_v3, %v8097_v21  ;;  %vm1556_vm8 = vcmp.lt.s32.totalorder %v1555_v19, 2  ;;  %vm1557_vm6 = vcmp.eq.s32.totalorder %v1555_v19, 0  ;;  %v8119_v49 = vld [vmem:[#allocation39_spill] sm:$0xff] }
 0x289   :  { %5089 = vrot.lane.b32.xlu1 %v4981_v26, %s5409_s17  ;;  %v1409_v13 = vsel %vm1402_vm15, %v1405_v5, %v1408_v22  ;;  %vm1560_vm1 = vcmp.eq.s32.totalorder %v1555_v19, 2  ;;  %v1559_v0 = vsel %vm1557_vm6, %v8105_v46, %v8104_v7  ;;  %v1863_v26 = vand.u32 3, %v8109_v33  ;;  %v8120_v3 = vld [vmem:[#allocation51_spill] sm:$0xff]  ;;  %v8122_v22 = vld [vmem:[#allocation50_spill] sm:$0xff]  ;;  %v8127_v33 = vld [vmem:[#allocation28_spill] sm:$0xff] }
 0x28a   :  { %v1410_v45 = vsel %vm8102_vm9, nan, %v1409_v13  ;;  %v1562_v6 = vsel %vm1560_vm1, %v8106_v37, %v8103_v39  ;;  %vm2018_vm0 = vcmp.lt.s32.totalorder %v2017_v56, 2  ;;  %vm2019_vm3 = vcmp.eq.s32.totalorder %v2017_v56, 0 }
 0x28b   :  { %v1563_v61 = vsel %vm1556_vm8, %v1559_v0, %v1562_v6  ;;  %v7671_v55 = vsel %vm5177_vm11, %v1410_v45, %v5018_v52  ;;  %vm1865_vm7 = vcmp.eq.s32.totalorder %v1863_v26, 0  ;;  %vm1868_vm13 = vcmp.eq.s32.totalorder %v1863_v26, 2 }
 0x28c   :  { %v7668_v28 = vsel %vm8108_vm5, nan, %v1563_v61  ;;  %vm1864_vm2 = vcmp.lt.s32.totalorder %v1863_v26, 2  ;;  %vm2022_vm15 = vcmp.eq.s32.totalorder %v2017_v56, 2  ;;  %vm8116_vm8 = vweird.f32 %v8115_v11  ;;  %v8135_v11 = vld [vmem:[#allocation42_spill] sm:$0xff] }
 0x28d   :  { %v2021_v25 = vsel %vm2019_vm3, %v7494_v54, %v2020_v29  ;;  %v2024_v12 = vsel %vm2022_vm15, %v2023_v43, %v7496_v15  ;;  %v8118_v54 = vld [vmem:[#allocation49_spill] sm:$0xff]  ;;  %v2479_v43 = vand.u32 3, %v7564_v36  ;;  %v4980_v5 = vsub.f32 0.0, %v8119_v49 }
 0x28e   :  { %5131 = vrot.lane.b32.xlu0 %v7615_v8, %s5408_s0  ;;  %5085 = vrot.lane.b32.xlu2 %v4979_v18, %s5409_s17  ;;  %v8112_v18 = vxor.u32 2147483648, %v8111_v58  ;;  %v2025_v4 = vsel %vm2018_vm0, %v2021_v25, %v2024_v12  ;;  %v5024_v19 = vpop.permute.xlu2 %5023  ;;  %v2325_v15 = vand.u32 3, %v8118_v54  ;;  %v8121_v41 = vxor.u32 2147483648, %v8120_v3 }
 0x28f   :  { %v7699_v62 = vsel %vm2016_vm12, nan, %v2025_v4  ;;  %v8123_v30 = vxor.u32 2147483648, %v8122_v22  ;;  %vm2480_vm12 = vcmp.lt.s32.totalorder %v2479_v43, 2  ;;  %v5008_v6 = vpop.permute.xlu1 %5007  ;;  %v8128_v56 = vxor.u32 2147483648, %v8127_v33 }
 0x290   :  { %vm2326_vm1 = vcmp.lt.s32.totalorder %v2325_v15, 2  ;;  %vm2327_vm9 = vcmp.eq.s32.totalorder %v2325_v15, 0  ;;  %vm2330_vm5 = vcmp.eq.s32.totalorder %v2325_v15, 2  ;;  %v8136_v25 = vxor.u32 2147483648, %v8135_v11  ;;  %v5002_v15 = vpop.permute.xlu0 %5001 }
 0x291   :  { %5095 = vrot.lane.b32.xlu1 %v4984_v50, %s5409_s17  ;;  %v1867_v50 = vsel %vm1865_vm7, %v8113_v14, %v8112_v18  ;;  %v2329_v13 = vsel %vm2327_vm9, %v8122_v22, %v8121_v41  ;;  %vm2481_vm7 = vcmp.eq.s32.totalorder %v2479_v43, 0  ;;  %v8131_v14 = vld [vmem:[#allocation15_spill] sm:$0xff]  ;;  %v2171_v4 = vand.u32 3, %v7334_v27 }
 0x292   :  { %v2483_v36 = vsel %vm2481_vm7, %v7583_v24, %v2482_v59  ;;  %v8125_v59 = vld [vmem:[#allocation29_spill] sm:$0xff]  ;;  %vm8132_vm15 = vweird.f32 %v8131_v14 }
 0x293   :  { %v8126_v23 = vxor.u32 2147483648, %v8125_v59  ;;  %vm2172_vm9 = vcmp.lt.s32.totalorder %v2171_v4, 2 }
 0x296   :  { %5137 = vrot.lane.b32.xlu0 %v794_v17, %s5408_s0  ;;  %5091 = vrot.lane.b32.xlu2 %v4982_v16, %s5409_s17  ;;  %v4977_v17 = vsub.f32 0.0, %v8110_v53  ;;  %v5030_v37 = vpop.permute.xlu2 %5029 }
 0x299   :  { %5145 = vrot.lane.b32.xlu1 %v1410_v45, %s5408_s0  ;;  %v2332_v45 = vsel %vm2330_vm5, %v8123_v30, %v8120_v3  ;;  %vm5194_vm5 = vcmask 523264  }
 0x29a   :  { %v2333_v39 = vsel %vm2326_vm1, %v2329_v13, %v2332_v45  ;;  %v5004_v45 = vpop.permute.xlu0 %5003 }
 0x29b   :  { %v2334_v46 = vsel %vm2324_vm14, nan, %v2333_v39 }
 0x29c   :  { %v7726_v52 = vsel %vm5177_vm11, %v2334_v46, %v5030_v37 }
 0x29e   :  { %5069 = vrot.lane.b32.xlu0 %v4971_v35, %s5409_s17  ;;  %5147 = vrot.lane.b32.xlu2 %v7668_v28, %s5408_s0  ;;  %v1870_v35 = vsel %vm1868_vm13, %v8114_v60, %v8111_v58  ;;  %v5016_v60 = vpop.permute.xlu1 %5015 }
 0x29f   :  { %v1871_v16 = vsel %vm1864_vm2, %v1867_v50, %v1870_v35  ;;  %vm2484_vm2 = vcmp.eq.s32.totalorder %v2479_v43, 2  ;;  %v8133_v35 = vld [vmem:[#allocation43_spill] sm:$0xff] }
 0x2a0   :  { %v1872_v47 = vsel %vm8116_vm8, nan, %v1871_v16  ;;  %v2486_v0 = vsel %vm2484_vm2, %v2485_v44, %v7586_v32  ;;  %v8129_v32 = vld [vmem:[#allocation41_spill] sm:$0xff]  ;;  %v8134_v16 = vxor.u32 2147483648, %v8133_v35  ;;  %vm2173_vm8 = vcmp.eq.s32.totalorder %v2171_v4, 0 }
 0x2a1   :  { %5151 = vrot.lane.b32.xlu1 %v1872_v47, %s5408_s0  ;;  %v7702_v29 = vsel %vm5177_vm11, %v1872_v47, %v5024_v19  ;;  %v2487_v61 = vsel %vm2480_vm12, %v2483_v36, %v2486_v0  ;;  %v1709_v44 = vand.u32 3, %v8129_v32 }
 0x2a2   :  { %v7737_v24 = vsel %vm2478_vm10, nan, %v2487_v61 }
 0x2a3   :  { %vm1711_vm14 = vcmp.eq.s32.totalorder %v1709_v44, 0  ;;  %vm1714_vm3 = vcmp.eq.s32.totalorder %v1709_v44, 2  ;;  %vm1710_vm10 = vcmp.lt.s32.totalorder %v1709_v44, 2 }
 0x2a4   :  { %v1713_v47 = vsel %vm1711_vm14, %v8135_v11, %v8134_v16  ;;  %v1716_v12 = vsel %vm1714_vm3, %v8136_v25, %v8133_v35 }
 0x2a6   :  { %5075 = vrot.lane.b32.xlu0 %v4974_v34, %s5409_s17  ;;  %v8117_v34 = vld [vmem:[#allocation26_spill] sm:$0xff]  ;;  %5153 = vrot.lane.b32.xlu2 %v7699_v62, %s5408_s0  ;;  %v5022_v43 = vpop.permute.xlu1 %5021 }
 0x2a7   :  { %v1247_v21 = vand.u32 3, %v8117_v34  ;;  %v1717_v34 = vsel %vm1710_vm10, %v1713_v47, %v1716_v12 }
 0x2a9   :  { %vm1249_vm6 = vcmp.eq.s32.totalorder %v1247_v21, 0  ;;  %vm1252_vm13 = vcmp.eq.s32.totalorder %v1247_v21, 2  ;;  %5157 = vrot.lane.b32.xlu1 %v2334_v46, %s5408_s0  ;;  %vm1248_vm0 = vcmp.lt.s32.totalorder %v1247_v21, 2  ;;  %v8137_v21 = vld [vmem:[#allocation27_spill] sm:$0xff] }
 0x2aa   :  { %v1251_v26 = vsel %vm1249_vm6, %v8127_v33, %v8126_v23  ;;  %v1254_v53 = vsel %vm1252_vm13, %v8128_v56, %v8125_v59  ;;  %vm2176_vm6 = vcmp.eq.s32.totalorder %v2171_v4, 2  ;;  %vm8138_vm1 = vweird.f32 %v8137_v21 }
 0x2ab   :  { %v1255_v18 = vsel %vm1248_vm0, %v1251_v26, %v1254_v53  ;;  %v1718_v54 = vsel %vm8138_vm1, nan, %v1717_v34  ;;  %v2178_v27 = vsel %vm2176_vm6, %v2177_v10, %v7420_v31  ;;  %v5178_v10 = vsel %vm5177_vm11, %v7523_v20, %v5002_v15 }
 0x2ac   :  { %v1256_v50 = vsel %vm8132_vm15, nan, %v1255_v18  ;;  %v5188_v49 = vsel %vm5177_vm11, %v1718_v54, %v5022_v43  ;;  %v5181_v33 = vsel %vm5177_vm11, %v7554_v2, %v5008_v6  ;;  %v5180_v15 = vsel %vm5177_vm11, %v7475_v48, %v7694_v57 }
 0x2ad   :  { %v5185_v51 = vsel %vm5177_vm11, %v1256_v50, %v5016_v60 }
 0x2ae   :  { %5081 = vrot.lane.b32.xlu0 %v4977_v17, %s5409_s17  ;;  %5159 = vrot.lane.b32.xlu2 %v7737_v24, %s5408_s0  ;;  %v8130_v17 = vld [vmem:[#allocation52_spill] sm:$0xff]  ;;  %v5028_v13 = vpop.permute.xlu1 %5027 }
 0x2af   :  { %v4983_v58 = vsub.f32 0.0, %v8130_v17 }
 0x2b3   :  { %v5130_v19 = vpop.permute.xlu2 %5129 }
 0x2b6   :  { %5087 = vrot.lane.b32.xlu0 %v4980_v5, %s5409_s17  ;;  %v2175_v5 = vsel %vm2173_vm8, %v7411_v40, %v2174_v9  ;;  %v5014_v9 = vpop.permute.xlu0 %5013 }
 0x2b7   :  { %v2179_v41 = vsel %vm2172_vm9, %v2175_v5, %v2178_v27  ;;  %v5184_v44 = vsel %vm5177_vm11, %v7576_v38, %v5014_v9 }
 0x2b8   :  { %v2180_v22 = vsel %vm2170_vm4, nan, %v2179_v41  ;;  %vm5211_vm4 = vcmask 785408  }
 0x2b9   :  { %v5191_v30 = vsel %vm5177_vm11, %v2180_v22, %v5028_v13 }
 0x2bb   :  { %v5134_v36 = vpop.permute.xlu1 %5133 }
 0x2be   :  { %5093 = vrot.lane.b32.xlu0 %v4983_v58, %s5409_s17  ;;  %v5020_v31 = vpop.permute.xlu0 %5019 }
 0x2bf   :  { %v5187_v60 = vsel %vm5177_vm11, %v7668_v28, %v5020_v31 }
 0x2c0   :  { %v5136_v3 = vpop.permute.xlu2 %5135 }
 0x2c6   :  { %5143 = vrot.lane.b32.xlu0 %v1256_v50, %s5408_s0  ;;  %v5179_v50 = vsel %vm5177_vm11, %v7615_v8, %v5004_v45 }
 0x2c8   :  { %v5142_v39 = vpop.permute.xlu2 %5141 }
 0x2ce   :  { %5149 = vrot.lane.b32.xlu0 %v1718_v54, %s5408_s0 }
 0x2d0   :  { %v5068_v7 = vpop.permute.xlu2 %5067 }
 0x2d3   :  { %v7769_v46 = vpop.permute.xlu1 %5139 }
 0x2d4   :  { %v5026_v23 = vpop.permute.xlu0 %5025 }
 0x2d5   :  { %v5190_v12 = vsel %vm5177_vm11, %v7699_v62, %v5026_v23 }
 0x2d6   :  { %5155 = vrot.lane.b32.xlu0 %v2180_v22, %s5408_s0 }
 0x2d8   :  { %v5074_v40 = vpop.permute.xlu2 %5073 }
 0x2d9   :  { %v5199_v8 = vsel %vm5194_vm5, %v7635_v1, %v5074_v40 }
 0x2db   :  { %v5066_v42 = vpop.permute.xlu1 %5065 }
 0x2dc   :  { %v5195_v0 = vsel %vm5194_vm5, %v5178_v10, %v5066_v42 }
 0x2dd   :  { %v5212_v37 = vsel %vm5211_vm4, %v5195_v0, %v5130_v19 }
 0x2de   :  { %5228 = vst [vmem:[#allocation2] sm:$0xff] %v5212_v37 }
 0x2e0   :  { %v5080_v61 = vpop.permute.xlu2 %5079 }
 0x2e1   :  { %v7776_v59 = vsel %vm5194_vm5, %v5185_v51, %v5080_v61  ;;  %v5196_v51 = vsel %vm5194_vm5, %v5179_v50, %v5068_v7 }
 0x2e3   :  { %v5072_v26 = vpop.permute.xlu1 %5071 }
 0x2e4   :  { %v5198_v56 = vsel %vm5194_vm5, %v5181_v33, %v5072_v26 }
 0x2e5   :  { %v5215_v20 = vsel %vm5211_vm4, %v5198_v56, %v5136_v3 }
 0x2e6   :  { %5231 = vst [vmem:[#allocation2 + $0x18] sm:$0xff] %v5215_v20 }
 0x2e8   :  { %v5086_v53 = vpop.permute.xlu2 %5085 }
 0x2e9   :  { %v7783_v32 = vsel %vm5194_vm5, %v5188_v49, %v5086_v53 }
 0x2eb   :  { %v5078_v58 = vpop.permute.xlu1 %5077 }
 0x2ec   :  { %v5201_v18 = vsel %vm5194_vm5, %v5184_v44, %v5078_v58 }
 0x2ed   :  { %v5218_v14 = vsel %vm5211_vm4, %v5201_v18, %v5142_v39 }
 0x2ee   :  { %5234 = vst [vmem:[#allocation2 + $0x30] sm:$0xff] %v5218_v14 }
 0x2f0   :  { %v5092_v2 = vpop.permute.xlu2 %5091 }
 0x2f1   :  { %v7790_v6 = vsel %vm5194_vm5, %v5191_v30, %v5092_v2 }
 0x2f3   :  { %v5084_v35 = vpop.permute.xlu1 %5083 }
 0x2f4   :  { %v5204_v11 = vsel %vm5194_vm5, %v5187_v60, %v5084_v35 }
 0x2f8   :  { %v5032_v17 = vpop.permute.xlu0 %5031  ;;  %v5148_v47 = vpop.permute.xlu2 %5147 }
 0x2f9   :  { %v5221_v25 = vsel %vm5211_vm4, %v5204_v11, %v5148_v47  ;;  %v5193_v62 = vsel %vm5177_vm11, %v7737_v24, %v5032_v17 }
 0x2fa   :  { %5237 = vst [vmem:[#allocation2 + $0x48] sm:$0xff] %v5221_v25 }
 0x2fb   :  { %v5090_v4 = vpop.permute.xlu1 %5089 }
 0x2fc   :  { %v5207_v34 = vsel %vm5194_vm5, %v5190_v12, %v5090_v4 }
 0x300   :  { %v5132_v38 = vpop.permute.xlu0 %5131  ;;  %v5154_v21 = vpop.permute.xlu2 %5153 }
 0x301   :  { %v5213_v16 = vsel %vm5211_vm4, %v5196_v51, %v5132_v38  ;;  %v5224_v54 = vsel %vm5211_vm4, %v5207_v34, %v5154_v21 }
 0x302   :  { %5229 = vst [vmem:[#allocation2 + $0x8] sm:$0xff] %v5213_v16 }
 0x303   :  { %5240 = vst [vmem:[#allocation2 + $0x60] sm:$0xff] %v5224_v54  ;;  %v5096_v1 = vpop.permute.xlu1 %5095 }
 0x304   :  { %v5210_v5 = vsel %vm5194_vm5, %v5193_v62, %v5096_v1 }
 0x308   :  { %v5138_v28 = vpop.permute.xlu0 %5137  ;;  %v5160_v3 = vpop.permute.xlu2 %5159 }
 0x309   :  { %v5216_v19 = vsel %vm5211_vm4, %v5199_v8, %v5138_v28  ;;  %v5227_v41 = vsel %vm5211_vm4, %v5210_v5, %v5160_v3 }
 0x30a   :  { %5232 = vst [vmem:[#allocation2 + $0x20] sm:$0xff] %v5216_v19 }
 0x30b   :  { %5243 = vst [vmem:[#allocation2 + $0x78] sm:$0xff] %v5227_v41  ;;  %v5146_v24 = vpop.permute.xlu1 %5145 }
 0x310   :  { %v5070_v43 = vpop.permute.xlu0 %5069 }
 0x311   :  { %v5197_v49 = vsel %vm5194_vm5, %v5180_v15, %v5070_v43 }
 0x312   :  { %v5214_v27 = vsel %vm5211_vm4, %v5197_v49, %v5134_v36 }
 0x313   :  { %5230 = vst [vmem:[#allocation2 + $0x10] sm:$0xff] %v5214_v27  ;;  %v5152_v39 = vpop.permute.xlu1 %5151 }
 0x318   :  { %v5076_v22 = vpop.permute.xlu0 %5075 }
 0x319   :  { %v5200_v48 = vsel %vm5194_vm5, %v7644_v63, %v5076_v22 }
 0x31a   :  { %v5217_v57 = vsel %vm5211_vm4, %v5200_v48, %v7769_v46 }
 0x31b   :  { %5233 = vst [vmem:[#allocation2 + $0x28] sm:$0xff] %v5217_v57  ;;  %v5158_v63 = vpop.permute.xlu1 %5157 }
 0x320   :  { %v5082_v13 = vpop.permute.xlu0 %5081 }
 0x321   :  { %v5203_v30 = vsel %vm5194_vm5, %v7671_v55, %v5082_v13 }
 0x322   :  { %v5220_v45 = vsel %vm5211_vm4, %v5203_v30, %v5146_v24 }
 0x323   :  { %5236 = vst [vmem:[#allocation2 + $0x40] sm:$0xff] %v5220_v45 }
 0x328   :  { %v5088_v36 = vpop.permute.xlu0 %5087 }
 0x329   :  { %v5206_v9 = vsel %vm5194_vm5, %v7702_v29, %v5088_v36 }
 0x32a   :  { %v5223_v7 = vsel %vm5211_vm4, %v5206_v9, %v5152_v39 }
 0x32b   :  { %5239 = vst [vmem:[#allocation2 + $0x58] sm:$0xff] %v5223_v7 }
 0x330   :  { %v5094_v40 = vpop.permute.xlu0 %5093 }
 0x331   :  { %v5209_v46 = vsel %vm5194_vm5, %v7726_v52, %v5094_v40 }
 0x332   :  { %v5226_v31 = vsel %vm5211_vm4, %v5209_v46, %v5158_v63 }
 0x333   :  { %5242 = vst [vmem:[#allocation2 + $0x70] sm:$0xff] %v5226_v31 }
 0x338   :  { %v5144_v55 = vpop.permute.xlu0 %5143 }
 0x339   :  { %v5219_v10 = vsel %vm5211_vm4, %v7776_v59, %v5144_v55 }
 0x33a   :  { %5235 = vst [vmem:[#allocation2 + $0x38] sm:$0xff] %v5219_v10 }
 0x340   :  { %v5150_v42 = vpop.permute.xlu0 %5149 }
 0x341   :  { %v5222_v29 = vsel %vm5211_vm4, %v7783_v32, %v5150_v42 }
 0x342   :  { %5238 = vst [vmem:[#allocation2 + $0x50] sm:$0xff] %v5222_v29 }
 0x348   :  { %v5156_v52 = vpop.permute.xlu0 %5155 }
 0x349   :  { %v5225_v0 = vsel %vm5211_vm4, %v7790_v6, %v5156_v52 }
 0x34a   :  { %5241 = vst [vmem:[#allocation2 + $0x68] sm:$0xff] %v5225_v0 }
 0x34b   :  { %5256 = dma.vmem_to_hbm [thread:$0]  %s5249_s18, 2048, %s5251_s21, [#allocation3], %s5411_s22, %s5411_s22, %s5412_s23  }
 0x34c   :  { %5398 = dma.done.wait [#allocation3], 2048  }
 0x34d   :  { %5399 = vsyncadd [#allocation3], 4294965248 }
 0x34e   :  { %5261 = vsyncpa [#allocation3], 1 }

</bundles_post_ra>
